<compile_context>
chip_gen: v5e
topology: v5e:2x2
jax: 0.10.0
libtpu: 0.0.40
codegen_flags: <defaults>
</compile_context>

<pallas_src>
import functools
import math

import jax
import jax.numpy as jnp
from jax.experimental import pallas as pl
from jax.experimental.pallas import tpu as pltpu

LN_EPS = 1e-5


# ----------------------------- Pallas kernels --------------------------------
def encode_kernel(x_ref, wle_ref, ble_ref, g1_ref, b1_ref, wqkv_ref, bqkv_ref,
                  x1_ref, qkv_ref, s_ref):
    """j==0: x1 = x + x @ W_le + b_le ; s = LayerNorm1(x1) (kept in VMEM scratch).
    every j: qkv[:, j-tile] = s @ W_qkv[:, j-tile] + b_qkv[j-tile]."""
    @pl.when(pl.program_id(1) == 0)
    def _():
        x = x_ref[...].astype(jnp.float32)
        x1 = x + jnp.dot(x.astype(jnp.bfloat16), wle_ref[...],
                         preferred_element_type=jnp.float32) + ble_ref[...]
        mu = jnp.mean(x1, axis=-1, keepdims=True)
        xc = x1 - mu
        var = jnp.mean(xc * xc, axis=-1, keepdims=True)
        s = xc * jax.lax.rsqrt(var + LN_EPS) * g1_ref[...] + b1_ref[...]
        x1_ref[...] = x1.astype(x1_ref.dtype)
        s_ref[...] = s.astype(s_ref.dtype)

    qkv = jnp.dot(s_ref[...], wqkv_ref[...],
                  preferred_element_type=jnp.float32) + bqkv_ref[...]
    qkv_ref[...] = qkv.astype(qkv_ref.dtype)


def attention_kernel(qkv_ref, o_ref, *, num_heads, head_dim, embed_dim):
    """Per-(p, B) batch softmax attention over the patch-grid axis L; heads are
    sliced directly out of the fused qkv lanes (attn scale pre-folded into W_q)."""
    qkv = qkv_ref[...].astype(jnp.float32)                 # (bt, L, 3E)
    outs = []
    for h in range(num_heads):
        lo = h * head_dim
        q = qkv[:, :, lo:lo + head_dim].astype(jnp.bfloat16)
        k = qkv[:, :, embed_dim + lo:embed_dim + lo + head_dim].astype(jnp.bfloat16)
        v = qkv[:, :, 2 * embed_dim + lo:2 * embed_dim + lo + head_dim]
        s = jnp.einsum('bld,bmd->blm', q, k, preferred_element_type=jnp.float32)
        m = jnp.max(s, axis=-1, keepdims=True)
        e = jnp.exp(s - m)
        p = e * pl.reciprocal(jnp.sum(e, axis=-1, keepdims=True), approx=True)
        outs.append(jnp.einsum('blm,bmd->bld', p.astype(jnp.bfloat16),
                               v.astype(jnp.bfloat16),
                               preferred_element_type=jnp.float32))
    o_ref[...] = jnp.concatenate(outs, axis=-1).astype(o_ref.dtype)


def out_mlp_kernel(a_ref, x1_ref, wo_ref, g2_ref, b2_ref,
                   wm1_ref, bm1_ref, wm2_ref, bm2_ref, y_ref):
    """h = x1 + attn @ W_out ; z = LayerNorm2(h) ; y = relu(z@W1+b1)@W2+b2 + z."""
    h = x1_ref[...].astype(jnp.float32) + jnp.dot(
        a_ref[...], wo_ref[...], preferred_element_type=jnp.float32)
    mu = jnp.mean(h, axis=-1, keepdims=True)
    hc = h - mu
    var = jnp.mean(hc * hc, axis=-1, keepdims=True)
    z = hc * jax.lax.rsqrt(var + LN_EPS) * g2_ref[...] + b2_ref[...]
    hmid = jnp.maximum(
        jnp.dot(z.astype(jnp.bfloat16), wm1_ref[...],
                preferred_element_type=jnp.float32) + bm1_ref[...], 0.0)
    y = jnp.dot(hmid.astype(jnp.bfloat16), wm2_ref[...],
                preferred_element_type=jnp.float32) + bm2_ref[...] + z
    y_ref[...] = y.astype(y_ref.dtype)


# --------------------------- tiling / budgeting helpers -----------------------
def _pick_block(n, target, multiples):
    """Largest divisor of n that is a multiple of one of `multiples`, <= target and
    (when possible) <= n//2 so the 'parallel' grid axis has >=2 steps (v7x has two
    TensorCores). Falls back to the full dim (legal under the (8,128)/full rule)."""
    caps = [min(target, n // 2), target]
    for mult in multiples:
        for cap in caps:
            best, d = 0, mult
            while d <= min(cap, n):
                if n % d == 0:
                    best = d
                d += mult
            if best:
                return best
    # TODO(synk): very large token counts not divisible by 8 fall back to one
    # resident slab; pad the token axis upstream if that ever happens in practice.
    return n


def _pick_weight_tile(n, target=768):
    """QKV-weight output-dim tile: prefer multiples of 256 (v6e/v7x MXU is 256 wide),
    then 128 (v5e); fall back to the full dim."""
    for mult in (256, 128):
        best, d = 0, mult
        while d <= min(target, n):
            if n % d == 0:
                best = d
            d += mult
        if best:
            return best
    return n


def _bytes(shape, dtype):
    return math.prod(shape) * jnp.dtype(dtype).itemsize


def _vmem_limit(block_bytes, scratch_bytes=0):
    """Scoped-VMEM budget from the tile plan: 2x (double-buffered pipeline) per-step
    blocks + scratch + headroom, capped below v7x's 64 MiB physical VMEM."""
    need = 2 * sum(block_bytes) + scratch_bytes + (1 << 20)
    return int(min(max(need, 4 << 20), 60 << 20))


# ------------------------------ pallas_call wrappers --------------------------
def _encode(x_tok, pp):
    T, E = x_tok.shape
    E3 = pp['w_qkv_t'].shape[1]
    tm = _pick_block(T, 512, (16, 8))          # token tile (bf16-friendly sublanes)
    tn = _pick_weight_tile(E3)
    blocks = [((tm, E), x_tok.dtype), ((E, E), jnp.bfloat16), ((1, E), jnp.float32),
              ((1, E), jnp.float32), ((1, E), jnp.float32), ((E, tn), jnp.bfloat16),
              ((1, tn), jnp.float32), ((tm, E), jnp.float32), ((tm, tn), jnp.bfloat16)]
    return pl.pallas_call(
        encode_kernel,
        out_shape=(jax.ShapeDtypeStruct((T, E), jnp.float32),    # x1 residual (f32)
                   jax.ShapeDtypeStruct((T, E3), jnp.bfloat16)), # qkv (matmul operand)
        grid=(T // tm, E3 // tn),
        in_specs=[
            pl.BlockSpec((tm, E), lambda i, j: (i, 0)),
            pl.BlockSpec((E, E), lambda i, j: (0, 0)),
            pl.BlockSpec((1, E), lambda i, j: (0, 0)),
            pl.BlockSpec((1, E), lambda i, j: (0, 0)),
            pl.BlockSpec((1, E), lambda i, j: (0, 0)),
            pl.BlockSpec((E, tn), lambda i, j: (0, j)),
            pl.BlockSpec((1, tn), lambda i, j: (0, j)),
        ],
        out_specs=(pl.BlockSpec((tm, E), lambda i, j: (i, 0)),
                   pl.BlockSpec((tm, tn), lambda i, j: (i, j))),
        scratch_shapes=[pltpu.VMEM((tm, E), jnp.bfloat16)],
        compiler_params=pltpu.CompilerParams(
            dimension_semantics=("parallel", "arbitrary"),
            vmem_limit_bytes=_vmem_limit([_bytes(*b) for b in blocks],
                                         _bytes((tm, E), jnp.bfloat16))),
    )(x_tok, pp['w_le_t'], pp['b_le'], pp['g1'], pp['b1'],
      pp['w_qkv_t'], pp['b_qkv'])


def _attention(qkv, num_heads):
    pB, L, E3 = qkv.shape
    E = E3 // 3
    hd = E // num_heads
    bt = _pick_block(pB, 128, (1,))            # many (p, B) groups per grid step
    blocks = [((bt, L, E3), jnp.bfloat16), ((bt, L, E), jnp.bfloat16)]
    return pl.pallas_call(
        functools.partial(attention_kernel, num_heads=num_heads,
                          head_dim=hd, embed_dim=E),
        out_shape=jax.ShapeDtypeStruct((pB, L, E), jnp.bfloat16),
        grid=(pB // bt,),
        in_specs=[pl.BlockSpec((bt, L, E3), lambda i: (i, 0, 0))],
        out_specs=pl.BlockSpec((bt, L, E), lambda i: (i, 0, 0)),
        compiler_params=pltpu.CompilerParams(
            dimension_semantics=("parallel",),
            vmem_limit_bytes=_vmem_limit([_bytes(*b) for b in blocks])),
    )(qkv)


def _out_mlp(attn_tok, x1_tok, pp, out_dtype):
    T, E = attn_tok.shape
    hid = pp['w_m1_t'].shape[1]
    tm = _pick_block(T, 512, (16, 8))
    blocks = [((tm, E), jnp.bfloat16), ((tm, E), jnp.float32), ((E, E), jnp.bfloat16),
              ((1, E), jnp.float32), ((1, E), jnp.float32), ((E, hid), jnp.bfloat16),
              ((1, hid), jnp.float32), ((hid, E), jnp.bfloat16), ((1, E), jnp.float32),
              ((tm, E), out_dtype)]
    return pl.pallas_call(
        out_mlp_kernel,
        out_shape=jax.ShapeDtypeStruct((T, E), out_dtype),
        grid=(T // tm,),
        in_specs=[
            pl.BlockSpec((tm, E), lambda i: (i, 0)),
            pl.BlockSpec((tm, E), lambda i: (i, 0)),
            pl.BlockSpec((E, E), lambda i: (0, 0)),
            pl.BlockSpec((1, E), lambda i: (0, 0)),
            pl.BlockSpec((1, E), lambda i: (0, 0)),
            pl.BlockSpec((E, hid), lambda i: (0, 0)),
            pl.BlockSpec((1, hid), lambda i: (0, 0)),
            pl.BlockSpec((hid, E), lambda i: (0, 0)),
            pl.BlockSpec((1, E), lambda i: (0, 0)),
        ],
        out_specs=pl.BlockSpec((tm, E), lambda i: (i, 0)),
        compiler_params=pltpu.CompilerParams(
            dimension_semantics=("parallel",),
            vmem_limit_bytes=_vmem_limit([_bytes(*b) for b in blocks])),
    )(attn_tok, x1_tok, pp['w_out_t'], pp['g2'], pp['b2'],
      pp['w_m1_t'], pp['b_m1'], pp['w_m2_t'], pp['b_m2'])


# ------------------------------ parameter preparation -------------------------
def prepare_params(params, num_heads):
    """One-time kernel-side parameter prep: transpose to (in, out) layout, cast
    weights to bf16 (MXU operands), fold the attention scale into the q-third of
    in_proj weight/bias, zero-pad the MLP hidden dim to a multiple of 128
    (numerically exact), and reshape biases / LN params to (1, .) f32."""
    E = params['w_le'].shape[0]
    head_dim = E // num_heads
    scale = head_dim ** (-0.5)
    bf16 = jnp.bfloat16

    qscale = jnp.concatenate([jnp.full((E,), scale, jnp.float32),
                              jnp.ones((2 * E,), jnp.float32)])
    w_qkv_t = (params['w_in'] * qscale[:, None]).T          # (E, 3E), q pre-scaled
    b_qkv = (params['b_in'] * qscale).reshape(1, 3 * E)

    hid = params['w_m1'].shape[0]
    hid_p = max(128, ((hid + 127) // 128) * 128)
    w_m1_t = jnp.pad(params['w_m1'].T, ((0, 0), (0, hid_p - hid)))
    b_m1 = jnp.pad(params['b_m1'], (0, hid_p - hid)).reshape(1, hid_p)
    w_m2_t = jnp.pad(params['w_m2'].T, ((0, hid_p - hid), (0, 0)))

    return dict(
        w_le_t=params['w_le'].T.astype(bf16), b_le=params['b_le'].reshape(1, E),
        g1=params['g1'].reshape(1, E), b1=params['b1'].reshape(1, E),
        w_qkv_t=w_qkv_t.astype(bf16), b_qkv=b_qkv,
        w_out_t=params['w_out'].T.astype(bf16),
        g2=params['g2'].reshape(1, E), b2=params['b2'].reshape(1, E),
        w_m1_t=w_m1_t.astype(bf16), b_m1=b_m1,
        w_m2_t=w_m2_t.astype(bf16), b_m2=params['b_m2'].reshape(1, E))


# ------------------------------ BSABlock forward ------------------------------
def bsablock_pallas(x, prepared, *, H, W, patch_dim, num_heads):
    """Forward pass of BSABlock (eval mode; all dropout p=0.0)."""
    B, p, N, C = x.shape
    assert N == H * W and H % patch_dim == 0 and W % patch_dim == 0
    E = C * patch_dim * patch_dim
    Hp, Wp = H // patch_dim, W // patch_dim
    L = Hp * Wp
    T = p * B * L

    # ---- unfold + the module's reshape scramble, flattened to (p, B, L) token order
    # so the attention kernel can slice heads straight out of the qkv lanes.
    xi = jnp.transpose(x, (0, 1, 3, 2)).reshape(B * p, C, H, W)
    xu = xi.reshape(B * p, C, Hp, patch_dim, Wp, patch_dim)
    xu = jnp.transpose(xu, (0, 1, 3, 5, 2, 4)).reshape(B * p, E, L)   # F.unfold(k=s)
    xt = jnp.transpose(xu.reshape(p, B, E, L), (0, 1, 3, 2))          # (p, B, L, E)
    x_tok = xt.reshape(T, E)

    # ---- stage 1: linear_encoding residual + LayerNorm1 + fused QKV projection ---
    x1_tok, qkv = _encode(x_tok, prepared)

    # ---- stage 2: multi-head attention over the patch-grid axis (seq = L) --------
    attn = _attention(qkv.reshape(p * B, L, 3 * E), num_heads)        # (p*B, L, E)
    attn_tok = attn.reshape(T, E)

    # ---- stage 3: out_proj + residual, LayerNorm2, MLP + residual ----------------
    y_tok = _out_mlp(attn_tok, x1_tok, prepared, x.dtype)

    # ---- fold + inverse layout glue ----------------------------------------------
    y = jnp.transpose(y_tok.reshape(p, B, L, E), (1, 0, 2, 3))   # torch transpose(0,2)
    y = jnp.swapaxes(y.reshape(B * p, L, E), 1, 2)               # (B*p, E, L)
    yf = y.reshape(B * p, C, patch_dim, patch_dim, Hp, Wp)
    yf = jnp.transpose(yf, (0, 1, 4, 2, 5, 3)).reshape(B * p, C, H, W)   # F.fold
    return jnp.transpose(yf.reshape(B, p, C, N), (0, 1, 3, 2))


# ------------------------------ pure-JAX reference ----------------------------
def _layer_norm(x, g, b):
    mu = jnp.mean(x, axis=-1, keepdims=True)
    xc = x - mu
    var = jnp.mean(xc * xc, axis=-1, keepdims=True)
    return xc * jax.lax.rsqrt(var + LN_EPS) * g + b


def _linear_bf16(x, w, b=None):
    """nn.Linear with bf16 operands + f32 accumulation (the kernels' MXU policy)."""
    y = jnp.einsum('...i,oi->...o', x.astype(jnp.bfloat16), w.astype(jnp.bfloat16),
                   preferred_element_type=jnp.float32)
    return y if b is None else y + b


def bsablock_reference(x, params, *, H, W, patch_dim, num_heads):
    B, p, N, C = x.shape
    E = C * patch_dim * patch_dim
    Hp, Wp = H // patch_dim, W // patch_dim
    L = Hp * Wp
    head_dim = E // num_heads
    scale = head_dim ** (-0.5)
    bf16 = jnp.bfloat16

    xi = jnp.transpose(x, (0, 1, 3, 2)).reshape(B * p, C, H, W)
    xu = xi.reshape(B * p, C, Hp, patch_dim, Wp, patch_dim)
    xu = jnp.transpose(xu, (0, 1, 3, 5, 2, 4)).reshape(B * p, E, L)
    t = jnp.transpose(xu, (2, 0, 1)).reshape(L, p, B, E)

    t = t + _linear_bf16(t, params['w_le'], params['b_le'])
    src2 = _layer_norm(t, params['g1'], params['b1'])

    qkv = _linear_bf16(src2, params['w_in'], params['b_in'])
    q, k, v = jnp.split(qkv, 3, axis=-1)
    q = q * scale
    BH = p * B * num_heads
    q = jnp.swapaxes(q.reshape(L, BH, head_dim), 0, 1)
    k = jnp.swapaxes(k.reshape(L, BH, head_dim), 0, 1)
    v = jnp.swapaxes(v.reshape(L, BH, head_dim), 0, 1)
    s = jnp.einsum('bld,bmd->blm', q.astype(bf16), k.astype(bf16),
                   preferred_element_type=jnp.float32)
    aw = jax.nn.softmax(s, axis=-1)
    a = jnp.einsum('blm,bmd->bld', aw.astype(bf16), v.astype(bf16),
                   preferred_element_type=jnp.float32)
    a = jnp.swapaxes(a, 0, 1).reshape(L, p * B, E)
    a = _linear_bf16(a, params['w_out']).reshape(L, p, B, E)

    t = t + a
    t = _layer_norm(t, params['g2'], params['b2'])
    m = jnp.maximum(_linear_bf16(t, params['w_m1'], params['b_m1']), 0.0)
    t = _linear_bf16(m, params['w_m2'], params['b_m2']) + t

    y = jnp.transpose(t, (2, 1, 0, 3)).reshape(B * p, L, E)
    y = jnp.swapaxes(y, 1, 2)
    yf = y.reshape(B * p, C, patch_dim, patch_dim, Hp, Wp)
    yf = jnp.transpose(yf, (0, 1, 4, 2, 5, 3)).reshape(B * p, C, H, W)
    return jnp.transpose(yf.reshape(B, p, C, N), (0, 1, 3, 2))


# ------------------------------ parameter init --------------------------------
def init_bsablock_params(dim, patch_dim, num_heads, mlp_ratio, key):
    E = dim * patch_dim * patch_dim
    hid = mlp_ratio * dim
    ks = jax.random.split(key, 8)

    def kaiming_uniform(k, shape, fan_in):
        bound = math.sqrt(6.0 / ((1.0 + 5.0) * fan_in))   # kaiming_uniform(a=sqrt(5))
        return jax.random.uniform(k, shape, jnp.float32, -bound, bound)

    def linear(k, out_f, in_f, bias=True):
        kw, kb = jax.random.split(k)
        w = kaiming_uniform(kw, (out_f, in_f), in_f)
        if not bias:
            return w, None
        bound = 1.0 / math.sqrt(in_f)
        return w, jax.random.uniform(kb, (out_f,), jnp.float32, -bound, bound)

    w_le, b_le = linear(ks[0], E, E)                      # linear_encoding
    w_in = kaiming_uniform(ks[1], (3 * E, E), E)          # BSAttention.in_proj_weight
    b_in = jnp.zeros((3 * E,), jnp.float32)               # in_proj_bias reset to 0
    w_out, _ = linear(ks[2], E, E, bias=False)            # out_proj (bias=False)
    w_m1, b_m1 = linear(ks[3], hid, E)                    # mlp_head[0]
    w_m2, b_m2 = linear(ks[4], E, hid)                    # mlp_head[3]
    # LayerNorm affine params (torch default ones/zeros; perturbed slightly so the
    # correctness check exercises them — forward semantics are init-independent).
    g1 = 1.0 + 0.02 * jax.random.normal(ks[5], (E,), jnp.float32)
    b1 = 0.02 * jax.random.normal(ks[6], (E,), jnp.float32)
    g2 = 1.0 + 0.02 * jax.random.normal(ks[7], (E,), jnp.float32)
    b2 = jnp.zeros((E,), jnp.float32)
    return dict(w_le=w_le, b_le=b_le, w_in=w_in, b_in=b_in, w_out=w_out,
                g1=g1, b1=b1, g2=g2, b2=b2,
                w_m1=w_m1, b_m1=b_m1, w_m2=w_m2, b_m2=b_m2)


if __name__ == "__main__":
    key = jax.random.PRNGKey(0)
    k_x, k_p = jax.random.split(key)

    # Small shapes consistent with BSABlock: dim=16, patch_dim=3 -> embed_dim=144,
    # num_heads=4 (head_dim=36), H=W=12 -> N=144, patch grid L=16, mlp hidden=16
    # (zero-padded to 128 inside prepare_params).
    B, p = 2, 2
    dim, patch_dim, num_heads, mlp_ratio = 16, 3, 4, 1
    H = W = 12
    N = H * W

    x = jax.random.normal(k_x, (B, p, N, dim), dtype=jnp.float32)
    params = init_bsablock_params(dim, patch_dim, num_heads, mlp_ratio, k_p)
    prepared = prepare_params(params, num_heads)

    fwd = jax.jit(functools.partial(bsablock_pallas, H=H, W=W,
                                    patch_dim=patch_dim, num_heads=num_heads))
    y = jax.block_until_ready(fwd(x, prepared))

    y_ref = bsablock_reference(x, params, H=H, W=W, patch_dim=patch_dim,
                               num_heads=num_heads)
    assert y.shape == (B, p, N, dim)
    err = jnp.max(jnp.abs(y - y_ref))
    # Tolerance reflects the intentional bf16-operand MXU policy (mirrored in the
    # reference) plus the approximate softmax reciprocal.
    assert jnp.allclose(y, y_ref, atol=2e-2, rtol=2e-2), (
        f"Pallas BSABlock mismatch vs reference: max abs err {err:.3e}")

    print("KERNEL_OK")
</pallas_src>

<mosaic_0001>
module attributes {stable_mosaic.version = 11 : i64} {
  func.func @encode_kernel(%arg0: i32, %arg1: i32, %arg2: memref<32x144xf32, #tpu.memory_space<vmem>>, %arg3: memref<144x144xbf16, #tpu.memory_space<vmem>>, %arg4: memref<1x144xf32, #tpu.memory_space<vmem>>, %arg5: memref<1x144xf32, #tpu.memory_space<vmem>>, %arg6: memref<1x144xf32, #tpu.memory_space<vmem>>, %arg7: memref<144x432xbf16, #tpu.memory_space<vmem>>, %arg8: memref<1x432xf32, #tpu.memory_space<vmem>>, %arg9: memref<32x144xf32, #tpu.memory_space<vmem>>, %arg10: memref<32x432xbf16, #tpu.memory_space<vmem>>, %arg11: memref<32x144xbf16, #tpu.memory_space<vmem>>) attributes {dimension_semantics = [#tpu.dimension_semantics<parallel>, #tpu.dimension_semantics<arbitrary>], iteration_bounds = array<i64: 2, 1>, scalar_prefetch = 0 : i64, scratch_operands = 1 : i64, tpu.core_type = #tpu.core_type<tc>, window_params = [{transform_indices = @transform_0, window_bounds = array<i64: 32, 144>}, {pipeline_mode = #tpu.pipeline_mode<synchronous>, transform_indices = @transform_1, window_bounds = array<i64: 144, 144>}, {pipeline_mode = #tpu.pipeline_mode<synchronous>, transform_indices = @transform_2, window_bounds = array<i64: 1, 144>}, {pipeline_mode = #tpu.pipeline_mode<synchronous>, transform_indices = @transform_3, window_bounds = array<i64: 1, 144>}, {pipeline_mode = #tpu.pipeline_mode<synchronous>, transform_indices = @transform_4, window_bounds = array<i64: 1, 144>}, {transform_indices = @transform_5, window_bounds = array<i64: 144, 432>}, {transform_indices = @transform_6, window_bounds = array<i64: 1, 432>}, {transform_indices = @transform_7, window_bounds = array<i64: 32, 144>}, {transform_indices = @transform_8, window_bounds = array<i64: 32, 432>}]} {
    %c0_i32 = arith.constant 0 : i32
    %0 = arith.cmpi eq, %arg1, %c0_i32 : i32
    %1 = arith.extui %0 : i1 to i32
    %c0_i32_0 = arith.constant 0 : i32
    %2 = arith.cmpi ne, %1, %c0_i32_0 : i32
    scf.if %2 {
      %c0_8 = arith.constant 0 : index
      %c0_9 = arith.constant 0 : index
      %11 = vector.load %arg2[%c0_8, %c0_9] : memref<32x144xf32, #tpu.memory_space<vmem>>, vector<32x144xf32>
      %12 = arith.truncf %11 : vector<32x144xf32> to vector<32x144xbf16>
      %c0_10 = arith.constant 0 : index
      %c0_11 = arith.constant 0 : index
      %13 = vector.load %arg3[%c0_10, %c0_11] : memref<144x144xbf16, #tpu.memory_space<vmem>>, vector<144x144xbf16>
      %cst_12 = arith.constant dense<0.000000e+00> : vector<32x144xf32>
      %14 = tpu.matmul %12, %13, %cst_12 {dimension_numbers = #tpu.dot_dimension_numbers<[1], [0], [0], [1], [0, 0, 1, 1], [], []>} : vector<32x144xbf16>, vector<144x144xbf16>, vector<32x144xf32> -> vector<32x144xf32>
      %15 = arith.addf %11, %14 : vector<32x144xf32>
      %c0_13 = arith.constant 0 : index
      %c0_14 = arith.constant 0 : index
      %16 = vector.load %arg4[%c0_13, %c0_14] : memref<1x144xf32, #tpu.memory_space<vmem>>, vector<1x144xf32>
      %17 = vector.broadcast %16 : vector<1x144xf32> to vector<32x144xf32>
      %18 = arith.addf %15, %17 : vector<32x144xf32>
      %cst_15 = arith.constant dense<0.000000e+00> : vector<32xf32>
      %19 = vector.multi_reduction <add>, %18, %cst_15 [1] : vector<32x144xf32> to vector<32xf32>
      %20 = vector.shape_cast %19 : vector<32xf32> to vector<32x1xf32>
      %cst_16 = arith.constant 1.440000e+02 : f32
      %21 = vector.broadcast %cst_16 : f32 to vector<32x1xf32>
      %22 = arith.divf %20, %21 : vector<32x1xf32>
      %23 = vector.broadcast %22 : vector<32x1xf32> to vector<32x144xf32>
      %24 = arith.subf %18, %23 : vector<32x144xf32>
      %25 = arith.mulf %24, %24 : vector<32x144xf32>
      %cst_17 = arith.constant dense<0.000000e+00> : vector<32xf32>
      %26 = vector.multi_reduction <add>, %25, %cst_17 [1] : vector<32x144xf32> to vector<32xf32>
      %27 = vector.shape_cast %26 : vector<32xf32> to vector<32x1xf32>
      %cst_18 = arith.constant 1.440000e+02 : f32
      %28 = vector.broadcast %cst_18 : f32 to vector<32x1xf32>
      %29 = arith.divf %27, %28 : vector<32x1xf32>
      %cst_19 = arith.constant 9.99999974E-6 : f32
      %30 = vector.broadcast %cst_19 : f32 to vector<32x1xf32>
      %31 = arith.addf %29, %30 : vector<32x1xf32>
      %32 = math.rsqrt %31 : vector<32x1xf32>
      %33 = vector.broadcast %32 : vector<32x1xf32> to vector<32x144xf32>
      %34 = arith.mulf %24, %33 : vector<32x144xf32>
      %c0_20 = arith.constant 0 : index
      %c0_21 = arith.constant 0 : index
      %35 = vector.load %arg5[%c0_20, %c0_21] : memref<1x144xf32, #tpu.memory_space<vmem>>, vector<1x144xf32>
      %36 = vector.broadcast %35 : vector<1x144xf32> to vector<32x144xf32>
      %37 = arith.mulf %34, %36 : vector<32x144xf32>
      %c0_22 = arith.constant 0 : index
      %c0_23 = arith.constant 0 : index
      %38 = vector.load %arg6[%c0_22, %c0_23] : memref<1x144xf32, #tpu.memory_space<vmem>>, vector<1x144xf32>
      %39 = vector.broadcast %38 : vector<1x144xf32> to vector<32x144xf32>
      %40 = arith.addf %37, %39 : vector<32x144xf32>
      %c0_24 = arith.constant 0 : index
      %c0_25 = arith.constant 0 : index
      %41 = vector.load %arg9[%c0_24, %c0_25] : memref<32x144xf32, #tpu.memory_space<vmem>>, vector<32x144xf32>
      tpu.vector_store %arg9[%c0_24, %c0_25], %18 {strides = array<i32>} : memref<32x144xf32, #tpu.memory_space<vmem>>, vector<32x144xf32>,
      %42 = arith.truncf %40 : vector<32x144xf32> to vector<32x144xbf16>
      %c0_26 = arith.constant 0 : index
      %c0_27 = arith.constant 0 : index
      %43 = vector.load %arg11[%c0_26, %c0_27] : memref<32x144xbf16, #tpu.memory_space<vmem>>, vector<32x144xbf16>
      tpu.vector_store %arg11[%c0_26, %c0_27], %42 {strides = array<i32>} : memref<32x144xbf16, #tpu.memory_space<vmem>>, vector<32x144xbf16>,
    } else {
    }
    %c0 = arith.constant 0 : index
    %c0_1 = arith.constant 0 : index
    %3 = vector.load %arg11[%c0, %c0_1] : memref<32x144xbf16, #tpu.memory_space<vmem>>, vector<32x144xbf16>
    %c0_2 = arith.constant 0 : index
    %c0_3 = arith.constant 0 : index
    %4 = vector.load %arg7[%c0_2, %c0_3] : memref<144x432xbf16, #tpu.memory_space<vmem>>, vector<144x432xbf16>
    %cst = arith.constant dense<0.000000e+00> : vector<32x432xf32>
    %5 = tpu.matmul %3, %4, %cst {dimension_numbers = #tpu.dot_dimension_numbers<[1], [0], [0], [1], [0, 0, 1, 1], [], []>} : vector<32x144xbf16>, vector<144x432xbf16>, vector<32x432xf32> -> vector<32x432xf32>
    %c0_4 = arith.constant 0 : index
    %c0_5 = arith.constant 0 : index
    %6 = vector.load %arg8[%c0_4, %c0_5] : memref<1x432xf32, #tpu.memory_space<vmem>>, vector<1x432xf32>
    %7 = vector.broadcast %6 : vector<1x432xf32> to vector<32x432xf32>
    %8 = arith.addf %5, %7 : vector<32x432xf32>
    %9 = arith.truncf %8 : vector<32x432xf32> to vector<32x432xbf16>
    %c0_6 = arith.constant 0 : index
    %c0_7 = arith.constant 0 : index
    %10 = vector.load %arg10[%c0_6, %c0_7] : memref<32x432xbf16, #tpu.memory_space<vmem>>, vector<32x432xbf16>
    tpu.vector_store %arg10[%c0_6, %c0_7], %9 {strides = array<i32>} : memref<32x432xbf16, #tpu.memory_space<vmem>>, vector<32x432xbf16>,
    return
  }
  func.func @transform_0(%arg0: i32, %arg1: i32) -> (i32, i32) {
    %c0_i32 = arith.constant 0 : i32
    %c0_i32_0 = arith.constant 0 : i32
    return %arg0, %c0_i32 : i32, i32
  }
  func.func @transform_1(%arg0: i32, %arg1: i32) -> (i32, i32) {
    %c0_i32 = arith.constant 0 : i32
    %c0_i32_0 = arith.constant 0 : i32
    %c0_i32_1 = arith.constant 0 : i32
    return %c0_i32, %c0_i32_0 : i32, i32
  }
  func.func @transform_2(%arg0: i32, %arg1: i32) -> (i32, i32) {
    %c0_i32 = arith.constant 0 : i32
    %c0_i32_0 = arith.constant 0 : i32
    %c0_i32_1 = arith.constant 0 : i32
    return %c0_i32, %c0_i32_0 : i32, i32
  }
  func.func @transform_3(%arg0: i32, %arg1: i32) -> (i32, i32) {
    %c0_i32 = arith.constant 0 : i32
    %c0_i32_0 = arith.constant 0 : i32
    %c0_i32_1 = arith.constant 0 : i32
    return %c0_i32, %c0_i32_0 : i32, i32
  }
  func.func @transform_4(%arg0: i32, %arg1: i32) -> (i32, i32) {
    %c0_i32 = arith.constant 0 : i32
    %c0_i32_0 = arith.constant 0 : i32
    %c0_i32_1 = arith.constant 0 : i32
    return %c0_i32, %c0_i32_0 : i32, i32
  }
  func.func @transform_5(%arg0: i32, %arg1: i32) -> (i32, i32) {
    %c0_i32 = arith.constant 0 : i32
    %c0_i32_0 = arith.constant 0 : i32
    return %c0_i32, %arg1 : i32, i32
  }
  func.func @transform_6(%arg0: i32, %arg1: i32) -> (i32, i32) {
    %c0_i32 = arith.constant 0 : i32
    %c0_i32_0 = arith.constant 0 : i32
    return %c0_i32, %arg1 : i32, i32
  }
  func.func @transform_7(%arg0: i32, %arg1: i32) -> (i32, i32) {
    %c0_i32 = arith.constant 0 : i32
    %c0_i32_0 = arith.constant 0 : i32
    return %arg0, %c0_i32 : i32, i32
  }
  func.func @transform_8(%arg0: i32, %arg1: i32) -> (i32, i32) {
    %c0_i32 = arith.constant 0 : i32
    return %arg0, %arg1 : i32, i32
  }
}

module attributes {stable_mosaic.version = 11 : i64} {
  func.func @attention_kernel(%arg0: i32, %arg1: memref<2x16x432xbf16, #tpu.memory_space<vmem>>, %arg2: memref<2x16x144xbf16, #tpu.memory_space<vmem>>) attributes {dimension_semantics = [#tpu.dimension_semantics<parallel>], iteration_bounds = array<i64: 2>, scalar_prefetch = 0 : i64, scratch_operands = 0 : i64, tpu.core_type = #tpu.core_type<tc>, window_params = [{transform_indices = @transform_0, window_bounds = array<i64: 2, 16, 432>}, {transform_indices = @transform_1, window_bounds = array<i64: 2, 16, 144>}]} {
    %c0 = arith.constant 0 : index
    %c0_0 = arith.constant 0 : index
    %c0_1 = arith.constant 0 : index
    %0 = vector.load %arg1[%c0, %c0_0, %c0_1] : memref<2x16x432xbf16, #tpu.memory_space<vmem>>, vector<2x16x432xbf16>
    %1 = arith.extf %0 : vector<2x16x432xbf16> to vector<2x16x432xf32>
    %2 = vector.extract_strided_slice %1 {offsets = [0, 0, 0], sizes = [2, 16, 36], strides = [1, 1, 1]} : vector<2x16x432xf32> to vector<2x16x36xf32>
    %3 = arith.truncf %2 : vector<2x16x36xf32> to vector<2x16x36xbf16>
    %4 = vector.extract_strided_slice %1 {offsets = [0, 0, 144], sizes = [2, 16, 36], strides = [1, 1, 1]} : vector<2x16x432xf32> to vector<2x16x36xf32>
    %5 = arith.truncf %4 : vector<2x16x36xf32> to vector<2x16x36xbf16>
    %6 = vector.extract_strided_slice %1 {offsets = [0, 0, 288], sizes = [2, 16, 36], strides = [1, 1, 1]} : vector<2x16x432xf32> to vector<2x16x36xf32>
    "tpu.trace_start"() <{level = 10 : i32, message = "bld,bmd->blm"}> : () -> ()
    %cst = arith.constant dense<0.000000e+00> : vector<2x16x16xf32>
    %7 = tpu.matmul %3, %5, %cst {dimension_numbers = #tpu.dot_dimension_numbers<[2], [2], [1], [1], [0, 0, 0, 1, 1, 1], [0], [0]>} : vector<2x16x36xbf16>, vector<2x16x36xbf16>, vector<2x16x16xf32> -> vector<2x16x16xf32>
    "tpu.trace_stop"() : () -> ()
    %cst_2 = arith.constant dense<0xFF800000> : vector<2x16xf32>
    %8 = vector.multi_reduction <maximumf>, %7, %cst_2 [2] : vector<2x16x16xf32> to vector<2x16xf32>
    %9 = vector.shape_cast %8 : vector<2x16xf32> to vector<2x16x1xf32>
    %10 = vector.broadcast %9 : vector<2x16x1xf32> to vector<2x16x16xf32>
    %11 = arith.subf %7, %10 : vector<2x16x16xf32>
    %12 = math.exp %11 : vector<2x16x16xf32>
    %cst_3 = arith.constant dense<0.000000e+00> : vector<2x16xf32>
    %13 = vector.multi_reduction <add>, %12, %cst_3 [2] : vector<2x16x16xf32> to vector<2x16xf32>
    %14 = vector.shape_cast %13 : vector<2x16xf32> to vector<2x16x1xf32>
    %15 = tpu.reciprocal %14 {approx = true} : vector<2x16x1xf32> -> vector<2x16x1xf32>
    %16 = vector.broadcast %15 : vector<2x16x1xf32> to vector<2x16x16xf32>
    %17 = arith.mulf %12, %16 : vector<2x16x16xf32>
    %18 = arith.truncf %17 : vector<2x16x16xf32> to vector<2x16x16xbf16>
    %19 = arith.truncf %6 : vector<2x16x36xf32> to vector<2x16x36xbf16>
    "tpu.trace_start"() <{level = 10 : i32, message = "blm,bmd->bld"}> : () -> ()
    %cst_4 = arith.constant dense<0.000000e+00> : vector<2x16x36xf32>
    %20 = tpu.matmul %18, %19, %cst_4 {dimension_numbers = #tpu.dot_dimension_numbers<[2], [1], [1], [2], [0, 0, 0, 1, 1, 2], [0], [0]>} : vector<2x16x16xbf16>, vector<2x16x36xbf16>, vector<2x16x36xf32> -> vector<2x16x36xf32>
    "tpu.trace_stop"() : () -> ()
    %21 = vector.extract_strided_slice %1 {offsets = [0, 0, 36], sizes = [2, 16, 36], strides = [1, 1, 1]} : vector<2x16x432xf32> to vector<2x16x36xf32>
    %22 = arith.truncf %21 : vector<2x16x36xf32> to vector<2x16x36xbf16>
    %23 = vector.extract_strided_slice %1 {offsets = [0, 0, 180], sizes = [2, 16, 36], strides = [1, 1, 1]} : vector<2x16x432xf32> to vector<2x16x36xf32>
    %24 = arith.truncf %23 : vector<2x16x36xf32> to vector<2x16x36xbf16>
    %25 = vector.extract_strided_slice %1 {offsets = [0, 0, 324], sizes = [2, 16, 36], strides = [1, 1, 1]} : vector<2x16x432xf32> to vector<2x16x36xf32>
    "tpu.trace_start"() <{level = 10 : i32, message = "bld,bmd->blm"}> : () -> ()
    %cst_5 = arith.constant dense<0.000000e+00> : vector<2x16x16xf32>
    %26 = tpu.matmul %22, %24, %cst_5 {dimension_numbers = #tpu.dot_dimension_numbers<[2], [2], [1], [1], [0, 0, 0, 1, 1, 1], [0], [0]>} : vector<2x16x36xbf16>, vector<2x16x36xbf16>, vector<2x16x16xf32> -> vector<2x16x16xf32>
    "tpu.trace_stop"() : () -> ()
    %cst_6 = arith.constant dense<0xFF800000> : vector<2x16xf32>
    %27 = vector.multi_reduction <maximumf>, %26, %cst_6 [2] : vector<2x16x16xf32> to vector<2x16xf32>
    %28 = vector.shape_cast %27 : vector<2x16xf32> to vector<2x16x1xf32>
    %29 = vector.broadcast %28 : vector<2x16x1xf32> to vector<2x16x16xf32>
    %30 = arith.subf %26, %29 : vector<2x16x16xf32>
    %31 = math.exp %30 : vector<2x16x16xf32>
    %cst_7 = arith.constant dense<0.000000e+00> : vector<2x16xf32>
    %32 = vector.multi_reduction <add>, %31, %cst_7 [2] : vector<2x16x16xf32> to vector<2x16xf32>
    %33 = vector.shape_cast %32 : vector<2x16xf32> to vector<2x16x1xf32>
    %34 = tpu.reciprocal %33 {approx = true} : vector<2x16x1xf32> -> vector<2x16x1xf32>
    %35 = vector.broadcast %34 : vector<2x16x1xf32> to vector<2x16x16xf32>
    %36 = arith.mulf %31, %35 : vector<2x16x16xf32>
    %37 = arith.truncf %36 : vector<2x16x16xf32> to vector<2x16x16xbf16>
    %38 = arith.truncf %25 : vector<2x16x36xf32> to vector<2x16x36xbf16>
    "tpu.trace_start"() <{level = 10 : i32, message = "blm,bmd->bld"}> : () -> ()
    %cst_8 = arith.constant dense<0.000000e+00> : vector<2x16x36xf32>
    %39 = tpu.matmul %37, %38, %cst_8 {dimension_numbers = #tpu.dot_dimension_numbers<[2], [1], [1], [2], [0, 0, 0, 1, 1, 2], [0], [0]>} : vector<2x16x16xbf16>, vector<2x16x36xbf16>, vector<2x16x36xf32> -> vector<2x16x36xf32>
    "tpu.trace_stop"() : () -> ()
    %40 = vector.extract_strided_slice %1 {offsets = [0, 0, 72], sizes = [2, 16, 36], strides = [1, 1, 1]} : vector<2x16x432xf32> to vector<2x16x36xf32>
    %41 = arith.truncf %40 : vector<2x16x36xf32> to vector<2x16x36xbf16>
    %42 = vector.extract_strided_slice %1 {offsets = [0, 0, 216], sizes = [2, 16, 36], strides = [1, 1, 1]} : vector<2x16x432xf32> to vector<2x16x36xf32>
    %43 = arith.truncf %42 : vector<2x16x36xf32> to vector<2x16x36xbf16>
    %44 = vector.extract_strided_slice %1 {offsets = [0, 0, 360], sizes = [2, 16, 36], strides = [1, 1, 1]} : vector<2x16x432xf32> to vector<2x16x36xf32>
    "tpu.trace_start"() <{level = 10 : i32, message = "bld,bmd->blm"}> : () -> ()
    %cst_9 = arith.constant dense<0.000000e+00> : vector<2x16x16xf32>
    %45 = tpu.matmul %41, %43, %cst_9 {dimension_numbers = #tpu.dot_dimension_numbers<[2], [2], [1], [1], [0, 0, 0, 1, 1, 1], [0], [0]>} : vector<2x16x36xbf16>, vector<2x16x36xbf16>, vector<2x16x16xf32> -> vector<2x16x16xf32>
    "tpu.trace_stop"() : () -> ()
    %cst_10 = arith.constant dense<0xFF800000> : vector<2x16xf32>
    %46 = vector.multi_reduction <maximumf>, %45, %cst_10 [2] : vector<2x16x16xf32> to vector<2x16xf32>
    %47 = vector.shape_cast %46 : vector<2x16xf32> to vector<2x16x1xf32>
    %48 = vector.broadcast %47 : vector<2x16x1xf32> to vector<2x16x16xf32>
    %49 = arith.subf %45, %48 : vector<2x16x16xf32>
    %50 = math.exp %49 : vector<2x16x16xf32>
    %cst_11 = arith.constant dense<0.000000e+00> : vector<2x16xf32>
    %51 = vector.multi_reduction <add>, %50, %cst_11 [2] : vector<2x16x16xf32> to vector<2x16xf32>
    %52 = vector.shape_cast %51 : vector<2x16xf32> to vector<2x16x1xf32>
    %53 = tpu.reciprocal %52 {approx = true} : vector<2x16x1xf32> -> vector<2x16x1xf32>
    %54 = vector.broadcast %53 : vector<2x16x1xf32> to vector<2x16x16xf32>
    %55 = arith.mulf %50, %54 : vector<2x16x16xf32>
    %56 = arith.truncf %55 : vector<2x16x16xf32> to vector<2x16x16xbf16>
    %57 = arith.truncf %44 : vector<2x16x36xf32> to vector<2x16x36xbf16>
    "tpu.trace_start"() <{level = 10 : i32, message = "blm,bmd->bld"}> : () -> ()
    %cst_12 = arith.constant dense<0.000000e+00> : vector<2x16x36xf32>
    %58 = tpu.matmul %56, %57, %cst_12 {dimension_numbers = #tpu.dot_dimension_numbers<[2], [1], [1], [2], [0, 0, 0, 1, 1, 2], [0], [0]>} : vector<2x16x16xbf16>, vector<2x16x36xbf16>, vector<2x16x36xf32> -> vector<2x16x36xf32>
    "tpu.trace_stop"() : () -> ()
    %59 = vector.extract_strided_slice %1 {offsets = [0, 0, 108], sizes = [2, 16, 36], strides = [1, 1, 1]} : vector<2x16x432xf32> to vector<2x16x36xf32>
    %60 = arith.truncf %59 : vector<2x16x36xf32> to vector<2x16x36xbf16>
    %61 = vector.extract_strided_slice %1 {offsets = [0, 0, 252], sizes = [2, 16, 36], strides = [1, 1, 1]} : vector<2x16x432xf32> to vector<2x16x36xf32>
    %62 = arith.truncf %61 : vector<2x16x36xf32> to vector<2x16x36xbf16>
    %63 = vector.extract_strided_slice %1 {offsets = [0, 0, 396], sizes = [2, 16, 36], strides = [1, 1, 1]} : vector<2x16x432xf32> to vector<2x16x36xf32>
    "tpu.trace_start"() <{level = 10 : i32, message = "bld,bmd->blm"}> : () -> ()
    %cst_13 = arith.constant dense<0.000000e+00> : vector<2x16x16xf32>
    %64 = tpu.matmul %60, %62, %cst_13 {dimension_numbers = #tpu.dot_dimension_numbers<[2], [2], [1], [1], [0, 0, 0, 1, 1, 1], [0], [0]>} : vector<2x16x36xbf16>, vector<2x16x36xbf16>, vector<2x16x16xf32> -> vector<2x16x16xf32>
    "tpu.trace_stop"() : () -> ()
    %cst_14 = arith.constant dense<0xFF800000> : vector<2x16xf32>
    %65 = vector.multi_reduction <maximumf>, %64, %cst_14 [2] : vector<2x16x16xf32> to vector<2x16xf32>
    %66 = vector.shape_cast %65 : vector<2x16xf32> to vector<2x16x1xf32>
    %67 = vector.broadcast %66 : vector<2x16x1xf32> to vector<2x16x16xf32>
    %68 = arith.subf %64, %67 : vector<2x16x16xf32>
    %69 = math.exp %68 : vector<2x16x16xf32>
    %cst_15 = arith.constant dense<0.000000e+00> : vector<2x16xf32>
    %70 = vector.multi_reduction <add>, %69, %cst_15 [2] : vector<2x16x16xf32> to vector<2x16xf32>
    %71 = vector.shape_cast %70 : vector<2x16xf32> to vector<2x16x1xf32>
    %72 = tpu.reciprocal %71 {approx = true} : vector<2x16x1xf32> -> vector<2x16x1xf32>
    %73 = vector.broadcast %72 : vector<2x16x1xf32> to vector<2x16x16xf32>
    %74 = arith.mulf %69, %73 : vector<2x16x16xf32>
    %75 = arith.truncf %74 : vector<2x16x16xf32> to vector<2x16x16xbf16>
    %76 = arith.truncf %63 : vector<2x16x36xf32> to vector<2x16x36xbf16>
    "tpu.trace_start"() <{level = 10 : i32, message = "blm,bmd->bld"}> : () -> ()
    %cst_16 = arith.constant dense<0.000000e+00> : vector<2x16x36xf32>
    %77 = tpu.matmul %75, %76, %cst_16 {dimension_numbers = #tpu.dot_dimension_numbers<[2], [1], [1], [2], [0, 0, 0, 1, 1, 2], [0], [0]>} : vector<2x16x16xbf16>, vector<2x16x36xbf16>, vector<2x16x36xf32> -> vector<2x16x36xf32>
    "tpu.trace_stop"() : () -> ()
    %78 = tpu.concatenate %20, %39, %58, %77 in 2 : vector<2x16x36xf32>, vector<2x16x36xf32>, vector<2x16x36xf32>, vector<2x16x36xf32> -> vector<2x16x144xf32>
    %79 = arith.truncf %78 : vector<2x16x144xf32> to vector<2x16x144xbf16>
    %c0_17 = arith.constant 0 : index
    %c0_18 = arith.constant 0 : index
    %c0_19 = arith.constant 0 : index
    %80 = vector.load %arg2[%c0_17, %c0_18, %c0_19] : memref<2x16x144xbf16, #tpu.memory_space<vmem>>, vector<2x16x144xbf16>
    tpu.vector_store %arg2[%c0_17, %c0_18, %c0_19], %79 {strides = array<i32>} : memref<2x16x144xbf16, #tpu.memory_space<vmem>>, vector<2x16x144xbf16>,
    return
  }
  func.func @transform_0(%arg0: i32) -> (i32, i32, i32) {
    %c0_i32 = arith.constant 0 : i32
    %c0_i32_0 = arith.constant 0 : i32
    %c0_i32_1 = arith.constant 0 : i32
    return %arg0, %c0_i32, %c0_i32_0 : i32, i32, i32
  }
  func.func @transform_1(%arg0: i32) -> (i32, i32, i32) {
    %c0_i32 = arith.constant 0 : i32
    %c0_i32_0 = arith.constant 0 : i32
    %c0_i32_1 = arith.constant 0 : i32
    return %arg0, %c0_i32, %c0_i32_0 : i32, i32, i32
  }
}

module attributes {stable_mosaic.version = 11 : i64} {
  func.func @out_mlp_kernel(%arg0: i32, %arg1: memref<32x144xbf16, #tpu.memory_space<vmem>>, %arg2: memref<32x144xf32, #tpu.memory_space<vmem>>, %arg3: memref<144x144xbf16, #tpu.memory_space<vmem>>, %arg4: memref<1x144xf32, #tpu.memory_space<vmem>>, %arg5: memref<1x144xf32, #tpu.memory_space<vmem>>, %arg6: memref<144x128xbf16, #tpu.memory_space<vmem>>, %arg7: memref<1x128xf32, #tpu.memory_space<vmem>>, %arg8: memref<128x144xbf16, #tpu.memory_space<vmem>>, %arg9: memref<1x144xf32, #tpu.memory_space<vmem>>, %arg10: memref<32x144xf32, #tpu.memory_space<vmem>>) attributes {dimension_semantics = [#tpu.dimension_semantics<parallel>], iteration_bounds = array<i64: 2>, scalar_prefetch = 0 : i64, scratch_operands = 0 : i64, tpu.core_type = #tpu.core_type<tc>, window_params = [{transform_indices = @transform_0, window_bounds = array<i64: 32, 144>}, {transform_indices = @transform_1, window_bounds = array<i64: 32, 144>}, {pipeline_mode = #tpu.pipeline_mode<synchronous>, transform_indices = @transform_2, window_bounds = array<i64: 144, 144>}, {pipeline_mode = #tpu.pipeline_mode<synchronous>, transform_indices = @transform_3, window_bounds = array<i64: 1, 144>}, {pipeline_mode = #tpu.pipeline_mode<synchronous>, transform_indices = @transform_4, window_bounds = array<i64: 1, 144>}, {pipeline_mode = #tpu.pipeline_mode<synchronous>, transform_indices = @transform_5, window_bounds = array<i64: 144, 128>}, {pipeline_mode = #tpu.pipeline_mode<synchronous>, transform_indices = @transform_6, window_bounds = array<i64: 1, 128>}, {pipeline_mode = #tpu.pipeline_mode<synchronous>, transform_indices = @transform_7, window_bounds = array<i64: 128, 144>}, {pipeline_mode = #tpu.pipeline_mode<synchronous>, transform_indices = @transform_8, window_bounds = array<i64: 1, 144>}, {transform_indices = @transform_9, window_bounds = array<i64: 32, 144>}]} {
    %c0 = arith.constant 0 : index
    %c0_0 = arith.constant 0 : index
    %0 = vector.load %arg2[%c0, %c0_0] : memref<32x144xf32, #tpu.memory_space<vmem>>, vector<32x144xf32>
    %c0_1 = arith.constant 0 : index
    %c0_2 = arith.constant 0 : index
    %1 = vector.load %arg1[%c0_1, %c0_2] : memref<32x144xbf16, #tpu.memory_space<vmem>>, vector<32x144xbf16>
    %c0_3 = arith.constant 0 : index
    %c0_4 = arith.constant 0 : index
    %2 = vector.load %arg3[%c0_3, %c0_4] : memref<144x144xbf16, #tpu.memory_space<vmem>>, vector<144x144xbf16>
    %cst = arith.constant dense<0.000000e+00> : vector<32x144xf32>
    %3 = tpu.matmul %1, %2, %cst {dimension_numbers = #tpu.dot_dimension_numbers<[1], [0], [0], [1], [0, 0, 1, 1], [], []>} : vector<32x144xbf16>, vector<144x144xbf16>, vector<32x144xf32> -> vector<32x144xf32>
    %4 = arith.addf %0, %3 : vector<32x144xf32>
    %cst_5 = arith.constant dense<0.000000e+00> : vector<32xf32>
    %5 = vector.multi_reduction <add>, %4, %cst_5 [1] : vector<32x144xf32> to vector<32xf32>
    %6 = vector.shape_cast %5 : vector<32xf32> to vector<32x1xf32>
    %cst_6 = arith.constant 1.440000e+02 : f32
    %7 = vector.broadcast %cst_6 : f32 to vector<32x1xf32>
    %8 = arith.divf %6, %7 : vector<32x1xf32>
    %9 = vector.broadcast %8 : vector<32x1xf32> to vector<32x144xf32>
    %10 = arith.subf %4, %9 : vector<32x144xf32>
    %11 = arith.mulf %10, %10 : vector<32x144xf32>
    %cst_7 = arith.constant dense<0.000000e+00> : vector<32xf32>
    %12 = vector.multi_reduction <add>, %11, %cst_7 [1] : vector<32x144xf32> to vector<32xf32>
    %13 = vector.shape_cast %12 : vector<32xf32> to vector<32x1xf32>
    %cst_8 = arith.constant 1.440000e+02 : f32
    %14 = vector.broadcast %cst_8 : f32 to vector<32x1xf32>
    %15 = arith.divf %13, %14 : vector<32x1xf32>
    %cst_9 = arith.constant 9.99999974E-6 : f32
    %16 = vector.broadcast %cst_9 : f32 to vector<32x1xf32>
    %17 = arith.addf %15, %16 : vector<32x1xf32>
    %18 = math.rsqrt %17 : vector<32x1xf32>
    %19 = vector.broadcast %18 : vector<32x1xf32> to vector<32x144xf32>
    %20 = arith.mulf %10, %19 : vector<32x144xf32>
    %c0_10 = arith.constant 0 : index
    %c0_11 = arith.constant 0 : index
    %21 = vector.load %arg4[%c0_10, %c0_11] : memref<1x144xf32, #tpu.memory_space<vmem>>, vector<1x144xf32>
    %22 = vector.broadcast %21 : vector<1x144xf32> to vector<32x144xf32>
    %23 = arith.mulf %20, %22 : vector<32x144xf32>
    %c0_12 = arith.constant 0 : index
    %c0_13 = arith.constant 0 : index
    %24 = vector.load %arg5[%c0_12, %c0_13] : memref<1x144xf32, #tpu.memory_space<vmem>>, vector<1x144xf32>
    %25 = vector.broadcast %24 : vector<1x144xf32> to vector<32x144xf32>
    %26 = arith.addf %23, %25 : vector<32x144xf32>
    %27 = arith.truncf %26 : vector<32x144xf32> to vector<32x144xbf16>
    %c0_14 = arith.constant 0 : index
    %c0_15 = arith.constant 0 : index
    %28 = vector.load %arg6[%c0_14, %c0_15] : memref<144x128xbf16, #tpu.memory_space<vmem>>, vector<144x128xbf16>
    %cst_16 = arith.constant dense<0.000000e+00> : vector<32x128xf32>
    %29 = tpu.matmul %27, %28, %cst_16 {dimension_numbers = #tpu.dot_dimension_numbers<[1], [0], [0], [1], [0, 0, 1, 1], [], []>} : vector<32x144xbf16>, vector<144x128xbf16>, vector<32x128xf32> -> vector<32x128xf32>
    %c0_17 = arith.constant 0 : index
    %c0_18 = arith.constant 0 : index
    %30 = vector.load %arg7[%c0_17, %c0_18] : memref<1x128xf32, #tpu.memory_space<vmem>>, vector<1x128xf32>
    %31 = vector.broadcast %30 : vector<1x128xf32> to vector<32x128xf32>
    %32 = arith.addf %29, %31 : vector<32x128xf32>
    %cst_19 = arith.constant 0.000000e+00 : f32
    %33 = vector.broadcast %cst_19 : f32 to vector<32x128xf32>
    %34 = arith.maximumf %32, %33 : vector<32x128xf32>
    %35 = arith.truncf %34 : vector<32x128xf32> to vector<32x128xbf16>
    %c0_20 = arith.constant 0 : index
    %c0_21 = arith.constant 0 : index
    %36 = vector.load %arg8[%c0_20, %c0_21] : memref<128x144xbf16, #tpu.memory_space<vmem>>, vector<128x144xbf16>
    %cst_22 = arith.constant dense<0.000000e+00> : vector<32x144xf32>
    %37 = tpu.matmul %35, %36, %cst_22 {dimension_numbers = #tpu.dot_dimension_numbers<[1], [0], [0], [1], [0, 0, 1, 1], [], []>} : vector<32x128xbf16>, vector<128x144xbf16>, vector<32x144xf32> -> vector<32x144xf32>
    %c0_23 = arith.constant 0 : index
    %c0_24 = arith.constant 0 : index
    %38 = vector.load %arg9[%c0_23, %c0_24] : memref<1x144xf32, #tpu.memory_space<vmem>>, vector<1x144xf32>
    %39 = vector.broadcast %38 : vector<1x144xf32> to vector<32x144xf32>
    %40 = arith.addf %37, %39 : vector<32x144xf32>
    %41 = arith.addf %40, %26 : vector<32x144xf32>
    %c0_25 = arith.constant 0 : index
    %c0_26 = arith.constant 0 : index
    %42 = vector.load %arg10[%c0_25, %c0_26] : memref<32x144xf32, #tpu.memory_space<vmem>>, vector<32x144xf32>
    tpu.vector_store %arg10[%c0_25, %c0_26], %41 {strides = array<i32>} : memref<32x144xf32, #tpu.memory_space<vmem>>, vector<32x144xf32>,
    return
  }
  func.func @transform_0(%arg0: i32) -> (i32, i32) {
    %c0_i32 = arith.constant 0 : i32
    %c0_i32_0 = arith.constant 0 : i32
    return %arg0, %c0_i32 : i32, i32
  }
  func.func @transform_1(%arg0: i32) -> (i32, i32) {
    %c0_i32 = arith.constant 0 : i32
    %c0_i32_0 = arith.constant 0 : i32
    return %arg0, %c0_i32 : i32, i32
  }
  func.func @transform_2(%arg0: i32) -> (i32, i32) {
    %c0_i32 = arith.constant 0 : i32
    %c0_i32_0 = arith.constant 0 : i32
    %c0_i32_1 = arith.constant 0 : i32
    return %c0_i32, %c0_i32_0 : i32, i32
  }
  func.func @transform_3(%arg0: i32) -> (i32, i32) {
    %c0_i32 = arith.constant 0 : i32
    %c0_i32_0 = arith.constant 0 : i32
    %c0_i32_1 = arith.constant 0 : i32
    return %c0_i32, %c0_i32_0 : i32, i32
  }
  func.func @transform_4(%arg0: i32) -> (i32, i32) {
    %c0_i32 = arith.constant 0 : i32
    %c0_i32_0 = arith.constant 0 : i32
    %c0_i32_1 = arith.constant 0 : i32
    return %c0_i32, %c0_i32_0 : i32, i32
  }
  func.func @transform_5(%arg0: i32) -> (i32, i32) {
    %c0_i32 = arith.constant 0 : i32
    %c0_i32_0 = arith.constant 0 : i32
    %c0_i32_1 = arith.constant 0 : i32
    return %c0_i32, %c0_i32_0 : i32, i32
  }
  func.func @transform_6(%arg0: i32) -> (i32, i32) {
    %c0_i32 = arith.constant 0 : i32
    %c0_i32_0 = arith.constant 0 : i32
    %c0_i32_1 = arith.constant 0 : i32
    return %c0_i32, %c0_i32_0 : i32, i32
  }
  func.func @transform_7(%arg0: i32) -> (i32, i32) {
    %c0_i32 = arith.constant 0 : i32
    %c0_i32_0 = arith.constant 0 : i32
    %c0_i32_1 = arith.constant 0 : i32
    return %c0_i32, %c0_i32_0 : i32, i32
  }
  func.func @transform_8(%arg0: i32) -> (i32, i32) {
    %c0_i32 = arith.constant 0 : i32
    %c0_i32_0 = arith.constant 0 : i32
    %c0_i32_1 = arith.constant 0 : i32
    return %c0_i32, %c0_i32_0 : i32, i32
  }
  func.func @transform_9(%arg0: i32) -> (i32, i32) {
    %c0_i32 = arith.constant 0 : i32
    %c0_i32_0 = arith.constant 0 : i32
    return %arg0, %c0_i32 : i32, i32
  }
}

</mosaic_0001>

<bundles_post_ra>
// kernel: bsablock_pallas.3
= control target key start
LH: loop header
LB: loop body
LE: loop exit
PB: predicated region body
PF: predicated region fallthrough
CT: control target
= control target key end

     0   :  { %s1796_s27 = smov 0   ;;  %s1798_s28 = smov 0   ;;  %s2412_s0 = inlined_call_operand.vmem [shape: f32[64,144], index: 0, kind: input, shape index: {}]   ;;  %s2413_s1 = inlined_call_operand.vmem [shape: bf16[144,144], index: 1, kind: input, shape index: {}]   ;;  %s2414_s2 = inlined_call_operand.vmem [shape: f32[1,144], index: 2, kind: input, shape index: {}]   ;;  %s2415_s3 = inlined_call_operand.vmem [shape: f32[1,144], index: 3, kind: input, shape index: {}]   ;;  %s2416_s4 = inlined_call_operand.vmem [shape: f32[1,144], index: 4, kind: input, shape index: {}]   ;;  %s2417_s5 = inlined_call_operand.vmem [shape: bf16[144,432], index: 5, kind: input, shape index: {}]   ;;  %s2418_s6 = inlined_call_operand.vmem [shape: f32[1,432], index: 6, kind: input, shape index: {}]   ;;  %s2419_s7 = inlined_call_operand.vmem [shape: f32[64,144], index: 7, kind: output, shape index: {0}]   ;;  %s2420_s8 = inlined_call_operand.vmem [shape: bf16[64,432], index: 8, kind: output, shape index: {1}]  }
   0x1   :  { %s1800_s29 = smov 0  }
   0x2 LB: > { %s31_s30 = sadd.s32 1, %s1744_s28  ;;  %p1365_p0 = scmp.ge.s32.totalorder %s1748_s29, 1  ;;  %s1748_s29 = sphi %s1800_s29, %s19_s29   ;;  %s1744_s28 = sphi %s1798_s28, %s2426_s28   ;;  %s1740_s27 = sphi %s1796_s27, %s2425_s27  }
   0x3   : > { %p33_p1 = scmp.ge.s32.totalorder %s31_s30, 2  ;;  %p302_p2 = scmp.lt.s32.totalorder %s1748_s29, 3 }
   0x5   : > { %s2428_s30 = smov (%p33_p1, %s31_s30), 0  ;;  %p303_p3 = pnand %p1365_p0, %p302_p2 }
   0x6   : > { %s1366_s23 = sshll.u32 (!%p303_p3), %s1740_s27, 2 }
   0x7   : > { %306 = sbr.rel (%p303_p3) target bundleno = 686 (0x2ae), region = 48  ;;  %p358_p4 = scmp.lt.s32.totalorder (!%p303_p3), %s1366_s23, 7 }
   0xc   : > { %v1433_v0 = vld [vmem:[%s2413_s1 + $0x70] sm:$0xf]  ;;  %v1639_v1 = vld [vmem:[%s2413_s1 + $0x74] sm:$0xf0]  ;;  %v1638_v2 = vld [vmem:[%s2413_s1 + $0x74] sm:$0xf] }
   0xd   : > { %v1434_v3 = vor.u32 %v1639_v1, %v1433_v0  ;;  %v1435_v4 = vld [vmem:[%s2413_s1 + $0x78] sm:$0xf0]  ;;  %v1425_v5 = vld [vmem:[%s2413_s1 + $0x60] sm:$0xf]  ;;  %v1637_v6 = vld [vmem:[%s2413_s1 + $0x64] sm:$0xf0] }
   0xe   : > { %v1438_v7 = vor.u32 %v1638_v2, %v1435_v4  ;;  %v1636_v8 = vld [vmem:[%s2413_s1 + $0x64] sm:$0xf]  ;;  %v1427_v9 = vld [vmem:[%s2413_s1 + $0x68] sm:$0xf0]  ;;  %v1426_v10 = vor.u32 %v1637_v6, %v1425_v5  ;;  %v1417_v12 = vld [vmem:[%s2413_s1 + $0x50] sm:$0xf] }
   0xf   : > { %526 = vmatpush.bf16.msra.mxu0 %v1434_v3  ;;  %v1430_v11 = vor.u32 %v1636_v8, %v1427_v9  ;;  %v1635_v13 = vld [vmem:[%s2413_s1 + $0x54] sm:$0xf0]  ;;  %v1634_v14 = vld [vmem:[%s2413_s1 + $0x54] sm:$0xf]  ;;  %v1419_v15 = vld [vmem:[%s2413_s1 + $0x58] sm:$0xf0] }
  0x10   : > { %564 = vmatpush.bf16.msra.mxu2 %v1438_v7  ;;  %v1418_v16 = vor.u32 %v1635_v13, %v1417_v12  ;;  %v1409_v17 = vld [vmem:[%s2413_s1 + $0x40] sm:$0xf]  ;;  %v1633_v18 = vld [vmem:[%s2413_s1 + $0x44] sm:$0xf0]  ;;  %v1422_v19 = vor.u32 %v1634_v14, %v1419_v15  ;;  %v1640_v20 = vld [vmem:[%s2413_s1 + $0x84] sm:$0xf] }
  0x11   : > { %v1443_v21 = vld [vmem:[%s2413_s1 + $0x88] sm:$0xf0]  ;;  %v1632_v22 = vld [vmem:[%s2413_s1 + $0x44] sm:$0xf]  ;;  %v1441_v25 = vld [vmem:[%s2413_s1 + $0x80] sm:$0xf]  ;;  %v1410_v26 = vor.u32 %v1633_v18, %v1409_v17 }
  0x12   : > { %v1411_v23 = vld [vmem:[%s2413_s1 + $0x48] sm:$0xf0]  ;;  %v1446_v24 = vor.u32 %v1640_v20, %v1443_v21  ;;  %s2430_s23 = smov (!%p358_p4, %s1366_s23), 7  ;;  %v1641_v27 = vld [vmem:[%s2413_s1 + $0x84] sm:$0xf0]  ;;  %vm519_vm0 = vcmask 130048  }
  0x13   : > { %527 = vmatpush.bf16.msra.mxu0 %v1426_v10  ;;  %v1414_v28 = vor.u32 %v1632_v22, %v1411_v23  ;;  %v1401_v29 = vld [vmem:[%s2413_s1 + $0x30] sm:$0xf]  ;;  %v1631_v30 = vld [vmem:[%s2413_s1 + $0x34] sm:$0xf0]  ;;  %v1442_v31 = vor.u32 %v1641_v27, %v1441_v25  ;;  %v1630_v32 = vld [vmem:[%s2413_s1 + $0x34] sm:$0xf] }
  0x14   : > { %565 = vmatpush.bf16.msra.mxu2 %v1430_v11  ;;  %590 = vmatpush.bf16.msra.mxu3 %v1446_v24  ;;  %v1403_v33 = vld [vmem:[%s2413_s1 + $0x38] sm:$0xf0]  ;;  %s1889_s21 = sshll.u32 %s2430_s23, 4  ;;  %v1402_v34 = vor.u32 %v1631_v30, %v1401_v29  ;;  %v1393_v38 = vld [vmem:[%s2413_s1 + $0x20] sm:$0xf]  ;;  %vm779_vm3 = vcmask 1043456  }
  0x15   : > { %s1895_s25 = scalar_lea.vmem %s2412_s0, %s1889_s21  ;;  %552 = vmatpush.bf16.msra.mxu1 %v1442_v31  ;;  %v1406_v37 = vor.u32 %v1630_v32, %v1403_v33  ;;  %v1629_v39 = vld [vmem:[%s2413_s1 + $0x24] sm:$0xf0]  ;;  %v1628_v41 = vld [vmem:[%s2413_s1 + $0x24] sm:$0xf]  ;;  %v1395_v42 = vld [vmem:[%s2413_s1 + $0x28] sm:$0xf0]  ;;  %s1964_s17 = scalar_lea.vmem %s2419_s7, %s1889_s21 }
  0x16   : > { %v1898_v35 = vld [vmem:[%s1895_s25 + $0x8] sm:$0xff]  ;;  %v1901_v36 = vld [vmem:[%s1895_s25 + $0x18] sm:$0xff]  ;;  %v1394_v43 = vor.u32 %v1629_v39, %v1393_v38  ;;  %v1398_v44 = vor.u32 %v1628_v41, %v1395_v42  ;;  %v1385_v45 = vld [vmem:[%s2413_s1 + $0x10] sm:$0xf]  ;;  %vm780_vm6 = vcmask 130052   ;;  %s2380_s9 = scalar_lea.vmem %s2420_s8, %s1889_s21 }
  0x17   : > { %528 = vmatpush.bf16.msra.mxu0 %v1418_v16  ;;  %v408_v40 = vpack.c.bf16 %v1901_v36, %v1898_v35  ;;  %v1627_v46 = vld [vmem:[%s2413_s1 + $0x14] sm:$0xf0]  ;;  %v1626_v47 = vld [vmem:[%s2413_s1 + $0x14] sm:$0xf]  ;;  %v1387_v48 = vld [vmem:[%s2413_s1 + $0x18] sm:$0xf0] }
  0x18   : > { %566 = vmatpush.bf16.msra.mxu2 %v1422_v19  ;;  %v1386_v49 = vor.u32 %v1627_v46, %v1385_v45  ;;  %v1390_v50 = vor.u32 %v1626_v47, %v1387_v48  ;;  %v1377_v51 = vld [vmem:[%s2413_s1] sm:$0xf]  ;;  %v1625_v52 = vld [vmem:[%s2413_s1 + $0x4] sm:$0xf0]  ;;  %v1624_v53 = vld [vmem:[%s2413_s1 + $0x4] sm:$0xf] }
  0x19   : > { %1449 = vmatmul.msk.bf16.vlgmr.msra.gmra.mxu3 %vm519_vm0, %v408_v40  ;;  %1447 = vmatmul.msk.bf16.vlgmr.msra.gmra.mxu1 %vm519_vm0, %v408_v40  ;;  %v1379_v54 = vld [vmem:[%s2413_s1 + $0x8] sm:$0xf0]  ;;  %v399_v55 = vld [vmem:[%s1895_s25] sm:$0xff]  ;;  %v1378_v56 = vor.u32 %v1625_v52, %v1377_v51  ;;  %v401_v57 = vld [vmem:[%s1895_s25 + $0x10] sm:$0xff] }
  0x1a   : > { %v1946_v58 = vld [vmem:[%s1895_s25 + $0x28] sm:$0xff]  ;;  %v1949_v59 = vld [vmem:[%s1895_s25 + $0x38] sm:$0xff]  ;;  %v1382_v60 = vor.u32 %v1624_v53, %v1379_v54  ;;  %v407_v61 = vpack.c.bf16 %v401_v57, %v399_v55  ;;  %v403_v63 = vld [vmem:[%s1895_s25 + $0x20] sm:$0xff]  ;;  %v1750_v53 = vmov 144.0  }
  0x1b   : > { %529 = vmatpush.bf16.msra.mxu0 %v1410_v26  ;;  %v410_v62 = vpack.c.bf16 %v1949_v59, %v1946_v58  ;;  %v405_v0 = vld [vmem:[%s1895_s25 + $0x30] sm:$0xff]  ;;  %v610_v3 = vld [vmem:[%s2414_s2] sm:$0x3]  ;;  %1716 = vrcp.f32 %v1750_v53  ;;  %vm2254_vm8 = vmor %vm780_vm6, %vm779_vm3 }
  0x1c   : > { %567 = vmatpush.bf16.msra.mxu2 %v1414_v28  ;;  %v409_v1 = vpack.c.bf16 %v405_v0, %v403_v63  ;;  %v612_v7 = vperm.slane %v610_v3, 0  ;;  %v613_v13 = vperm.slane %v610_v3, 1  ;;  %v1660_v53 = vld [vmem:[%s2417_s5 + $0x6c] sm:$0xf0] }
  0x1f   : > { %530 = vmatpush.bf16.msra.mxu0 %v1402_v34 }
  0x20   : > { %568 = vmatpush.bf16.msra.mxu2 %v1406_v37 }
  0x21   : > { %v1717_v54 = vpop.eup %1716 }
  0x22   : > { %vm645_vm1 = vweird.f32 %v1717_v54 }
  0x23   : > { %531 = vmatpush.bf16.msra.mxu0 %v1394_v43 }
  0x24   : > { %569 = vmatpush.bf16.msra.mxu2 %v1398_v44 }
  0x27   : > { %532 = vmatpush.bf16.msra.mxu0 %v1386_v49 }
  0x28   : > { %570 = vmatpush.bf16.msra.mxu2 %v1390_v50 }
  0x29   : > { %1450 = vmatmul.msk.bf16.gmra.mxu3 %vm519_vm0, %v410_v62  ;;  %1448 = vmatmul.msk.bf16.gmra.mxu1 %vm519_vm0, %v410_v62 }
  0x2b   : > { %533 = vmatpush.bf16.msra.mxu0 %v1378_v56 }
  0x2c   : > { %571 = vmatpush.bf16.msra.mxu2 %v1382_v60 }
  0x2e   : > { %534 = vmatmul.bf16.vlgmr.msra.gmra.mxu0 %v407_v61 }
  0x2f   : > { %572 = vmatmul.bf16.vlgmr.msra.gmra.mxu2 %v407_v61 }
  0x3e   : > { %539 = vmatmul.bf16.gmra.mxu0 %v409_v1 }
  0x3f   : > { %577 = vmatmul.bf16.gmra.mxu2 %v409_v1 }
  0x96   : > { %v554_v2 = vpop.f32.mrf.mxu1 }
  0x9c   : > { %v592_v5 = vpop.f32.mrf.mxu3 }
  0x9e   : > { %v556_v8 = vpop.f32.mrf.mxu1 }
  0xa4   : > { %v594_v17 = vpop.f32.mrf.mxu3 }
  0xa6   : > { %v559_v20 = vpop.f32.mrf.mxu1 }
  0xab   : > { %v535_v4 = vpop.f32.mrf.mxu0 }
  0xac   : > { %v555_v6 = vadd.f32 %v554_v2, %v535_v4  ;;  %v597_v31 = vpop.f32.mrf.mxu3 }
  0xae   : > { %v602_v9 = vadd.f32 %v555_v6, %v399_v55  ;;  %v561_v33 = vpop.f32.mrf.mxu1  ;;  %v641_v55 = vmul.f32 144.0, %v1717_v54 }
  0xb0   : > { %v1966_v10 = vadd.f32 %v612_v7, %v602_v9  ;;  %v642_v56 = vsub.f32 1.0, %v641_v55 }
  0xb2   : > { %v573_v11 = vpop.f32.mrf.mxu2  ;;  %767 = vst [vmem:[%s1964_s17] sm:$0xff] %v1966_v10 }
  0xb3   : > { %v593_v12 = vadd.f32 %v592_v5, %v573_v11  ;;  %v537_v14 = vpop.f32.mrf.mxu0 }
  0xb4   : > { %v557_v15 = vadd.f32 %v556_v8, %v537_v14  ;;  %v599_v45 = vpop.f32.mrf.mxu3 }
  0xb5   : > { %v603_v16 = vadd.f32 %v593_v12, %v1898_v35 }
  0xb6   : > { %v604_v18 = vadd.f32 %v557_v15, %v401_v57  ;;  %v643_v57 = vmul.f32 %v1717_v54, %v642_v56 }
  0xb7   : > { %v617_v19 = vadd.f32 %v613_v13, %v603_v16 }
  0xb8   : > { %v1971_v21 = vadd.f32 %v612_v7, %v604_v18 }
  0xb9   : > { %768 = vst.msk [vmem:[%s1964_s17 + $0x8] sm:$0xff] %vm519_vm0, %v617_v19  ;;  %v624_v22 = vsel %vm519_vm0, %v617_v19, 0.0 }
  0xba   : > { %v575_v23 = vpop.f32.mrf.mxu2  ;;  %v625_v24 = vadd.f32 %v624_v22, %v1966_v10  ;;  %769 = vst [vmem:[%s1964_s17 + $0x10] sm:$0xff] %v1971_v21 }
  0xbb   : > { %v595_v25 = vadd.f32 %v594_v17, %v575_v23  ;;  %v540_v26 = vpop.f32.mrf.mxu0 }
  0xbc   : > { %626 = vadd.xlane.f32.xlu0 %v625_v24  ;;  %v560_v27 = vadd.f32 %v559_v20, %v540_v26 }
  0xbd   : > { %v605_v28 = vadd.f32 %v595_v25, %v1901_v36 }
  0xbe   : > { %v606_v29 = vadd.f32 %v560_v27, %v403_v63 }
  0xbf   : > { %v619_v30 = vadd.f32 %v613_v13, %v605_v28  ;;  %v1581_v28 = vld [vmem:[%s2417_s5 + $0xe0] sm:$0xf] }
  0xc0   : > { %v620_v32 = vadd.f32 %v612_v7, %v606_v29  ;;  %v1676_v29 = vld [vmem:[%s2417_s5 + $0xec] sm:$0xf0] }
  0xc1   : > { %770 = vst.msk [vmem:[%s1964_s17 + $0x18] sm:$0xff] %vm519_vm0, %v619_v30  ;;  %v628_v34 = vsel %vm519_vm0, %v619_v30, 0.0 }
  0xc2   : > { %v578_v35 = vpop.f32.mrf.mxu2  ;;  %v629_v37 = vadd.f32 %v628_v34, %v1971_v21  ;;  %771 = vst [vmem:[%s1964_s17 + $0x20] sm:$0xff] %v620_v32  ;;  %v1565_v34 = vld [vmem:[%s2417_s5 + $0xc0] sm:$0xf] }
  0xc3   : > { %v598_v38 = vadd.f32 %v597_v31, %v578_v35  ;;  %v542_v39 = vpop.f32.mrf.mxu0  ;;  %v1582_v31 = vor.u32 %v1676_v29, %v1581_v28  ;;  %v1672_v35 = vld [vmem:[%s2417_s5 + $0xcc] sm:$0xf0]  ;;  %v1646_v28 = vld [vmem:[%s2417_s5 + $0x4] sm:$0xf] }
  0xc4   : > { %630 = vadd.xlane.f32.xlu0 %v629_v37  ;;  %v562_v36 = vadd.f32 %v561_v33, %v542_v39  ;;  %v1670_v37 = vld [vmem:[%s2417_s5 + $0xc4] sm:$0xf]  ;;  %v1567_v39 = vld [vmem:[%s2417_s5 + $0xd0] sm:$0xf0] }
  0xc5   : > { %v607_v40 = vadd.f32 %v598_v38, %v1946_v58  ;;  %v644_v58 = vadd.f32 %v1717_v54, %v643_v57  ;;  %1041 = vmatpush.bf16.msrb.mxu1 %v1582_v31  ;;  %v1566_v38 = vor.u32 %v1672_v35, %v1565_v34  ;;  %v1519_v57 = vld [vmem:[%s2417_s5 + $0x70] sm:$0xf0]  ;;  %v1678_v31 = vld [vmem:[%s2417_s5 + $0x104] sm:$0xf]  ;;  %v739_v35 = vld [vmem:[%s2415_s3] sm:$0x3] }
  0xc6   : > { %v608_v41 = vadd.f32 %v562_v36, %v405_v0  ;;  %v1570_v36 = vor.u32 %v1670_v37, %v1567_v39  ;;  %v1599_v34 = vld [vmem:[%s2417_s5 + $0x110] sm:$0xf0] }
  0xc7   : > { %v621_v42 = vadd.f32 %v613_v13, %v607_v40  ;;  %v1994_v60 = vsel %vm645_vm1, %v1717_v54, %v644_v58  ;;  %v1549_v40 = vld [vmem:[%s2417_s5 + $0xa0] sm:$0xf]  ;;  %v1658_v54 = vld [vmem:[%s2417_s5 + $0x64] sm:$0xf]  ;;  %v1602_v37 = vor.u32 %v1678_v31, %v1599_v34 }
  0xc8   : > { %v622_v43 = vadd.f32 %v612_v7, %v608_v41  ;;  %v1668_v41 = vld [vmem:[%s2417_s5 + $0xac] sm:$0xf0] }
  0xc9   : > { %772 = vst.msk [vmem:[%s1964_s17 + $0x28] sm:$0xff] %vm519_vm0, %v621_v42  ;;  %v632_v44 = vsel %vm519_vm0, %v621_v42, 0.0  ;;  %1042 = vmatpush.bf16.msrb.mxu1 %v1566_v38  ;;  %1105 = vmatpush.bf16.msrb.mxu2 %v1602_v37 }
  0xca   : > { %v580_v46 = vpop.f32.mrf.mxu2  ;;  %v633_v47 = vadd.f32 %v632_v44, %v620_v32  ;;  %773 = vst [vmem:[%s1964_s17 + $0x30] sm:$0xff] %v622_v43  ;;  %v1551_v44 = vld [vmem:[%s2417_s5 + $0xb0] sm:$0xf0] }
  0xcb   : > { %v600_v48 = vadd.f32 %v599_v45, %v580_v46  ;;  %v1533_v46 = vld [vmem:[%s2417_s5 + $0x80] sm:$0xf] }
  0xcc   : > { %634 = vadd.xlane.f32.xlu1 %v633_v47  ;;  %v1664_v47 = vld [vmem:[%s2417_s5 + $0x8c] sm:$0xf0] }
  0xcd   : > { %v609_v49 = vadd.f32 %v600_v48, %v1949_v59  ;;  %v1662_v48 = vld [vmem:[%s2417_s5 + $0x84] sm:$0xf] }
  0xcf   : > { %v623_v50 = vadd.f32 %v613_v13, %v609_v49  ;;  %v1534_v49 = vor.u32 %v1664_v47, %v1533_v46 }
  0xd1   : > { %774 = vst.msk [vmem:[%s1964_s17 + $0x38] sm:$0xff] %vm519_vm0, %v623_v50  ;;  %v636_v51 = vsel %vm519_vm0, %v623_v50, 0.0 }
  0xd2   : > { %v637_v52 = vadd.f32 %v636_v51, %v622_v43 }
  0xd4   : > { %638 = vadd.xlane.f32.xlu1 %v637_v52  ;;  %v1517_v52 = vld [vmem:[%s2417_s5 + $0x60] sm:$0xf] }
  0xd5   : > { %v1518_v56 = vor.u32 %v1660_v53, %v1517_v52  ;;  %v1573_v53 = vld [vmem:[%s2417_s5 + $0xc8] sm:$0xf] }
 0x12f   : > { %v627_v61 = vpop.xlane.xlu0 %626 }
 0x130   : > { %v647_v59 = vmul.f32 %v1994_v60, %v627_v61  ;;  %v1522_v61 = vor.u32 %v1658_v54, %v1519_v57  ;;  %v1673_v54 = vld [vmem:[%s2417_s5 + $0xd4] sm:$0xf0] }
 0x132   : > { %v1998_v62 = vsub.f32 %v1966_v10, %v647_v59  ;;  %v2000_v63 = vsub.f32 %v617_v19, %v647_v59 }
 0x134   : > { %v659_v0 = vmul.f32 %v1998_v62, %v1998_v62  ;;  %v660_v1 = vmul.f32 %v2000_v63, %v2000_v63 }
 0x136   : > { %v667_v2 = vsel %vm519_vm0, %v660_v1, 0.0  ;;  %v1656_v1 = vld [vmem:[%s2417_s5 + $0x4c] sm:$0xf0] }
 0x137   : > { %v631_v3 = vpop.xlane.xlu0 %630  ;;  %v668_v4 = vadd.f32 %v667_v2, %v659_v0  ;;  %v1501_v0 = vld [vmem:[%s2417_s5 + $0x40] sm:$0xf] }
 0x138   : > { %v648_v5 = vmul.f32 %v1994_v60, %v631_v3  ;;  %v1502_v2 = vor.u32 %v1656_v1, %v1501_v0  ;;  %v1654_v3 = vld [vmem:[%s2417_s5 + $0x44] sm:$0xf] }
 0x139   : > { %669 = vadd.xlane.f32.xlu2 %v668_v4  ;;  %v1503_v4 = vld [vmem:[%s2417_s5 + $0x50] sm:$0xf0] }
 0x13a   : > { %v2009_v6 = vsub.f32 %v1971_v21, %v648_v5  ;;  %v2011_v7 = vsub.f32 %v619_v30, %v648_v5  ;;  %v1674_v30 = vld [vmem:[%s2417_s5 + $0xe4] sm:$0xf]  ;;  %v1506_v5 = vor.u32 %v1654_v3, %v1503_v4 }
 0x13c   : > { %v661_v8 = vmul.f32 %v2009_v6, %v2009_v6  ;;  %v662_v9 = vmul.f32 %v2011_v7, %v2011_v7 }
 0x13e   : > { %v671_v10 = vsel %vm519_vm0, %v662_v9, 0.0  ;;  %v1652_v9 = vld [vmem:[%s2417_s5 + $0x2c] sm:$0xf0] }
 0x13f   : > { %v635_v11 = vpop.xlane.xlu1 %634  ;;  %v672_v12 = vadd.f32 %v671_v10, %v661_v8  ;;  %v1485_v8 = vld [vmem:[%s2417_s5 + $0x20] sm:$0xf]  ;;  %v1650_v10 = vld [vmem:[%s2417_s5 + $0x24] sm:$0xf] }
 0x140   : > { %v649_v13 = vmul.f32 %v1994_v60, %v635_v11 }
 0x141   : > { %673 = vadd.xlane.f32.xlu2 %v672_v12  ;;  %v1486_v12 = vor.u32 %v1652_v9, %v1485_v8  ;;  %v1669_v8 = vld [vmem:[%s2417_s5 + $0xb4] sm:$0xf0]  ;;  %v1667_v9 = vld [vmem:[%s2417_s5 + $0xac] sm:$0xf] }
 0x142   : > { %v2019_v14 = vsub.f32 %v620_v32, %v649_v13  ;;  %v2021_v15 = vsub.f32 %v621_v42, %v649_v13  ;;  %v1583_v32 = vld [vmem:[%s2417_s5 + $0xf0] sm:$0xf0]  ;;  %v1666_v42 = vld [vmem:[%s2417_s5 + $0xa4] sm:$0xf] }
 0x143   : > { %v1586_v33 = vor.u32 %v1674_v30, %v1583_v32  ;;  %v1554_v45 = vor.u32 %v1666_v42, %v1551_v44  ;;  %v1487_v13 = vld [vmem:[%s2417_s5 + $0x30] sm:$0xf0]  ;;  %v1591_v44 = vld [vmem:[%s2417_s5 + $0xf8] sm:$0xf0] }
 0x144   : > { %v663_v16 = vmul.f32 %v2019_v14, %v2019_v14  ;;  %v664_v17 = vmul.f32 %v2021_v15, %v2021_v15  ;;  %v1471_v30 = vld [vmem:[%s2417_s5 + $0x10] sm:$0xf0] }
 0x145   : > { %1079 = vmatpush.bf16.msrb.mxu0 %v1586_v33  ;;  %v1474_v33 = vor.u32 %v1646_v28, %v1471_v30 }
 0x146   : > { %v675_v18 = vsel %vm519_vm0, %v664_v17, 0.0  ;;  %v1490_v17 = vor.u32 %v1650_v10, %v1487_v13 }
 0x147   : > { %v639_v19 = vpop.xlane.xlu1 %638  ;;  %v676_v20 = vadd.f32 %v675_v18, %v663_v16 }
 0x148   : > { %v650_v21 = vmul.f32 %v1994_v60, %v639_v19 }
 0x149   : > { %677 = vadd.xlane.f32.xlu0 %v676_v20  ;;  %1080 = vmatpush.bf16.msrb.mxu0 %v1570_v36  ;;  %v1597_v20 = vld [vmem:[%s2417_s5 + $0x100] sm:$0xf]  ;;  %v1589_v36 = vld [vmem:[%s2417_s5 + $0xe8] sm:$0xf] }
 0x14a   : > { %v2029_v22 = vsub.f32 %v622_v43, %v650_v21  ;;  %v2031_v23 = vsub.f32 %v623_v50, %v650_v21  ;;  %v1550_v43 = vor.u32 %v1668_v41, %v1549_v40  ;;  %v1535_v50 = vld [vmem:[%s2417_s5 + $0x90] sm:$0xf0]  ;;  %v1680_v21 = vld [vmem:[%s2417_s5 + $0x10c] sm:$0xf0]  ;;  %v1677_v40 = vld [vmem:[%s2417_s5 + $0xf4] sm:$0xf0] }
 0x14b   : > { %v1538_v51 = vor.u32 %v1662_v48, %v1535_v50  ;;  %v1590_v42 = vor.u32 %v1677_v40, %v1589_v36 }
 0x14c   : > { %v665_v24 = vmul.f32 %v2029_v22, %v2029_v22  ;;  %v666_v25 = vmul.f32 %v2031_v23, %v2031_v23  ;;  %1043 = vmatpush.bf16.msrb.mxu1 %v1550_v43  ;;  %v1675_v43 = vld [vmem:[%s2417_s5 + $0xec] sm:$0xf] }
 0x14d   : > { %1081 = vmatpush.bf16.msrb.mxu0 %v1554_v45  ;;  %v753_v45 = vld [vmem:[%s2416_s4] sm:$0x3]  ;;  %v2174_v47 = vor.u32 %v1675_v43, %v1591_v44  ;;  %v1661_v43 = vld [vmem:[%s2417_s5 + $0x74] sm:$0xf0] }
 0x14e   : > { %v679_v26 = vsel %vm519_vm0, %v666_v25, 0.0  ;;  %v1598_v25 = vor.u32 %v1680_v21, %v1597_v20  ;;  %v2197_v57 = vperm.slane %v753_v45, 0  ;;  %v1665_v20 = vld [vmem:[%s2417_s5 + $0x94] sm:$0xf0]  ;;  %v1663_v21 = vld [vmem:[%s2417_s5 + $0x8c] sm:$0xf] }
 0x14f   : > { %v680_v27 = vadd.f32 %v679_v26, %v665_v24  ;;  %v1469_v26 = vld [vmem:[%s2417_s5] sm:$0xf] }
 0x150   : > { %1044 = vmatpush.bf16.msrb.mxu1 %v1534_v49  ;;  %1067 = vmatpush.bf16.msrb.mxu3 %v1598_v25  ;;  %v2178_v49 = vperm.slane %v739_v35, 0 }
 0x151   : > { %681 = vadd.xlane.f32.xlu1 %v680_v27  ;;  %1082 = vmatpush.bf16.msrb.mxu0 %v1538_v51  ;;  %v1648_v27 = vld [vmem:[%s2417_s5 + $0xc] sm:$0xf0] }
 0x152   : > { %v1470_v29 = vor.u32 %v1648_v27, %v1469_v26  ;;  %v1607_v27 = vld [vmem:[%s2417_s5 + $0x118] sm:$0xf0] }
 0x154   : > { %1045 = vmatpush.bf16.msrb.mxu1 %v1518_v56  ;;  %1682 = vmatpush.bf16.msra.mxu3 %v1602_v37  ;;  %v2195_v56 = vperm.slane %v739_v35, 1 }
 0x155   : > { %1083 = vmatpush.bf16.msrb.mxu0 %v1522_v61  ;;  %v1575_v61 = vld [vmem:[%s2417_s5 + $0xd8] sm:$0xf0] }
 0x158   : > { %1046 = vmatpush.bf16.msrb.mxu1 %v1502_v2 }
 0x159   : > { %1084 = vmatpush.bf16.msrb.mxu0 %v1506_v5  ;;  %v1557_v5 = vld [vmem:[%s2417_s5 + $0xa8] sm:$0xf] }
 0x15c   : > { %1047 = vmatpush.bf16.msrb.mxu1 %v1486_v12  ;;  %v1541_v12 = vld [vmem:[%s2417_s5 + $0x88] sm:$0xf] }
 0x15d   : > { %1085 = vmatpush.bf16.msrb.mxu0 %v1490_v17  ;;  %v1542_v26 = vor.u32 %v1665_v20, %v1541_v12 }
 0x160   : > { %1048 = vmatpush.bf16.msrb.mxu1 %v1470_v29 }
 0x161   : > { %1086 = vmatpush.bf16.msrb.mxu0 %v1474_v33 }
 0x164   : > { %1117 = vmatpush.bf16.msra.mxu1 %v1590_v42  ;;  %v1525_v42 = vld [vmem:[%s2417_s5 + $0x68] sm:$0xf] }
 0x165   : > { %1155 = vmatpush.bf16.msra.mxu0 %v2174_v47 }
 0x1ac   : > { %v670_v55 = vpop.xlane.xlu2 %669 }
 0x1ad   : > { %v683_v58 = vmul.f32 %v670_v55, %v1994_v60  ;;  %v1671_v55 = vld [vmem:[%s2417_s5 + $0xcc] sm:$0xf] }
 0x1ae   : > { %v2207_v2 = vor.u32 %v1671_v55, %v1575_v61 }
 0x1af   : > { %v2099_v59 = vadd.f32 1e-05, %v683_v58  ;;  %v1574_v58 = vor.u32 %v1673_v54, %v1573_v53  ;;  %v1657_v53 = vld [vmem:[%s2417_s5 + $0x54] sm:$0xf0] }
 0x1b0   : > { %1156 = vmatpush.bf16.msra.mxu0 %v2207_v2 }
 0x1b1   : > { %1718 = vrsqrt.f32 %v2099_v59  ;;  %vm697_vm4 = vweird.f32 %v2099_v59  ;;  %1118 = vmatpush.bf16.msra.mxu1 %v1574_v58 }
 0x1b4   : > { %v674_v11 = vpop.xlane.xlu2 %673 }
 0x1b5   : > { %v684_v16 = vmul.f32 %v674_v11, %v1994_v60 }
 0x1b7   : > { %v1719_v18 = vpop.eup %1718  ;;  %v2127_v19 = vadd.f32 1e-05, %v684_v16 }
 0x1b8   : > { %v692_v24 = vmul.f32 %v1719_v18, %v2099_v59  ;;  %vm698_vm2 = vweird.f32 %v1719_v18  ;;  %v2204_v59 = vperm.slane %v753_v45, 1 }
 0x1b9   : > { %1720 = vrsqrt.f32 %v2127_v19  ;;  %vm699_vm5 = vmor %vm697_vm4, %vm698_vm2  ;;  %vm707_vm9 = vweird.f32 %v2127_v19 }
 0x1ba   : > { %v693_v32 = vmul.f32 %v1719_v18, %v692_v24  ;;  %v1543_v24 = vld [vmem:[%s2417_s5 + $0x98] sm:$0xf0] }
 0x1bb   : > { %v2262_v37 = vor.u32 %v1663_v21, %v1543_v24  ;;  %v1477_v21 = vld [vmem:[%s2417_s5 + $0x8] sm:$0xf] }
 0x1bc   : > { %v694_v38 = vmul.f32 0.5, %v693_v32  ;;  %v678_v39 = vpop.xlane.xlu0 %677 }
 0x1bd   : > { %v685_v41 = vmul.f32 %v678_v39, %v1994_v60 }
 0x1be   : > { %v695_v46 = vsub.f32 1.5, %v694_v38 }
 0x1bf   : > { %v2176_v48 = vpop.eup %1720  ;;  %v2180_v50 = vadd.f32 1e-05, %v685_v41 }
 0x1c0   : > { %v696_v51 = vmul.f32 %v1719_v18, %v695_v46  ;;  %v702_v52 = vmul.f32 %v2176_v48, %v2127_v19  ;;  %vm708_vm7 = vweird.f32 %v2176_v48  ;;  %v1526_v46 = vor.u32 %v1661_v43, %v1525_v42 }
 0x1c1   : > { %1722 = vrsqrt.f32 %v2180_v50  ;;  %vm709_vm10 = vmor %vm707_vm9, %vm708_vm7  ;;  %vm717_vm12 = vweird.f32 %v2180_v50 }
 0x1c2   : > { %v700_v0 = vsel %vm699_vm5, %v1719_v18, %v696_v51  ;;  %v703_v1 = vmul.f32 %v2176_v48, %v702_v52  ;;  %v1509_v52 = vld [vmem:[%s2417_s5 + $0x48] sm:$0xf] }
 0x1c3   : > { %v731_v3 = vmul.f32 %v700_v0, %v1998_v62  ;;  %v732_v4 = vmul.f32 %v700_v0, %v2000_v63  ;;  %v1558_v62 = vor.u32 %v1669_v8, %v1557_v5  ;;  %v1559_v63 = vld [vmem:[%s2417_s5 + $0xb8] sm:$0xf0]  ;;  %v1510_v61 = vor.u32 %v1657_v53, %v1509_v52  ;;  %v1655_v0 = vld [vmem:[%s2417_s5 + $0x4c] sm:$0xf]  ;;  %v1493_v8 = vld [vmem:[%s2417_s5 + $0x28] sm:$0xf] }
 0x1c4   : > { %v704_v10 = vmul.f32 0.5, %v703_v1  ;;  %v682_v11 = vpop.xlane.xlu1 %681  ;;  %v2230_v18 = vor.u32 %v1667_v9, %v1559_v63  ;;  %v1511_v1 = vld [vmem:[%s2417_s5 + $0x58] sm:$0xf0]  ;;  %v1653_v9 = vld [vmem:[%s2417_s5 + $0x34] sm:$0xf0] }
 0x1c5   : > { %v745_v13 = vmul.f32 %v2178_v49, %v731_v3  ;;  %v746_v16 = vmul.f32 %v2195_v56, %v732_v4  ;;  %v686_v17 = vmul.f32 %v682_v11, %v1994_v60  ;;  %v1679_v60 = vld [vmem:[%s2417_s5 + $0x10c] sm:$0xf]  ;;  %1119 = vmatpush.bf16.msra.mxu1 %v1558_v62  ;;  %v2306_v5 = vor.u32 %v1655_v0, %v1511_v1  ;;  %v1495_v11 = vld [vmem:[%s2417_s5 + $0x38] sm:$0xf0] }
 0x1c6   : > { %v705_v25 = vsub.f32 1.5, %v704_v10  ;;  %v1610_v32 = vor.u32 %v1679_v60, %v1607_v27  ;;  %1157 = vmatpush.bf16.msra.mxu0 %v2230_v18 }
 0x1c7   : > { %v1723_v28 = vpop.eup %1722  ;;  %v759_v29 = vadd.f32 %v2197_v57, %v745_v13  ;;  %v760_v30 = vadd.f32 %v2204_v59, %v746_v16  ;;  %v2250_v31 = vadd.f32 1e-05, %v686_v17  ;;  %v1494_v16 = vor.u32 %v1653_v9, %v1493_v8 }
 0x1c8   : > { %v706_v34 = vmul.f32 %v2176_v48, %v705_v25  ;;  %v712_v35 = vmul.f32 %v1723_v28, %v2180_v50  ;;  %1181 = vmatpush.bf16.msra.mxu2 %v1610_v32  ;;  %vm718_vm11 = vweird.f32 %v1723_v28  ;;  %v1651_v50 = vld [vmem:[%s2417_s5 + $0x2c] sm:$0xf] }
 0x1c9   : > { %v775_v38 = vpack.c.bf16 %v760_v30, %v759_v29  ;;  %1724 = vrsqrt.f32 %v2250_v31  ;;  %1120 = vmatpush.bf16.msra.mxu1 %v1542_v26  ;;  %vm719_vm13 = vmor %vm717_vm12, %vm718_vm11  ;;  %v1498_v20 = vor.u32 %v1651_v50, %v1495_v11  ;;  %v1479_v26 = vld [vmem:[%s2417_s5 + $0x18] sm:$0xf0]  ;;  %vm727_vm15 = vweird.f32 %v2250_v31 }
 0x1ca   : > { %v710_v39 = vsel %vm709_vm10, %v2176_v48, %v706_v34  ;;  %v713_v36 = vmul.f32 %v1723_v28, %v712_v35  ;;  %1158 = vmatpush.bf16.msra.mxu0 %v2262_v37 }
 0x1cb   : > { %782 = vst.msk [vmem:[#allocation2] sm:$0xff] %vm2254_vm8, %v775_v38  ;;  %v733_v19 = vmul.f32 %v710_v39, %v2009_v6  ;;  %v734_v40 = vmul.f32 %v710_v39, %v2011_v7  ;;  %v1659_v6 = vld [vmem:[%s2417_s5 + $0x6c] sm:$0xf]  ;;  %v1527_v7 = vld [vmem:[%s2417_s5 + $0x78] sm:$0xf0] }
 0x1cc   : > { %v714_v41 = vmul.f32 0.5, %v713_v36  ;;  %v2287_v51 = vor.u32 %v1659_v6, %v1527_v7 }
 0x1cd   : > { %v747_v44 = vmul.f32 %v2178_v49, %v733_v19  ;;  %v748_v45 = vmul.f32 %v2195_v56, %v734_v40  ;;  %1121 = vmatpush.bf16.msra.mxu1 %v1526_v46 }
 0x1ce   : > { %v715_v48 = vsub.f32 1.5, %v714_v41  ;;  %1159 = vmatpush.bf16.msra.mxu0 %v2287_v51 }
 0x1cf   : > { %v1725_v54 = vpop.eup %1724  ;;  %v761_v55 = vadd.f32 %v2197_v57, %v747_v44  ;;  %v762_v58 = vadd.f32 %v2204_v59, %v748_v45  ;;  %v1605_v45 = vld [vmem:[%s2417_s5 + $0x108] sm:$0xf] }
 0x1d0   : > { %v716_v3 = vmul.f32 %v1723_v28, %v715_v48  ;;  %v722_v4 = vmul.f32 %v1725_v54, %v2250_v31  ;;  %vm728_vm14 = vweird.f32 %v1725_v54 }
 0x1d1   : > { %v776_v10 = vpack.c.bf16 %v762_v58, %v761_v55  ;;  %1122 = vmatpush.bf16.msra.mxu1 %v1510_v61  ;;  %vm729_vm1 = vmor %vm727_vm15, %vm728_vm14 }
 0x1d2   : > { %v720_v62 = vsel %vm719_vm13, %v1723_v28, %v716_v3  ;;  %v723_v63 = vmul.f32 %v1725_v54, %v722_v4  ;;  %1160 = vmatpush.bf16.msra.mxu0 %v2306_v5  ;;  %v1453_v35 = vld [vmem:[#allocation2] sm:$0xf]  ;;  %v1642_v36 = vld [vmem:[#allocation2 + $0x4] sm:$0xf] }
 0x1d3   : > { %783 = vst.msk [vmem:[#allocation2 + $0x8] sm:$0xff] %vm2254_vm8, %v776_v10  ;;  %v735_v12 = vmul.f32 %v720_v62, %v2019_v14  ;;  %v736_v13 = vmul.f32 %v720_v62, %v2021_v15  ;;  %v1649_v14 = vld [vmem:[%s2417_s5 + $0x14] sm:$0xf0]  ;;  %v1647_v15 = vld [vmem:[%s2417_s5 + $0xc] sm:$0xf] }
 0x1d4   : > { %v724_v17 = vmul.f32 0.5, %v723_v63  ;;  %v1478_v30 = vor.u32 %v1649_v14, %v1477_v21  ;;  %v1482_v32 = vor.u32 %v1647_v15, %v1479_v26 }
 0x1d5   : > { %v749_v24 = vmul.f32 %v2178_v49, %v735_v12  ;;  %v750_v25 = vmul.f32 %v2195_v56, %v736_v13  ;;  %1123 = vmatpush.bf16.msra.mxu1 %v1494_v16 }
 0x1d6   : > { %v725_v60 = vsub.f32 1.5, %v724_v17  ;;  %1161 = vmatpush.bf16.msra.mxu0 %v1498_v20 }
 0x1d7   : > { %v763_v27 = vadd.f32 %v2197_v57, %v749_v24  ;;  %v764_v28 = vadd.f32 %v2204_v59, %v750_v25 }
 0x1d8   : > { %v726_v29 = vmul.f32 %v1725_v54, %v725_v60 }
 0x1d9   : > { %v777_v34 = vpack.c.bf16 %v764_v28, %v763_v27  ;;  %1124 = vmatpush.bf16.msra.mxu1 %v1478_v30 }
 0x1da   : > { %v730_v38 = vsel %vm729_vm1, %v1725_v54, %v726_v29  ;;  %v1643_v39 = vld [vmem:[#allocation2 + $0x4] sm:$0xf0]  ;;  %v1455_v19 = vld [vmem:[#allocation2 + $0x8] sm:$0xf0]  ;;  %1162 = vmatpush.bf16.msra.mxu0 %v1482_v32 }
 0x1db   : > { %784 = vst.msk [vmem:[#allocation2 + $0x10] sm:$0xff] %vm2254_vm8, %v777_v34  ;;  %v737_v40 = vmul.f32 %v730_v38, %v2029_v22  ;;  %v738_v41 = vmul.f32 %v730_v38, %v2031_v23  ;;  %v1454_v42 = vor.u32 %v1643_v39, %v1453_v35  ;;  %v1458_v43 = vor.u32 %v1642_v36, %v1455_v19  ;;  %v1681_v22 = vld [vmem:[%s2417_s5 + $0x114] sm:$0xf0] }
 0x1dc   : > { %v1606_v23 = vor.u32 %v1681_v22, %v1605_v45 }
 0x1dd   : > { %v751_v31 = vmul.f32 %v2178_v49, %v737_v40  ;;  %v752_v44 = vmul.f32 %v2195_v56, %v738_v41  ;;  %1049 = vmatmul.bf16.vlgmr.msrb.gmra.mxu1 %v1454_v42  ;;  %1611 = vmatmul.msk.bf16.vlgmr.msrb.gmra.mxu3 %vm519_vm0, %v1458_v43 }
 0x1de   : > { %1087 = vmatmul.bf16.vlgmr.msrb.gmra.mxu0 %v1454_v42  ;;  %1613 = vmatmul.msk.bf16.vlgmr.msrb.gmra.mxu2 %vm519_vm0, %v1458_v43 }
 0x1df   : > { %v765_v46 = vadd.f32 %v2197_v57, %v751_v31  ;;  %v766_v49 = vadd.f32 %v2204_v59, %v752_v44  ;;  %1683 = vmatpush.bf16.msrb.mxu1 %v2174_v47  ;;  %1143 = vmatpush.bf16.msrb.mxu3 %v1606_v23  ;;  %v826_v47 = vld [vmem:[%s2418_s6] sm:$0xf] }
 0x1e0   : > { %v828_v59 = vperm.slane %v826_v47, 0  ;;  %v831_v34 = vperm.slane %v826_v47, 3  ;;  %v830_v36 = vperm.slane %v826_v47, 2 }
 0x1e1   : > { %v778_v56 = vpack.c.bf16 %v766_v49, %v765_v46 }
 0x1e2   : > { %v1461_v6 = vld [vmem:[#allocation2 + $0x10] sm:$0xf]  ;;  %v1644_v48 = vld [vmem:[#allocation2 + $0x14] sm:$0xf] }
 0x1e3   : > { %785 = vst.msk [vmem:[#allocation2 + $0x18] sm:$0xff] %vm2254_vm8, %v778_v56  ;;  %1684 = vmatpush.bf16.msrb.mxu1 %v2207_v2 }
 0x1e7   : > { %1685 = vmatpush.bf16.msrb.mxu1 %v2230_v18  ;;  %v829_v18 = vperm.slane %v826_v47, 1 }
 0x1ea   : > { %v1645_v7 = vld [vmem:[#allocation2 + $0x14] sm:$0xf0]  ;;  %v1463_v52 = vld [vmem:[#allocation2 + $0x18] sm:$0xf0] }
 0x1eb   : > { %v1462_v53 = vor.u32 %v1645_v7, %v1461_v6  ;;  %v1466_v54 = vor.u32 %v1644_v48, %v1463_v52  ;;  %1686 = vmatpush.bf16.msrb.mxu1 %v2262_v37 }
 0x1ed   : > { %1054 = vmatmul.bf16.gmra.mxu1 %v1462_v53  ;;  %1612 = vmatmul.msk.bf16.gmra.mxu3 %vm519_vm0, %v1466_v54 }
 0x1ee   : > { %1092 = vmatmul.bf16.gmra.mxu0 %v1462_v53  ;;  %1617 = vmatmul.msk.bf16.vlgmr.msra.gmra.mxu2 %vm519_vm0, %v1458_v43 }
 0x1ef   : > { %1687 = vmatpush.bf16.msrb.mxu1 %v2287_v51 }
 0x1f3   : > { %1688 = vmatpush.bf16.msrb.mxu1 %v2306_v5 }
 0x1f7   : > { %1689 = vmatpush.bf16.msrb.mxu1 %v1498_v20 }
 0x1fb   : > { %1690 = vmatpush.bf16.msrb.mxu1 %v1482_v32 }
 0x1fd   : > { %1614 = vmatmul.msk.bf16.vlgmr.msra.gmra.mxu3 %vm519_vm0, %v1466_v54  ;;  %1125 = vmatmul.bf16.vlgmr.msra.gmra.mxu1 %v1454_v42 }
 0x1fe   : > { %1163 = vmatmul.bf16.vlgmr.msra.gmra.mxu0 %v1454_v42  ;;  %1618 = vmatmul.msk.bf16.gmra.mxu2 %vm519_vm0, %v1466_v54 }
 0x20d   : > { %1130 = vmatmul.bf16.gmra.mxu1 %v1462_v53  ;;  %1615 = vmatmul.msk.bf16.vlgmr.msrb.gmra.mxu3 %vm519_vm0, %v1458_v43 }
 0x21d   : > { %1616 = vmatmul.msk.bf16.gmra.mxu3 %vm519_vm0, %v1466_v54  ;;  %1168 = vmatmul.bf16.vlgmr.msrb.gmra.mxu1 %v1462_v53  ;;  %vm1203_vm0 = vcmask 392196  }
 0x21e   : > { %vm2387_vm2 = vmor %vm1203_vm0, %vm779_vm3 }
 0x25a   : > { %v1050_v57 = vpop.f32.mrf.mxu1 }
 0x25b   : > { %v1088_v2 = vpop.f32.mrf.mxu0  ;;  %v1051_v33 = vadd.f32 %v1050_v57, %v828_v59 }
 0x25c   : > { %v1089_v37 = vadd.f32 %v1088_v2, %v829_v18 }
 0x260   : > { %v1069_v51 = vpop.f32.mrf.mxu3 }
 0x261   : > { %v1070_v55 = vadd.f32 %v1069_v51, %v1051_v33  ;;  %v1107_v58 = vpop.f32.mrf.mxu2 }
 0x262   : > { %v1108_v61 = vadd.f32 %v1107_v58, %v1089_v37  ;;  %v1052_v0 = vpop.f32.mrf.mxu1 }
 0x263   : > { %v1090_v3 = vpop.f32.mrf.mxu0  ;;  %v1053_v4 = vadd.f32 %v1052_v0, %v828_v59 }
 0x264   : > { %v1193_v1 = vpack.c.bf16 %v1108_v61, %v1070_v55  ;;  %v1091_v5 = vadd.f32 %v1090_v3, %v829_v18 }
 0x266   : > { %1201 = vst [vmem:[%s2380_s9] sm:$0xff] %v1193_v1 }
 0x268   : > { %v1071_v8 = vpop.f32.mrf.mxu3 }
 0x269   : > { %v1072_v9 = vadd.f32 %v1071_v8, %v1053_v4  ;;  %v1109_v10 = vpop.f32.mrf.mxu2 }
 0x26a   : > { %v1110_v50 = vadd.f32 %v1109_v10, %v1091_v5  ;;  %v1055_v11 = vpop.f32.mrf.mxu1 }
 0x26b   : > { %v1093_v13 = vpop.f32.mrf.mxu0  ;;  %v1056_v21 = vadd.f32 %v1055_v11, %v828_v59 }
 0x26c   : > { %v1195_v62 = vpack.c.bf16 %v1110_v50, %v1072_v9  ;;  %v1094_v24 = vadd.f32 %v1093_v13, %v829_v18 }
 0x26e   : > { %1206 = vst [vmem:[%s2380_s9 + $0x10] sm:$0xff] %v1195_v62 }
 0x270   : > { %v1074_v63 = vpop.f32.mrf.mxu3 }
 0x271   : > { %v1075_v14 = vadd.f32 %v1074_v63, %v1056_v21  ;;  %v1183_v38 = vpop.f32.mrf.mxu2 }
 0x272   : > { %v1057_v12 = vpop.f32.mrf.mxu1 }
 0x273   : > { %v1095_v20 = vpop.f32.mrf.mxu0  ;;  %v1058_v27 = vadd.f32 %v1057_v12, %v828_v59 }
 0x274   : > { %v1096_v28 = vadd.f32 %v1095_v20, %v829_v18 }
 0x278   : > { %v1076_v16 = vpop.f32.mrf.mxu3 }
 0x279   : > { %v1077_v32 = vadd.f32 %v1076_v16, %v1058_v27  ;;  %v1185_v46 = vpop.f32.mrf.mxu2 }
 0x27a   : > { %v1126_v17 = vpop.f32.mrf.mxu1 }
 0x27b   : > { %v1164_v29 = vpop.f32.mrf.mxu0  ;;  %v1127_v41 = vadd.f32 %v1126_v17, %v830_v36 }
 0x27c   : > { %v1165_v40 = vadd.f32 %v1164_v29, %v831_v34 }
 0x27e   : > { %v1184_v43 = vadd.f32 %v1183_v38, %v1165_v40 }
 0x280   : > { %v1112_v25 = vpop.f32.mrf.mxu3 }
 0x281   : > { %v1113_v15 = vadd.f32 %v1112_v25, %v1094_v24  ;;  %v1188_v47 = vpop.f32.mrf.mxu2 }
 0x282   : > { %v1128_v26 = vpop.f32.mrf.mxu1 }
 0x283   : > { %v1197_v60 = vpack.c.bf16 %v1113_v15, %v1075_v14  ;;  %v1166_v44 = vpop.f32.mrf.mxu0  ;;  %v1129_v56 = vadd.f32 %v1128_v26, %v830_v36 }
 0x284   : > { %v1167_v49 = vadd.f32 %v1166_v44, %v831_v34 }
 0x285   : > { %1208 = vst [vmem:[%s2380_s9 + $0x20] sm:$0xff] %v1197_v60 }
 0x286   : > { %v1186_v7 = vadd.f32 %v1185_v46, %v1167_v49 }
 0x288   : > { %v1114_v30 = vpop.f32.mrf.mxu3 }
 0x289   : > { %v1115_v35 = vadd.f32 %v1114_v30, %v1096_v28  ;;  %v1190_v58 = vpop.f32.mrf.mxu2 }
 0x28a   : > { %v1131_v39 = vpop.f32.mrf.mxu1 }
 0x28b   : > { %v1199_v19 = vpack.c.bf16 %v1115_v35, %v1077_v32  ;;  %v1132_v57 = vadd.f32 %v1131_v39, %v830_v36 }
 0x28d   : > { %1210 = vst [vmem:[%s2380_s9 + $0x30] sm:$0xff] %v1199_v19 }
 0x290   : > { %v1145_v42 = vpop.f32.mrf.mxu3 }
 0x291   : > { %v1146_v31 = vadd.f32 %v1145_v42, %v1127_v41 }
 0x292   : > { %v1133_v22 = vpop.f32.mrf.mxu1 }
 0x293   : > { %v1194_v23 = vpack.c.bf16 %v1184_v43, %v1146_v31  ;;  %v1134_v55 = vadd.f32 %v1133_v22, %v830_v36 }
 0x295   : > { %1205 = vst.msk [vmem:[%s2380_s9 + $0x8] sm:$0xff] %vm2387_vm2, %v1194_v23 }
 0x298   : > { %v1147_v6 = vpop.f32.mrf.mxu3 }
 0x299   : > { %v1148_v48 = vadd.f32 %v1147_v6, %v1129_v56 }
 0x29a   : > { %v1169_v52 = vpop.f32.mrf.mxu1 }
 0x29b   : > { %v1196_v53 = vpack.c.bf16 %v1186_v7, %v1148_v48  ;;  %v1170_v54 = vadd.f32 %v1169_v52, %v831_v34 }
 0x29d   : > { %1207 = vst.msk [vmem:[%s2380_s9 + $0x18] sm:$0xff] %vm2387_vm2, %v1196_v53  ;;  %v1189_v2 = vadd.f32 %v1188_v47, %v1170_v54 }
 0x2a0   : > { %v1150_v59 = vpop.f32.mrf.mxu3 }
 0x2a1   : > { %v1151_v18 = vadd.f32 %v1150_v59, %v1132_v57 }
 0x2a2   : > { %v1171_v33 = vpop.f32.mrf.mxu1 }
 0x2a3   : > { %v1198_v37 = vpack.c.bf16 %v1189_v2, %v1151_v18  ;;  %v1172_v51 = vadd.f32 %v1171_v33, %v831_v34 }
 0x2a5   : > { %1209 = vst.msk [vmem:[%s2380_s9 + $0x28] sm:$0xff] %vm2387_vm2, %v1198_v37  ;;  %v1191_v0 = vadd.f32 %v1190_v58, %v1172_v51 }
 0x2a8   : > { %v1152_v61 = vpop.f32.mrf.mxu3 }
 0x2a9   : > { %v1153_v1 = vadd.f32 %v1152_v61, %v1134_v55 }
 0x2ab   : > { %v1200_v3 = vpack.c.bf16 %v1191_v0, %v1153_v1 }
 0x2ad   : > { %1211 = vst.msk [vmem:[%s2380_s9 + $0x38] sm:$0xff] %vm2387_vm2, %v1200_v3 }
 0x2ae PF: > { %s19_s29 = sadd.s32 1, %s1748_s29   ;;  %s2425_s27 = smov %s1744_s28 }
 0x2af   : > { %p16_p5 = scmp.ge.s32.totalorder %s19_s29, 4   ;;  %s2426_s28 = smov %s2428_s30 }
 0x2b1   :  { %18 = sbr.rel (!%p16_p5) target bundleno = 2 (0x2), region = 100 }

// kernel: bsablock_pallas.4
= control target key start
LH: loop header
LB: loop body
LE: loop exit
PB: predicated region body
PF: predicated region fallthrough
CT: control target
= control target key end

     0   :  { %s1219_s6 = smov 0   ;;  %s1533_s0 = inlined_call_operand.vmem [shape: bf16[4,16,432], index: 0, kind: input, shape index: {}]   ;;  %s1534_s1 = inlined_call_operand.vmem [shape: bf16[4,16,144], index: 1, kind: output, shape index: {}]  }
   0x1 LB: > { %s1000_s7 = sadd.s32 4294967295, %s1193_s6   ;;  %p1004_p0 = scmp.ge.s32.totalorder %s1193_s6, 1  ;;  %s1193_s6 = sphi %s1219_s6, %s11_s6  }
   0x2   : > { %p89_p1 = scmp.lt.s32.totalorder %s1193_s6, 3 }
   0x4   : > { %p90_p2 = pnand %p1004_p0, %p89_p1 }
   0x5   : > { %s1005_s8 = sshll.u32 (!%p90_p2), %s1000_s7, 1  ;;  %s1195_s13 = smov (!%p90_p2), 112  }
   0x6   : > { %93 = sbr.rel (%p90_p2) target bundleno = 1290 (0x50a), region = 24  ;;  %p112_p3 = scmp.lt.s32.totalorder (!%p90_p2), %s1005_s8, 3 }
   0x7   : > { %s1196_s14 = smov (!%p90_p2), 96   ;;  %s1197_s15 = smov (!%p90_p2), 76  }
   0x8   : > { %s1198_s16 = smov (!%p90_p2), 92   ;;  %s1199_s17 = smov (!%p90_p2), 40  }
   0x9   : > { %s1200_s18 = smov (!%p90_p2), 4   ;;  %s1201_s19 = smov (!%p90_p2), 56  }
   0xa   : > { %s1202_s20 = smov (!%p90_p2), 20   ;;  %s1203_s21 = smov (!%p90_p2), 60  }
   0xb   : > { %s1536_s8 = smov (!%p112_p3, %s1005_s8), 3  ;;  %vm170_vm0 = vcmask 293888   ;;  %vm223_vm1 = vcmask 130048   ;;  %vm689_vm2 = vcmask 31744   ;;  %s1204_s22 = smov 24   ;;  %vm675_vm3 = vcmask 162816  }
   0xc   : > { %s1061_s9 = sshll.u32 %s1536_s8, 5  ;;  %s1205_s23 = smov 116   ;;  %vm599_vm4 = vcmask 195584   ;;  %vm921_vm5 = vcmask 588800   ;;  %vm926_vm6 = vcmask 883712   ;;  %vm935_vm7 = vcmask 1043456  }
   0xd   : > { %s1233_s12 = scalar_lea.vmem %s1533_s0, %s1061_s9  ;;  %s1206_s24 = smov 36   ;;  %vm936_vm8 = vcmask 130052  }
   0xe   : > { %v126_v0 = vld [vmem:[%s1233_s12] sm:$0xff]  ;;  %v128_v1 = vld [vmem:[%s1233_s12 + $0x10] sm:$0xff]  ;;  %v1262_v18 = vld [vmem:[%s1233_s12 + $0x28] sm:$0xff]  ;;  %s1207_s25 = smov 72   ;;  %s1208_s26 = smov 108  }
   0xf   : > { %v130_v2 = vld [vmem:[%s1233_s12 + $0x20] sm:$0xff]  ;;  %v1238_v3 = vunpack.c.h.bf16 %v126_v0  ;;  %v1240_v4 = vunpack.c.h.bf16 %v128_v1  ;;  %v132_v5 = vld [vmem:[%s1233_s12 + $0x30] sm:$0xff]  ;;  %v1265_v19 = vld [vmem:[%s1233_s12 + $0x38] sm:$0xff]  ;;  %v1271_v21 = vunpack.c.l.bf16 %v1262_v18  ;;  %v134_v34 = vunpack.c.l.bf16 %v126_v0  ;;  %s1062_s27 = sshll.u32 %s1536_s8, 4 }
  0x10   : > { %v1243_v6 = vunpack.c.h.bf16 %v130_v2  ;;  %v1245_v7 = vunpack.c.h.bf16 %v132_v5  ;;  %v1268_v20 = vld [vmem:[%s1233_s12 + $0x8] sm:$0xff]  ;;  %v1274_v22 = vunpack.c.l.bf16 %v1265_v19  ;;  %v1277_v23 = vld [vmem:[%s1233_s12 + $0x18] sm:$0xff]  ;;  %v138_v36 = vunpack.c.l.bf16 %v128_v1  ;;  %s123_s30 = scalar_lea.vmem %s1534_s1, %s1062_s27  ;;  %vm937_vm9 = vmor %vm936_vm8, %vm935_vm7 }
  0x11   : > { %v154_v8 = vpack.c.bf16 %v1238_v3, %v1238_v3  ;;  %v155_v9 = vpack.c.bf16 %v1240_v4, %v1240_v4  ;;  %v1280_v24 = vunpack.c.l.bf16 %v1268_v20  ;;  %v1283_v25 = vunpack.c.l.bf16 %v1277_v23 }
  0x12   : > { %v156_v12 = vpack.c.bf16 %v1243_v6, %v1243_v6  ;;  %v157_v13 = vpack.c.bf16 %v1245_v7, %v1245_v7  ;;  %v274_v26 = vpack.c.bf16 %v1271_v21, %v1271_v21  ;;  %v275_v27 = vpack.c.bf16 %v1274_v22, %v1274_v22 }
  0x13   : > { %v165_v10 = vunpack.c.l.b16 %v154_v8  ;;  %v166_v11 = vunpack.c.l.b16 %v155_v9  ;;  %v272_v28 = vpack.c.bf16 %v1280_v24, %v1280_v24  ;;  %v273_v29 = vpack.c.bf16 %v1283_v25, %v1283_v25 }
  0x14   : > { %v198_v15 = vunpack.c.l.b16 %v156_v12  ;;  %v199_v16 = vunpack.c.l.b16 %v157_v13  ;;  %v313_v30 = vunpack.c.l.b16 %v274_v26  ;;  %v314_v31 = vunpack.c.l.b16 %v275_v27 }
  0x15   : > { %v1255_v14 = vpack.c.b16 %v166_v11, %v165_v10  ;;  %v283_v32 = vunpack.c.l.b16 %v272_v28  ;;  %v284_v33 = vunpack.c.l.b16 %v273_v29  ;;  %v150_v38 = vpack.c.bf16 %v134_v34, %v134_v34 }
  0x16   : > { %v1258_v17 = vpack.c.b16 %v199_v16, %v198_v15  ;;  %v1293_v35 = vpack.c.b16 %v314_v31, %v313_v30  ;;  %v151_v39 = vpack.c.bf16 %v138_v36, %v138_v36  ;;  %v142_v44 = vunpack.c.l.bf16 %v130_v2 }
  0x17   : > { %168 = vrot.lane.b32.xlu0 %v1255_v14, %s1195_s13  ;;  %v1295_v37 = vpack.c.b16 %v284_v33, %v283_v32  ;;  %v160_v41 = vunpack.c.l.b16 %v150_v38  ;;  %v146_v45 = vunpack.c.l.bf16 %v132_v5 }
  0x18   : > { %316 = vrot.lane.b32.xlu1 %v1293_v35, %s1196_s14  ;;  %v161_v43 = vunpack.c.l.b16 %v151_v39  ;;  %v152_v47 = vpack.c.bf16 %v142_v44, %v142_v44  ;;  %v659_v39 = vpack.c.bf16 %v1280_v24, %v1238_v3  ;;  %v661_v44 = vpack.c.bf16 %v1271_v21, %v1243_v6  ;;  %v1050_v21 = vld [vmem:[%s1233_s12 + $0x20] sm:$0xf] }
  0x19   : > { %286 = vrot.lane.b32.xlu2 %v1295_v37, %s1196_s14  ;;  %v153_v48 = vpack.c.bf16 %v146_v45, %v146_v45  ;;  %v662_v45 = vpack.c.bf16 %v1274_v22, %v1245_v7  ;;  %v1069_v7 = vld [vmem:[%s1233_s12 + $0x2c] sm:$0xf0] }
  0x1a   : > { %v1301_v46 = vpack.c.b16 %v161_v43, %v160_v41  ;;  %v193_v51 = vunpack.c.l.b16 %v152_v47  ;;  %v679_v41 = vunpack.c.l.b16 %v659_v39  ;;  %v727_v3 = vunpack.c.h.b16 %v661_v44 }
  0x1b   : > { %v194_v52 = vunpack.c.l.b16 %v153_v48  ;;  %v1051_v22 = vor.u32 %v1069_v7, %v1050_v21  ;;  %v1041_v48 = vld [vmem:[%s1233_s12] sm:$0xf] }
  0x1d   : > { %v1307_v53 = vpack.c.b16 %v194_v52, %v193_v51  ;;  %v1052_v51 = vld [vmem:[%s1233_s12 + $0x30] sm:$0xf0]  ;;  %v726_v52 = vunpack.c.l.b16 %v661_v44 }
  0x1f   : > { %201 = vrot.lane.b32.xlu0 %v1258_v17, %s1195_s13 }
  0x21   : > { %338 = vrot.lane.b32.xlu2 %v1255_v14, %s1197_s15 }
  0x29   : > { %362 = vrot.lane.b32.xlu2 %v1258_v17, %s1197_s15 }
  0x73   : > { %v287_v54 = vpop.permute.xlu2 %286 }
  0x74   : > { %299 = vmatpush.bf16.msra.mxu2 %v287_v54  ;;  %v728_v54 = vunpack.c.l.b16 %v662_v45 }
  0x7b   : > { %v339_v56 = vpop.permute.xlu2 %338 }
  0x7c   : > { %v344_v57 = vsel %vm170_vm0, %v339_v56, 0  ;;  %v730_v56 = vpack.c.b16 %v728_v54, %v726_v52 }
  0x7d   : > { %353 = vmatpush.bf16.xpose.msrb.mxu2 %v344_v57  ;;  %v1063_v57 = vld [vmem:[%s1233_s12 + $0x4] sm:$0xf] }
  0x83   : > { %v363_v60 = vpop.permute.xlu2 %362 }
  0x84   : > { %v368_v61 = vsel %vm170_vm0, %v363_v60, 0 }
  0x89   : > { %v169_v40 = vpop.permute.xlu0 %168 }
  0x8a   : > { %v175_v42 = vsel %vm170_vm0, %v169_v40, 0  ;;  %v317_v55 = vpop.permute.xlu1 %316  ;;  %v660_v40 = vpack.c.bf16 %v1283_v25, %v1240_v4  ;;  %v729_v4 = vunpack.c.h.b16 %v662_v45  ;;  %v680_v25 = vunpack.c.h.b16 %v659_v39 }
  0x8b   : > { %184 = vmatpush.bf16.xpose.msra.mxu0 %v175_v42  ;;  %329 = vmatpush.bf16.msra.mxu3 %v317_v55 }
  0x8c   : > { %v681_v42 = vunpack.c.l.b16 %v660_v40  ;;  %v731_v24 = vpack.c.b16 %v729_v4, %v727_v3  ;;  %v682_v47 = vunpack.c.h.b16 %v660_v40 }
  0x8e   : > { %v683_v43 = vpack.c.b16 %v681_v42, %v679_v41  ;;  %v684_v6 = vpack.c.b16 %v682_v47, %v680_v25  ;;  %v1023_v41 = vld [vmem:[%s1233_s12 + $0x8] sm:$0xf]  ;;  %v1066_v42 = vld [vmem:[%s1233_s12 + $0x14] sm:$0xf0] }
  0x8f   : > { %377 = vmatpush.bf16.xpose.msrb.mxu3 %v368_v61 }
  0x91   : > { %v202_v49 = vpop.permute.xlu0 %201 }
  0x92   : > { %1011 = vmatmul.msk.bf16.vlgmr.msra.gmra.mxu0 %vm170_vm0, %v1301_v46  ;;  %v207_v50 = vsel %vm170_vm0, %v202_v49, 0  ;;  %v1065_v49 = vld [vmem:[%s1233_s12 + $0xc] sm:$0xf0] }
  0x93   : > { %216 = vmatpush.bf16.xpose.msra.mxu1 %v207_v50  ;;  %v1067_v50 = vld [vmem:[%s1233_s12 + $0x24] sm:$0xf] }
  0x94   : > { %v1055_v55 = vor.u32 %v1067_v50, %v1052_v51 }
  0x9a   : > { %1012 = vmatmul.msk.bf16.vlgmr.msra.gmra.mxu1 %vm170_vm0, %v1307_v53 }
 0x10f   : > { %v186_v58 = vpop.f32.mrf.mxu0 }
 0x110   : > { %v224_v59 = vsel %vm223_vm1, %v186_v58, -inf }
 0x111   : > { %225 = vmax.xlane.f32.xlu1 %v224_v59 }
 0x117   : > { %v188_v62 = vpop.f32.mrf.mxu0  ;;  %v218_v63 = vpop.f32.mrf.mxu1 }
 0x118   : > { %v230_v0 = vsel %vm223_vm1, %v218_v63, -inf  ;;  %v227_v1 = vsel %vm223_vm1, %v188_v62, -inf }
 0x119   : > { %231 = vmax.xlane.f32.xlu2 %v230_v0  ;;  %228 = vmax.xlane.f32.xlu1 %v227_v1 }
 0x11f   : > { %v220_v2 = vpop.f32.mrf.mxu1 }
 0x120   : > { %v233_v5 = vsel %vm223_vm1, %v220_v2, -inf }
 0x121   : > { %234 = vmax.xlane.f32.xlu2 %v233_v5 }
 0x132   : > { %336 = vrot.lane.b32.xlu1 %v1301_v46, %s1198_s16 }
 0x139   : > { %484 = vrot.lane.b32.xlu2 %v1255_v14, %s1199_s17 }
 0x184   : > { %v226_v8 = vpop.xlane.xlu1 %225 }
 0x185   : > { %v236_v9 = vsub.f32 %v186_v58, %v226_v8  ;;  %v1043_v58 = vld [vmem:[%s1233_s12 + $0x10] sm:$0xf0] }
 0x186   : > { %v1046_v59 = vor.u32 %v1063_v57, %v1043_v58 }
 0x187   : > { %v240_v10 = vmul.f32 1.442695, %v236_v9 }
 0x189   : > { %1123 = vpow2.f32 %v240_v10 }
 0x18c   : > { %v232_v11 = vpop.xlane.xlu2 %231  ;;  %v229_v12 = vpop.xlane.xlu1 %228 }
 0x18d   : > { %v238_v13 = vsub.f32 %v218_v63, %v232_v11  ;;  %v237_v15 = vsub.f32 %v188_v62, %v229_v12 }
 0x18f   : > { %v1321_v16 = vpop.eup %1123  ;;  %v244_v26 = vmul.f32 1.442695, %v238_v13  ;;  %v242_v27 = vmul.f32 1.442695, %v237_v15 }
 0x190   : > { %v248_v28 = vsel %vm223_vm1, %v1321_v16, 0.0 }
 0x191   : > { %1125 = vpow2.f32 %v244_v26  ;;  %249 = vadd.xlane.f32.xlu0 %v248_v28 }
 0x192   : > { %1127 = vpow2.f32 %v242_v27 }
 0x194   : > { %v235_v29 = vpop.xlane.xlu2 %234 }
 0x195   : > { %v239_v14 = vsub.f32 %v220_v2, %v235_v29 }
 0x197   : > { %v1325_v30 = vpop.eup %1125  ;;  %v246_v31 = vmul.f32 1.442695, %v239_v14 }
 0x198   : > { %v1327_v32 = vpop.eup %1127  ;;  %v254_v33 = vsel %vm223_vm1, %v1325_v30, 0.0 }
 0x199   : > { %1129 = vpow2.f32 %v246_v31  ;;  %255 = vadd.xlane.f32.xlu2 %v254_v33  ;;  %v251_v34 = vsel %vm223_vm1, %v1327_v32, 0.0 }
 0x19a   : > { %252 = vadd.xlane.f32.xlu1 %v251_v34 }
 0x19f   : > { %v1333_v36 = vpop.eup %1129 }
 0x1a0   : > { %v257_v38 = vsel %vm223_vm1, %v1333_v36, 0.0 }
 0x1a2   : > { %258 = vadd.xlane.f32.xlu1 %v257_v38 }
 0x1a4   : > { %v337_v60 = vpop.permute.xlu1 %336 }
 0x1a5   : > { %360 = vrot.lane.b32.xlu0 %v1307_v53, %s1198_s16 }
 0x1ad   : > { %685 = vrot.lane.b32.xlu0 %v683_v43, %s1200_s18  ;;  %v1024_v43 = vor.u32 %v1066_v42, %v1023_v41 }
 0x1b1   : > { %482 = vrot.lane.b32.xlu2 %v1301_v46, %s1201_s19  ;;  %v1042_v46 = vor.u32 %v1065_v49, %v1041_v48 }
 0x1b5   : > { %734 = vrot.lane.b32.xlu0 %v731_v24, %s1200_s18 }
 0x1b9   : > { %687 = vrot.lane.b32.xlu2 %v684_v6, %s1200_s18 }
 0x1bb   : > { %508 = vrot.lane.b32.xlu1 %v1258_v17, %s1199_s17  ;;  %v485_v17 = vpop.permute.xlu2 %484 }
 0x1bc   : > { %v490_v26 = vsel %vm170_vm0, %v485_v17, 0 }
 0x1bd   : > { %719 = vrot.lane.b32.xlu0 %v1051_v22, %s1202_s20 }
 0x1c1   : > { %671 = vrot.lane.b32.xlu2 %v1042_v46, %s1202_s20 }
 0x1c3   : > { %506 = vrot.lane.b32.xlu1 %v1307_v53, %s1201_s19 }
 0x1c5   : > { %437 = vrot.lane.b32.xlu0 %v1295_v37, %s1203_s21 }
 0x1c9   : > { %721 = vrot.lane.b32.xlu2 %v1055_v55, %s1202_s20 }
 0x1cb   : > { %732 = vrot.lane.b32.xlu1 %v730_v56, %s1200_s18 }
 0x1d1   : > { %462 = vrot.lane.b32.xlu2 %v1293_v35, %s1203_s21 }
 0x1d3   : > { %673 = vrot.lane.b32.xlu1 %v1046_v59, %s1202_s20 }
 0x1d9   : > { %595 = vrot.lane.b32.xlu2 %v1024_v43, %s1204_s22 }
 0x204   : > { %v250_v61 = vpop.xlane.xlu0 %249 }
 0x205   : > { %1131 = vrcp.f32 %v250_v61 }
 0x20b   : > { %v1132_v63 = vpop.eup %1131 }
 0x20c   : > { %v256_v53 = vpop.xlane.xlu2 %255  ;;  %v264_v0 = vmul.f32 %v1132_v63, %v1321_v16 }
 0x20d   : > { %v253_v62 = vpop.xlane.xlu1 %252 }
 0x20e   : > { %1133 = vrcp.f32 %v253_v62  ;;  %v268_v8 = vpack.c.bf16 %v264_v0, %v264_v0 }
 0x20f   : > { %1135 = vrcp.f32 %v256_v53 }
 0x210   : > { %v278_v37 = vunpack.c.l.b16 %v268_v8 }
 0x214   : > { %v1134_v1 = vpop.eup %1133  ;;  %v483_v13 = vpop.permute.xlu2 %482 }
 0x215   : > { %v259_v2 = vpop.xlane.xlu1 %258  ;;  %v265_v5 = vmul.f32 %v1134_v1, %v1327_v32  ;;  %v1136_v9 = vpop.eup %1135 }
 0x216   : > { %1137 = vrcp.f32 %v259_v2  ;;  %v266_v11 = vmul.f32 %v1136_v9, %v1325_v30 }
 0x217   : > { %v269_v35 = vpack.c.bf16 %v265_v5, %v265_v5  ;;  %v361_v28 = vpop.permute.xlu0 %360 }
 0x218   : > { %v270_v27 = vpack.c.bf16 %v266_v11, %v266_v11 }
 0x219   : > { %v279_v10 = vunpack.c.l.b16 %v269_v35 }
 0x21a   : > { %v308_v14 = vunpack.c.l.b16 %v270_v27 }
 0x21b   : > { %v280_v12 = vpack.c.b16 %v279_v10, %v278_v37 }
 0x21c   : > { %v1138_v15 = vpop.eup %1137  ;;  %v688_v30 = vpop.permute.xlu2 %687 }
 0x21d   : > { %1013 = vmatmul.msk.bf16.vlgmr.msra.gmra.mxu2 %vm223_vm1, %v280_v12  ;;  %v267_v16 = vmul.f32 %v1138_v15, %v1333_v36 }
 0x21e   : > { %499 = vmatpush.bf16.xpose.msra.mxu2 %v490_v26 }
 0x21f   : > { %v271_v29 = vpack.c.bf16 %v267_v16, %v267_v16  ;;  %v686_v33 = vpop.permute.xlu0 %685 }
 0x220   : > { %v690_v34 = vsel %vm689_vm2, %v686_v33, %v688_v30 }
 0x221   : > { %v309_v31 = vunpack.c.l.b16 %v271_v29  ;;  %v695_v38 = vsel %vm170_vm0, %v690_v34, 0 }
 0x223   : > { %v310_v32 = vpack.c.b16 %v309_v31, %v308_v14 }
 0x224   : > { %v672_v24 = vpop.permute.xlu2 %671 }
 0x225   : > { %1014 = vmatmul.msk.bf16.vlgmr.msra.gmra.mxu3 %vm223_vm1, %v310_v32 }
 0x227   : > { %v735_v44 = vpop.permute.xlu0 %734 }
 0x22c   : > { %v722_v6 = vpop.permute.xlu2 %721 }
 0x22d   : > { %1015 = vmatmul.msk.bf16.vlgmr.msrb.gmra.mxu2 %vm170_vm0, %v337_v60  ;;  %v509_v36 = vpop.permute.xlu1 %508 }
 0x22e   : > { %v514_v39 = vsel %vm170_vm0, %v509_v36, 0  ;;  %704 = vmatpush.bf16.xpose.msrb.mxu2 %v695_v38 }
 0x22f   : > { %523 = vmatpush.bf16.xpose.msra.mxu3 %v514_v39  ;;  %v720_v21 = vpop.permute.xlu0 %719 }
 0x230   : > { %v723_v7 = vsel %vm675_vm3, %v720_v21, %v722_v6 }
 0x234   : > { %v463_v60 = vpop.permute.xlu2 %462 }
 0x235   : > { %1016 = vmatmul.msk.bf16.vlgmr.msrb.gmra.mxu3 %vm170_vm0, %v361_v28  ;;  %v507_v40 = vpop.permute.xlu1 %506  ;;  %475 = vmatpush.bf16.msrb.mxu1 %v463_v60 }
 0x237   : > { %v438_v61 = vpop.permute.xlu0 %437 }
 0x238   : > { %450 = vmatpush.bf16.msrb.mxu0 %v438_v61 }
 0x23d   : > { %1019 = vmatmul.msk.bf16.vlgmr.msra.gmra.mxu2 %vm170_vm0, %v483_v13  ;;  %v733_v45 = vpop.permute.xlu1 %732  ;;  %v1421_v13 = vpop.permute.xlu2 %595 }
 0x23e   : > { %v736_v3 = vsel %vm689_vm2, %v733_v45, %v735_v44 }
 0x23f   : > { %v741_v4 = vsel %vm170_vm0, %v736_v3, 0 }
 0x240   : > { %750 = vmatpush.bf16.xpose.msrb.mxu3 %v741_v4 }
 0x245   : > { %1020 = vmatmul.msk.bf16.vlgmr.msra.gmra.mxu3 %vm170_vm0, %v507_v40  ;;  %v674_v25 = vpop.permute.xlu1 %673 }
 0x246   : > { %v676_v47 = vsel %vm675_vm3, %v672_v24, %v674_v25 }
 0x24d   : > { %1047 = vmatmul.msk.bf16.vlgmr.msrb.gmra.mxu2 %vm170_vm0, %v676_v47 }
 0x255   : > { %1056 = vmatmul.msk.bf16.vlgmr.msrb.gmra.mxu3 %vm170_vm0, %v723_v7 }
 0x2a0   : > { %v1386_v22 = vpop.f32.mrf.mxu2 }
 0x2a8   : > { %v1388_v48 = vpop.f32.mrf.mxu2  ;;  %v1390_v49 = vpop.f32.mrf.mxu3 }
 0x2b0   : > { %v1392_v46 = vpop.f32.mrf.mxu3  ;;  %v355_v50 = vpop.f32.mrf.mxu2 }
 0x2b1   : > { %v384_v51 = vsel %vm223_vm1, %v355_v50, -inf }
 0x2b2   : > { %385 = vmax.xlane.f32.xlu1 %v384_v51 }
 0x2b8   : > { %v357_v52 = vpop.f32.mrf.mxu2  ;;  %v379_v54 = vpop.f32.mrf.mxu3 }
 0x2b9   : > { %v387_v55 = vsel %vm223_vm1, %v357_v52, -inf  ;;  %v390_v56 = vsel %vm223_vm1, %v379_v54, -inf }
 0x2ba   : > { %388 = vmax.xlane.f32.xlu0 %v387_v55  ;;  %391 = vmax.xlane.f32.xlu2 %v390_v56  ;;  %v1032_v55 = vld [vmem:[%s1233_s12 + $0x28] sm:$0xf]  ;;  %v1070_v56 = vld [vmem:[%s1233_s12 + $0x34] sm:$0xf0] }
 0x2bb   : > { %v1033_v61 = vor.u32 %v1070_v56, %v1032_v55 }
 0x2c0   : > { %v381_v57 = vpop.f32.mrf.mxu3  ;;  %v501_v58 = vpop.f32.mrf.mxu2 }
 0x2c1   : > { %v530_v59 = vsel %vm223_vm1, %v501_v58, -inf  ;;  %v393_v17 = vsel %vm223_vm1, %v381_v57, -inf }
 0x2c2   : > { %531 = vmax.xlane.f32.xlu0 %v530_v59  ;;  %394 = vmax.xlane.f32.xlu1 %v393_v17 }
 0x2c8   : > { %v1399_v53 = vpop.f32.mrf.mxu2  ;;  %v525_v62 = vpop.f32.mrf.mxu3 }
 0x2c9   : > { %v533_v63 = vsel %vm223_vm1, %v1399_v53, -inf  ;;  %v536_v0 = vsel %vm223_vm1, %v525_v62, -inf }
 0x2ca   : > { %534 = vmax.xlane.f32.xlu2 %v533_v63  ;;  %537 = vmax.xlane.f32.xlu1 %v536_v0 }
 0x2d0   : > { %v527_v1 = vpop.f32.mrf.mxu3  ;;  %v1404_v2 = vpop.f32.mrf.mxu2 }
 0x2d1   : > { %v539_v5 = vsel %vm223_vm1, %v527_v1, -inf  ;;  %v757_v8 = vsel %vm223_vm1, %v1404_v2, -inf }
 0x2d2   : > { %540 = vmax.xlane.f32.xlu0 %v539_v5  ;;  %758 = vmax.xlane.f32.xlu2 %v757_v8  ;;  %v1034_v5 = vld [vmem:[%s1233_s12 + $0x38] sm:$0xf0] }
 0x2d8   : > { %v1409_v9 = vpop.f32.mrf.mxu2  ;;  %v1411_v35 = vpop.f32.mrf.mxu3 }
 0x2d9   : > { %v763_v37 = vsel %vm223_vm1, %v1411_v35, -inf  ;;  %v760_v10 = vsel %vm223_vm1, %v1409_v9, -inf }
 0x2da   : > { %764 = vmax.xlane.f32.xlu0 %v763_v37  ;;  %761 = vmax.xlane.f32.xlu1 %v760_v10 }
 0x2e0   : > { %v1417_v11 = vpop.f32.mrf.mxu3 }
 0x2e1   : > { %v766_v12 = vsel %vm223_vm1, %v1417_v11, -inf }
 0x2e2   : > { %767 = vmax.xlane.f32.xlu2 %v766_v12 }
 0x325   : > { %v386_v15 = vpop.xlane.xlu1 %385 }
 0x326   : > { %v396_v26 = vsub.f32 %v355_v50, %v386_v15 }
 0x328   : > { %v400_v16 = vmul.f32 1.442695, %v396_v26 }
 0x32a   : > { %1139 = vpow2.f32 %v400_v16 }
 0x32d   : > { %v389_v27 = vpop.xlane.xlu0 %388  ;;  %v392_v28 = vpop.xlane.xlu2 %391 }
 0x32e   : > { %v397_v29 = vsub.f32 %v357_v52, %v389_v27  ;;  %v398_v14 = vsub.f32 %v379_v54, %v392_v28  ;;  %v1064_v28 = vld [vmem:[%s1233_s12 + $0xc] sm:$0xf] }
 0x330   : > { %v1423_v31 = vpop.eup %1139  ;;  %v402_v32 = vmul.f32 1.442695, %v397_v29  ;;  %v404_v30 = vmul.f32 1.442695, %v398_v14  ;;  %v1025_v29 = vld [vmem:[%s1233_s12 + $0x18] sm:$0xf0] }
 0x331   : > { %v408_v33 = vsel %vm223_vm1, %v1423_v31, 0.0  ;;  %v1028_v14 = vor.u32 %v1064_v28, %v1025_v29 }
 0x332   : > { %1141 = vpow2.f32 %v402_v32  ;;  %409 = vadd.xlane.f32.xlu1 %v408_v33  ;;  %v137_v33 = vunpack.c.h.bf16 %v1268_v20  ;;  %v145_v20 = vunpack.c.h.bf16 %v1262_v18 }
 0x333   : > { %1143 = vpow2.f32 %v404_v30 }
 0x335   : > { %v395_v34 = vpop.xlane.xlu1 %394  ;;  %v532_v38 = vpop.xlane.xlu0 %531 }
 0x336   : > { %v399_v36 = vsub.f32 %v381_v57, %v395_v34  ;;  %v542_v42 = vsub.f32 %v501_v58, %v532_v38  ;;  %v141_v34 = vunpack.c.h.bf16 %v1277_v23  ;;  %v149_v23 = vunpack.c.h.bf16 %v1265_v19 }
 0x338   : > { %v1427_v39 = vpop.eup %1141  ;;  %v406_v40 = vmul.f32 1.442695, %v399_v36  ;;  %v546_v45 = vmul.f32 1.442695, %v542_v42  ;;  %v805_v36 = vpack.c.bf16 %v137_v33, %v137_v33 }
 0x339   : > { %v1429_v41 = vpop.eup %1143  ;;  %v411_v43 = vsel %vm223_vm1, %v1427_v39, 0.0 }
 0x33a   : > { %412 = vadd.xlane.f32.xlu0 %v411_v43  ;;  %v414_v44 = vsel %vm223_vm1, %v1429_v41, 0.0  ;;  %1145 = vpow2.f32 %v406_v40  ;;  %v806_v40 = vpack.c.bf16 %v141_v34, %v141_v34  ;;  %v816_v42 = vunpack.c.l.b16 %v805_v36 }
 0x33b   : > { %415 = vadd.xlane.f32.xlu2 %v414_v44  ;;  %1147 = vpow2.f32 %v546_v45 }
 0x33c   : > { %v817_v43 = vunpack.c.l.b16 %v806_v40 }
 0x33d   : > { %v538_v3 = vpop.xlane.xlu1 %537  ;;  %v535_v47 = vpop.xlane.xlu2 %534 }
 0x33e   : > { %v544_v24 = vsub.f32 %v525_v62, %v538_v3  ;;  %v543_v52 = vsub.f32 %v1399_v53, %v535_v47  ;;  %v818_v45 = vpack.c.b16 %v817_v43, %v816_v42  ;;  %v808_v47 = vpack.c.bf16 %v149_v23, %v149_v23 }
 0x340   : > { %v1435_v4 = vpop.eup %1145  ;;  %v550_v6 = vmul.f32 1.442695, %v544_v24  ;;  %v548_v57 = vmul.f32 1.442695, %v543_v52 }
 0x341   : > { %v417_v25 = vsel %vm223_vm1, %v1435_v4, 0.0  ;;  %v1439_v50 = vpop.eup %1147 }
 0x342   : > { %418 = vadd.xlane.f32.xlu1 %v417_v25  ;;  %1149 = vpow2.f32 %v550_v6  ;;  %v554_v54 = vsel %vm223_vm1, %v1439_v50, 0.0  ;;  %v807_v25 = vpack.c.bf16 %v145_v20, %v145_v20 }
 0x344   : > { %v846_v6 = vunpack.c.l.b16 %v807_v25 }
 0x345   : > { %v541_v21 = vpop.xlane.xlu0 %540  ;;  %v759_v58 = vpop.xlane.xlu2 %758 }
 0x346   : > { %v545_v7 = vsub.f32 %v527_v1, %v541_v21  ;;  %v1068_v1 = vld [vmem:[%s1233_s12 + $0x2c] sm:$0xf]  ;;  %v769_v32 = vsub.f32 %v1404_v2, %v759_v58  ;;  %v847_v21 = vunpack.c.l.b16 %v808_v47 }
 0x347   : > { %v1037_v10 = vor.u32 %v1068_v1, %v1034_v5 }
 0x348   : > { %v552_v51 = vmul.f32 1.442695, %v545_v7  ;;  %v1447_v60 = vpop.eup %1149  ;;  %v773_v30 = vmul.f32 1.442695, %v769_v32  ;;  %v848_v7 = vpack.c.b16 %v847_v21, %v846_v6 }
 0x349   : > { %v560_v0 = vsel %vm223_vm1, %v1447_v60, 0.0 }
 0x34a   : > { %1151 = vpow2.f32 %v552_v51  ;;  %555 = vadd.xlane.f32.xlu1 %v554_v54 }
 0x34b   : > { %1153 = vpow2.f32 %v548_v57 }
 0x34d   : > { %v765_v59 = vpop.xlane.xlu0 %764  ;;  %v762_v2 = vpop.xlane.xlu1 %761 }
 0x34e   : > { %v771_v17 = vsub.f32 %v1411_v35, %v765_v59  ;;  %v770_v3 = vsub.f32 %v1409_v9, %v762_v2 }
 0x350   : > { %v1449_v62 = vpop.eup %1151  ;;  %v777_v53 = vmul.f32 1.442695, %v771_v17  ;;  %v775_v24 = vmul.f32 1.442695, %v770_v3 }
 0x351   : > { %v563_v63 = vsel %vm223_vm1, %v1449_v62, 0.0  ;;  %v1459_v37 = vpop.eup %1153 }
 0x352   : > { %1155 = vpow2.f32 %v777_v53  ;;  %564 = vadd.xlane.f32.xlu0 %v563_v63  ;;  %561 = vadd.xlane.f32.xlu1 %v560_v0  ;;  %v557_v16 = vsel %vm223_vm1, %v1459_v37, 0.0 }
 0x353   : > { %632 = vrot.lane.b32.xlu2 %v1033_v61, %s1204_s22 }
 0x355   : > { %v768_v8 = vpop.xlane.xlu2 %767 }
 0x356   : > { %v772_v35 = vsub.f32 %v1417_v11, %v768_v8 }
 0x358   : > { %v1461_v12 = vpop.eup %1155  ;;  %v779_v15 = vmul.f32 1.442695, %v772_v35 }
 0x359   : > { %v787_v26 = vsel %vm223_vm1, %v1461_v12, 0.0 }
 0x35a   : > { %1157 = vpow2.f32 %v779_v15  ;;  %788 = vadd.xlane.f32.xlu0 %v787_v26  ;;  %558 = vadd.xlane.f32.xlu1 %v557_v16 }
 0x35b   : > { %634 = vrot.lane.b32.xlu2 %v1037_v10, %s1204_s22  ;;  %1159 = vpow2.f32 %v773_v30 }
 0x35c   : > { %1161 = vpow2.f32 %v775_v24 }
 0x360   : > { %v1468_v27 = vpop.eup %1157 }
 0x361   : > { %v790_v11 = vsel %vm223_vm1, %v1468_v27, 0.0  ;;  %v1478_v38 = vpop.eup %1159 }
 0x362   : > { %791 = vadd.xlane.f32.xlu0 %v790_v11  ;;  %v781_v44 = vsel %vm223_vm1, %v1478_v38, 0.0  ;;  %v1485_v51 = vpop.eup %1161 }
 0x363   : > { %v784_v52 = vsel %vm223_vm1, %v1485_v51, 0.0 }
 0x373   : > { %597 = vrot.lane.b32.xlu1 %v1028_v14, %s1204_s22 }
 0x376   : > { %819 = vrot.lane.b32.xlu0 %v818_v45, %s1205_s23 }
 0x384   : > { %782 = vadd.xlane.f32.xlu2 %v781_v44 }
 0x39c   : > { %849 = vrot.lane.b32.xlu2 %v848_v7, %s1205_s23 }
 0x39d   : > { %785 = vadd.xlane.f32.xlu1 %v784_v52 }
 0x3a5   : > { %v410_v54 = vpop.xlane.xlu1 %409 }
 0x3a6   : > { %1163 = vrcp.f32 %v410_v54 }
 0x3ac   : > { %v1164_v18 = vpop.eup %1163 }
 0x3ad   : > { %v413_v9 = vpop.xlane.xlu0 %412  ;;  %v424_v55 = vmul.f32 %v1164_v18, %v1423_v31 }
 0x3ae   : > { %1165 = vrcp.f32 %v413_v9  ;;  %v416_v19 = vpop.xlane.xlu2 %415 }
 0x3af   : > { %1167 = vrcp.f32 %v416_v19  ;;  %v428_v57 = vpack.c.bf16 %v424_v55, %v424_v55 }
 0x3b1   : > { %v434_v63 = vunpack.c.l.b16 %v428_v57 }
 0x3b4   : > { %v1166_v56 = vpop.eup %1165 }
 0x3b5   : > { %v425_v58 = vmul.f32 %v1166_v56, %v1427_v39  ;;  %v419_v17 = vpop.xlane.xlu1 %418  ;;  %v1168_v61 = vpop.eup %1167 }
 0x3b6   : > { %v633_v59 = vpop.permute.xlu2 %632  ;;  %1169 = vrcp.f32 %v419_v17  ;;  %v426_v1 = vmul.f32 %v1168_v61, %v1429_v41 }
 0x3b7   : > { %v429_v53 = vpack.c.bf16 %v425_v58, %v425_v58 }
 0x3b8   : > { %v430_v31 = vpack.c.bf16 %v426_v1, %v426_v1 }
 0x3b9   : > { %v435_v0 = vunpack.c.l.b16 %v429_v53 }
 0x3ba   : > { %v459_v16 = vunpack.c.l.b16 %v430_v31 }
 0x3bb   : > { %v436_v5 = vpack.c.b16 %v435_v0, %v434_v63 }
 0x3bc   : > { %v1170_v8 = vpop.eup %1169 }
 0x3bd   : > { %1017 = vmatmul.msk.bf16.vlgmr.msrb.gmra.mxu0 %vm223_vm1, %v436_v5  ;;  %v427_v35 = vmul.f32 %v1170_v8, %v1435_v4  ;;  %v556_v15 = vpop.xlane.xlu1 %555 }
 0x3be   : > { %v635_v10 = vpop.permute.xlu2 %634 }
 0x3bf   : > { %v636_v39 = vsel %vm599_vm4, %v633_v59, %v635_v10  ;;  %v431_v26 = vpack.c.bf16 %v427_v35, %v427_v35 }
 0x3c0   : > { %648 = vmatpush.bf16.msra.mxu1 %v636_v39 }
 0x3c1   : > { %v460_v11 = vunpack.c.l.b16 %v431_v26 }
 0x3c3   : > { %v461_v28 = vpack.c.b16 %v460_v11, %v459_v16 }
 0x3c5   : > { %v565_v29 = vpop.xlane.xlu0 %564  ;;  %1018 = vmatmul.msk.bf16.vlgmr.msrb.gmra.mxu1 %vm223_vm1, %v461_v28  ;;  %v562_v41 = vpop.xlane.xlu1 %561 }
 0x3c6   : > { %1171 = vrcp.f32 %v565_v29 }
 0x3c7   : > { %1173 = vrcp.f32 %v562_v41 }
 0x3cc   : > { %v1172_v14 = vpop.eup %1171 }
 0x3cd   : > { %v1174_v32 = vpop.eup %1173  ;;  %v573_v30 = vmul.f32 %v1172_v14, %v1449_v62  ;;  %v559_v40 = vpop.xlane.xlu1 %558 }
 0x3ce   : > { %v572_v4 = vmul.f32 %v1174_v32, %v1447_v60  ;;  %1175 = vrcp.f32 %v559_v40  ;;  %v789_v20 = vpop.xlane.xlu0 %788 }
 0x3cf   : > { %v577_v33 = vpack.c.bf16 %v573_v30, %v573_v30  ;;  %1177 = vrcp.f32 %v556_v15 }
 0x3d0   : > { %v576_v34 = vpack.c.bf16 %v572_v4, %v572_v4 }
 0x3d1   : > { %v622_v36 = vunpack.c.l.b16 %v577_v33 }
 0x3d2   : > { %v621_v42 = vunpack.c.l.b16 %v576_v34 }
 0x3d4   : > { %v623_v43 = vpack.c.b16 %v622_v36, %v621_v42  ;;  %v1176_v44 = vpop.eup %1175 }
 0x3d5   : > { %v1178_v45 = vpop.eup %1177  ;;  %v571_v2 = vmul.f32 %v1176_v44, %v1459_v37 }
 0x3d6   : > { %1038 = vmatmul.msk.bf16.vlgmr.msra.gmra.mxu1 %vm223_vm1, %v623_v43  ;;  %v570_v3 = vmul.f32 %v1178_v45, %v1439_v50  ;;  %v792_v21 = vpop.xlane.xlu0 %791 }
 0x3d7   : > { %v575_v62 = vpack.c.bf16 %v571_v2, %v571_v2  ;;  %1179 = vrcp.f32 %v792_v21 }
 0x3d8   : > { %v574_v23 = vpack.c.bf16 %v570_v3, %v570_v3  ;;  %1181 = vrcp.f32 %v789_v20 }
 0x3d9   : > { %v585_v60 = vunpack.c.l.b16 %v575_v62 }
 0x3da   : > { %v584_v25 = vunpack.c.l.b16 %v574_v23 }
 0x3dc   : > { %v586_v6 = vpack.c.b16 %v585_v60, %v584_v25 }
 0x3dd   : > { %v1180_v7 = vpop.eup %1179 }
 0x3de   : > { %v1182_v37 = vpop.eup %1181  ;;  %v800_v50 = vmul.f32 %v1180_v7, %v1468_v27 }
 0x3df   : > { %v799_v52 = vmul.f32 %v1182_v37, %v1461_v12 }
 0x3e0   : > { %v804_v9 = vpack.c.bf16 %v800_v50, %v800_v50 }
 0x3e1   : > { %v803_v18 = vpack.c.bf16 %v799_v52, %v799_v52 }
 0x3e2   : > { %v842_v19 = vunpack.c.l.b16 %v804_v9 }
 0x3e5   : > { %v598_v24 = vpop.permute.xlu1 %597 }
 0x3e6   : > { %v600_v47 = vsel %vm599_vm4, %v1421_v13, %v598_v24  ;;  %v841_v13 = vunpack.c.l.b16 %v803_v18 }
 0x3e7   : > { %612 = vmatpush.bf16.msra.mxu0 %v600_v47 }
 0x3e8   : > { %v820_v55 = vpop.permute.xlu0 %819  ;;  %v843_v57 = vpack.c.b16 %v842_v19, %v841_v13 }
 0x3ea   : > { %1029 = vmatmul.msk.bf16.vlgmr.msra.gmra.mxu0 %vm223_vm1, %v586_v6 }
 0x3eb   : > { %832 = vmatpush.bf16.msrb.mxu0 %v820_v55 }
 0x3f7   : > { %v783_v54 = vpop.xlane.xlu2 %782 }
 0x3f8   : > { %1183 = vrcp.f32 %v783_v54 }
 0x3fe   : > { %v1184_v59 = vpop.eup %1183 }
 0x3ff   : > { %v850_v56 = vpop.permute.xlu2 %849  ;;  %v797_v27 = vmul.f32 %v1184_v59, %v1478_v38 }
 0x400   : > { %862 = vmatpush.bf16.msrb.mxu1 %v850_v56 }
 0x401   : > { %v801_v12 = vpack.c.bf16 %v797_v27, %v797_v27 }
 0x403   : > { %1058 = vmatmul.msk.bf16.vlgmr.msrb.gmra.mxu1 %vm223_vm1, %v843_v57  ;;  %v811_v63 = vunpack.c.l.b16 %v801_v12 }
 0x410   : > { %v786_v58 = vpop.xlane.xlu1 %785 }
 0x411   : > { %1185 = vrcp.f32 %v786_v58 }
 0x417   : > { %v1186_v17 = vpop.eup %1185 }
 0x418   : > { %v798_v61 = vmul.f32 %v1186_v17, %v1485_v51 }
 0x41a   : > { %v802_v53 = vpack.c.bf16 %v798_v61, %v798_v61 }
 0x41c   : > { %v812_v0 = vunpack.c.l.b16 %v802_v53 }
 0x41e   : > { %v813_v1 = vpack.c.b16 %v812_v0, %v811_v63 }
 0x420   : > { %1057 = vmatmul.msk.bf16.vlgmr.msrb.gmra.mxu0 %vm223_vm1, %v813_v1 }
 0x43a   : > { %v452_v5 = vpop.f32.mrf.mxu0 }
 0x442   : > { %v454_v8 = vpop.f32.mrf.mxu0  ;;  %v477_v35 = vpop.f32.mrf.mxu1 }
 0x443   : > { %v1093_v31 = vpack.i.bf16 %v454_v8, %v452_v5 }
 0x445   : > { %1094 = vrot.lane.b32.xlu1 %v1093_v31, %s1206_s24 }
 0x44a   : > { %v479_v10 = vpop.f32.mrf.mxu1 }
 0x44b   : > { %v1098_v15 = vpack.i.bf16 %v479_v10, %v477_v35 }
 0x44d   : > { %1099 = vrot.lane.b32.xlu0 %v1098_v15, %s1206_s24 }
 0x453   : > { %v650_v39 = vpop.f32.mrf.mxu1 }
 0x45b   : > { %v652_v51 = vpop.f32.mrf.mxu1 }
 0x45c   : > { %v1108_v11 = vpack.i.bf16 %v652_v51, %v650_v39 }
 0x467   : > { %v614_v38 = vpop.f32.mrf.mxu0 }
 0x46f   : > { %v616_v26 = vpop.f32.mrf.mxu0 }
 0x470   : > { %v1103_v16 = vpack.i.bf16 %v616_v26, %v614_v38 }
 0x472   : > { %1104 = vrot.lane.b32.xlu0 %v1103_v16, %s1207_s25 }
 0x47a   : > { %1109 = vrot.lane.b32.xlu0 %v1108_v11, %s1207_s25 }
 0x480   : > { %v864_v28 = vpop.f32.mrf.mxu1 }
 0x488   : > { %v866_v29 = vpop.f32.mrf.mxu1 }
 0x489   : > { %v1118_v41 = vpack.i.bf16 %v866_v29, %v864_v28 }
 0x48b   : > { %1119 = vrot.lane.b32.xlu1 %v1118_v41, %s1208_s26 }
 0x49d   : > { %v834_v14 = vpop.f32.mrf.mxu0 }
 0x4a5   : > { %v836_v32 = vpop.f32.mrf.mxu0 }
 0x4a6   : > { %v1113_v30 = vpack.i.bf16 %v836_v32, %v834_v14 }
 0x4a8   : > { %1114 = vrot.lane.b32.xlu2 %v1113_v30, %s1208_s26 }
 0x4b7   : > { %v1095_v34 = vpop.permute.xlu1 %1094 }
 0x4b8   : > { %v1097_v36 = vunpack.i.h.bf16 %v1095_v34  ;;  %v1096_v43 = vunpack.i.l.bf16 %v1095_v34 }
 0x4ba   : > { %v918_v62 = vsel %vm170_vm0, %v1388_v48, %v1097_v36  ;;  %v917_v47 = vsel %vm170_vm0, %v1386_v22, %v1096_v43 }
 0x4bf   : > { %v1100_v4 = vpop.permute.xlu0 %1099 }
 0x4c0   : > { %v1101_v44 = vunpack.i.l.bf16 %v1100_v4  ;;  %v1102_v45 = vunpack.i.h.bf16 %v1100_v4 }
 0x4c2   : > { %v919_v6 = vsel %vm170_vm0, %v1390_v49, %v1101_v44  ;;  %v920_v48 = vsel %vm170_vm0, %v1392_v46, %v1102_v45 }
 0x4e4   : > { %v1105_v33 = vpop.permute.xlu0 %1104 }
 0x4e5   : > { %v1107_v2 = vunpack.i.h.bf16 %v1105_v33  ;;  %v1106_v3 = vunpack.i.l.bf16 %v1105_v33 }
 0x4e7   : > { %v922_v50 = vsel %vm921_vm5, %v917_v47, %v1106_v3  ;;  %v923_v52 = vsel %vm921_vm5, %v918_v62, %v1107_v2 }
 0x4ec   : > { %v1110_v40 = vpop.permute.xlu0 %1109 }
 0x4ed   : > { %v1111_v20 = vunpack.i.l.bf16 %v1110_v40  ;;  %v1112_v23 = vunpack.i.h.bf16 %v1110_v40 }
 0x4ef   : > { %v924_v37 = vsel %vm921_vm5, %v919_v6, %v1111_v20  ;;  %v925_v54 = vsel %vm921_vm5, %v920_v48, %v1112_v23 }
 0x4fd   : > { %v1120_v42 = vpop.permute.xlu1 %1119 }
 0x4fe   : > { %v1121_v60 = vunpack.i.l.bf16 %v1120_v42  ;;  %v1122_v24 = vunpack.i.h.bf16 %v1120_v42 }
 0x500   : > { %v929_v9 = vsel %vm926_vm6, %v924_v37, %v1121_v60  ;;  %v930_v46 = vsel %vm926_vm6, %v925_v54, %v1122_v24 }
 0x501   : > { %v933_v55 = vpack.c.bf16 %v1121_v60, %v929_v9  ;;  %v934_v13 = vpack.c.bf16 %v1122_v24, %v930_v46 }
 0x502   : > { %v1115_v25 = vpop.permute.xlu2 %1114 }
 0x503   : > { %v1117_v21 = vunpack.i.h.bf16 %v1115_v25  ;;  %v1116_v7 = vunpack.i.l.bf16 %v1115_v25  ;;  %940 = vst.msk [vmem:[%s123_s30 + $0x10] sm:$0xff] %vm937_vm9, %v933_v55 }
 0x504   : > { %941 = vst.msk [vmem:[%s123_s30 + $0x18] sm:$0xff] %vm937_vm9, %v934_v13 }
 0x505   : > { %v927_v22 = vsel %vm926_vm6, %v922_v50, %v1116_v7  ;;  %v928_v49 = vsel %vm926_vm6, %v923_v52, %v1117_v21 }
 0x506   : > { %v931_v18 = vpack.c.bf16 %v1116_v7, %v927_v22  ;;  %v932_v19 = vpack.c.bf16 %v1117_v21, %v928_v49 }
 0x508   : > { %938 = vst.msk [vmem:[%s123_s30] sm:$0xff] %vm937_vm9, %v931_v18 }
 0x509   : > { %939 = vst.msk [vmem:[%s123_s30 + $0x8] sm:$0xff] %vm937_vm9, %v932_v19 }
 0x50a PF: > { %s11_s6 = sadd.s32 1, %s1193_s6  }
 0x50b   : > { %p8_p4 = scmp.ge.s32.totalorder %s11_s6, 4  }
 0x50d   :  { %10 = sbr.rel (!%p8_p4) target bundleno = 1 (0x1), region = 54 }

// kernel: bsablock_pallas.5
= control target key start
LH: loop header
LB: loop body
LE: loop exit
PB: predicated region body
PF: predicated region fallthrough
CT: control target
= control target key end

     0   :  { %s1450_s30 = smov 0   ;;  %s1871_s0 = inlined_call_operand.vmem [shape: bf16[64,144], index: 0, kind: input, shape index: {}]   ;;  %s1872_s1 = inlined_call_operand.vmem [shape: f32[64,144], index: 1, kind: input, shape index: {}]   ;;  %s1873_s2 = inlined_call_operand.vmem [shape: bf16[144,144], index: 2, kind: input, shape index: {}]   ;;  %s1874_s3 = inlined_call_operand.vmem [shape: f32[1,144], index: 3, kind: input, shape index: {}]   ;;  %s1875_s4 = inlined_call_operand.vmem [shape: f32[1,144], index: 4, kind: input, shape index: {}]   ;;  %s1876_s5 = inlined_call_operand.vmem [shape: bf16[144,128], index: 5, kind: input, shape index: {}]   ;;  %s1877_s6 = inlined_call_operand.vmem [shape: f32[1,128], index: 6, kind: input, shape index: {}]   ;;  %s1878_s7 = inlined_call_operand.vmem [shape: bf16[128,144], index: 7, kind: input, shape index: {}]   ;;  %s1879_s8 = inlined_call_operand.vmem [shape: f32[1,144], index: 8, kind: input, shape index: {}]   ;;  %s1880_s9 = inlined_call_operand.vmem [shape: f32[64,144], index: 9, kind: output, shape index: {}]  }
   0x1 LB: > { %s1095_s10 = sadd.s32 4294967295, %s1397_s30   ;;  %p1099_p0 = scmp.ge.s32.totalorder %s1397_s30, 1  ;;  %s1397_s30 = sphi %s1450_s30, %s19_s30  }
   0x2   : > { %p301_p1 = scmp.lt.s32.totalorder %s1397_s30, 3 }
   0x4   : > { %p302_p2 = pnand %p1099_p0, %p301_p1 }
   0x5   : > { %s1100_s24 = sshll.u32 (!%p302_p2), %s1095_s10, 2 }
   0x6   : > { %305 = sbr.rel (%p302_p2) target bundleno = 771 (0x303), region = 56  ;;  %p346_p3 = scmp.lt.s32.totalorder (!%p302_p2), %s1100_s24, 7 }
   0xb   : > { %v1183_v0 = vld [vmem:[%s1873_s2 + $0x70] sm:$0xf]  ;;  %v1327_v1 = vld [vmem:[%s1873_s2 + $0x74] sm:$0xf0]  ;;  %v1326_v2 = vld [vmem:[%s1873_s2 + $0x74] sm:$0xf] }
   0xc   : > { %v1184_v3 = vor.u32 %v1327_v1, %v1183_v0  ;;  %v1185_v4 = vld [vmem:[%s1873_s2 + $0x78] sm:$0xf0]  ;;  %v1175_v5 = vld [vmem:[%s1873_s2 + $0x60] sm:$0xf]  ;;  %v1325_v6 = vld [vmem:[%s1873_s2 + $0x64] sm:$0xf0] }
   0xd   : > { %v1188_v7 = vor.u32 %v1326_v2, %v1185_v4  ;;  %v1324_v8 = vld [vmem:[%s1873_s2 + $0x64] sm:$0xf]  ;;  %v1177_v9 = vld [vmem:[%s1873_s2 + $0x68] sm:$0xf0]  ;;  %v1176_v10 = vor.u32 %v1325_v6, %v1175_v5  ;;  %v1167_v12 = vld [vmem:[%s1873_s2 + $0x50] sm:$0xf] }
   0xe   : > { %512 = vmatpush.bf16.msra.mxu0 %v1184_v3  ;;  %v1180_v11 = vor.u32 %v1324_v8, %v1177_v9  ;;  %v1323_v13 = vld [vmem:[%s1873_s2 + $0x54] sm:$0xf0]  ;;  %v1322_v14 = vld [vmem:[%s1873_s2 + $0x54] sm:$0xf]  ;;  %v1169_v15 = vld [vmem:[%s1873_s2 + $0x58] sm:$0xf0] }
   0xf   : > { %550 = vmatpush.bf16.msra.mxu2 %v1188_v7  ;;  %v1168_v16 = vor.u32 %v1323_v13, %v1167_v12  ;;  %v1159_v17 = vld [vmem:[%s1873_s2 + $0x40] sm:$0xf]  ;;  %v1321_v18 = vld [vmem:[%s1873_s2 + $0x44] sm:$0xf0]  ;;  %v1172_v19 = vor.u32 %v1322_v14, %v1169_v15  ;;  %v1328_v20 = vld [vmem:[%s1873_s2 + $0x84] sm:$0xf] }
  0x10   : > { %v1193_v21 = vld [vmem:[%s1873_s2 + $0x88] sm:$0xf0]  ;;  %v1320_v22 = vld [vmem:[%s1873_s2 + $0x44] sm:$0xf]  ;;  %v1191_v25 = vld [vmem:[%s1873_s2 + $0x80] sm:$0xf]  ;;  %v1160_v26 = vor.u32 %v1321_v18, %v1159_v17 }
  0x11   : > { %v1161_v23 = vld [vmem:[%s1873_s2 + $0x48] sm:$0xf0]  ;;  %v1196_v24 = vor.u32 %v1328_v20, %v1193_v21  ;;  %s1882_s24 = smov (!%p346_p3, %s1100_s24), 7  ;;  %v1329_v27 = vld [vmem:[%s1873_s2 + $0x84] sm:$0xf0]  ;;  %vm505_vm0 = vcmask 130048  }
  0x12   : > { %513 = vmatpush.bf16.msra.mxu0 %v1176_v10  ;;  %v1164_v28 = vor.u32 %v1320_v22, %v1161_v23  ;;  %v1151_v29 = vld [vmem:[%s1873_s2 + $0x30] sm:$0xf]  ;;  %v1319_v30 = vld [vmem:[%s1873_s2 + $0x34] sm:$0xf0]  ;;  %v1318_v31 = vld [vmem:[%s1873_s2 + $0x34] sm:$0xf]  ;;  %v1192_v32 = vor.u32 %v1329_v27, %v1191_v25 }
  0x13   : > { %551 = vmatpush.bf16.msra.mxu2 %v1180_v11  ;;  %576 = vmatpush.bf16.msra.mxu3 %v1196_v24  ;;  %v1153_v33 = vld [vmem:[%s1873_s2 + $0x38] sm:$0xf0]  ;;  %s1305_s21 = sshll.u32 %s1882_s24, 3  ;;  %v1152_v34 = vor.u32 %v1319_v30, %v1151_v29  ;;  %v1143_v38 = vld [vmem:[%s1873_s2 + $0x20] sm:$0xf]  ;;  %s1306_s12 = sshll.u32 %s1882_s24, 4 }
  0x14   : > { %s1538_s25 = scalar_lea.vmem %s1871_s0, %s1305_s21  ;;  %538 = vmatpush.bf16.msra.mxu1 %v1192_v32  ;;  %v1156_v37 = vor.u32 %v1318_v31, %v1153_v33  ;;  %v1317_v39 = vld [vmem:[%s1873_s2 + $0x24] sm:$0xf0]  ;;  %v1316_v41 = vld [vmem:[%s1873_s2 + $0x24] sm:$0xf]  ;;  %v1145_v42 = vld [vmem:[%s1873_s2 + $0x28] sm:$0xf0]  ;;  %s1594_s15 = scalar_lea.vmem %s1872_s1, %s1306_s12 }
  0x15   : > { %v1308_v35 = vld [vmem:[%s1538_s25 + $0x4] sm:$0xf]  ;;  %v1113_v36 = vld [vmem:[%s1538_s25 + $0x8] sm:$0xf0]  ;;  %v1144_v43 = vor.u32 %v1317_v39, %v1143_v38  ;;  %v1148_v44 = vor.u32 %v1316_v41, %v1145_v42  ;;  %v1135_v45 = vld [vmem:[%s1873_s2 + $0x10] sm:$0xf]  ;;  %s1846_s17 = scalar_lea.vmem %s1880_s9, %s1306_s12 }
  0x16   : > { %514 = vmatpush.bf16.msra.mxu0 %v1168_v16  ;;  %v1116_v40 = vor.u32 %v1308_v35, %v1113_v36  ;;  %v1315_v46 = vld [vmem:[%s1873_s2 + $0x14] sm:$0xf0]  ;;  %v1314_v47 = vld [vmem:[%s1873_s2 + $0x14] sm:$0xf]  ;;  %v1137_v48 = vld [vmem:[%s1873_s2 + $0x18] sm:$0xf0] }
  0x17   : > { %552 = vmatpush.bf16.msra.mxu2 %v1172_v19  ;;  %v1136_v49 = vor.u32 %v1315_v46, %v1135_v45  ;;  %v1140_v50 = vor.u32 %v1314_v47, %v1137_v48  ;;  %v1127_v51 = vld [vmem:[%s1873_s2] sm:$0xf]  ;;  %v1313_v52 = vld [vmem:[%s1873_s2 + $0x4] sm:$0xf0]  ;;  %v1312_v53 = vld [vmem:[%s1873_s2 + $0x4] sm:$0xf] }
  0x18   : > { %1199 = vmatmul.msk.bf16.vlgmr.msra.gmra.mxu3 %vm505_vm0, %v1116_v40  ;;  %1197 = vmatmul.msk.bf16.vlgmr.msra.gmra.mxu1 %vm505_vm0, %v1116_v40  ;;  %v1129_v54 = vld [vmem:[%s1873_s2 + $0x8] sm:$0xf0]  ;;  %v1111_v55 = vld [vmem:[%s1538_s25] sm:$0xf]  ;;  %v1128_v56 = vor.u32 %v1313_v52, %v1127_v51  ;;  %v1309_v57 = vld [vmem:[%s1538_s25 + $0x4] sm:$0xf0] }
  0x19   : > { %v1310_v58 = vld [vmem:[%s1538_s25 + $0x14] sm:$0xf]  ;;  %v1121_v59 = vld [vmem:[%s1538_s25 + $0x18] sm:$0xf0]  ;;  %v1132_v60 = vor.u32 %v1312_v53, %v1129_v54  ;;  %v1112_v61 = vor.u32 %v1309_v57, %v1111_v55  ;;  %v1119_v63 = vld [vmem:[%s1538_s25 + $0x10] sm:$0xf] }
  0x1a   : > { %515 = vmatpush.bf16.msra.mxu0 %v1160_v26  ;;  %v1124_v62 = vor.u32 %v1310_v58, %v1121_v59  ;;  %v1311_v0 = vld [vmem:[%s1538_s25 + $0x14] sm:$0xf0]  ;;  %v367_v6 = vld [vmem:[%s1594_s15] sm:$0xff]  ;;  %v368_v7 = vld [vmem:[%s1594_s15 + $0x8] sm:$0xff] }
  0x1b   : > { %553 = vmatpush.bf16.msra.mxu2 %v1164_v28  ;;  %v1120_v1 = vor.u32 %v1311_v0, %v1119_v63  ;;  %v370_v18 = vld [vmem:[%s1594_s15 + $0x18] sm:$0xff]  ;;  %v369_v20 = vld [vmem:[%s1594_s15 + $0x10] sm:$0xff]  ;;  %v371_v30 = vld [vmem:[%s1594_s15 + $0x20] sm:$0xff] }
  0x1c   : > { %v372_v31 = vld [vmem:[%s1594_s15 + $0x28] sm:$0xff]  ;;  %v374_v42 = vld [vmem:[%s1594_s15 + $0x38] sm:$0xff] }
  0x1e   : > { %516 = vmatpush.bf16.msra.mxu0 %v1152_v34 }
  0x1f   : > { %554 = vmatpush.bf16.msra.mxu2 %v1156_v37 }
  0x22   : > { %517 = vmatpush.bf16.msra.mxu0 %v1144_v43 }
  0x23   : > { %555 = vmatpush.bf16.msra.mxu2 %v1148_v44  ;;  %v373_v44 = vld [vmem:[%s1594_s15 + $0x30] sm:$0xff] }
  0x26   : > { %518 = vmatpush.bf16.msra.mxu0 %v1136_v49 }
  0x27   : > { %556 = vmatpush.bf16.msra.mxu2 %v1140_v50  ;;  %v1399_v50 = vmov 144.0  }
  0x28   : > { %1200 = vmatmul.msk.bf16.gmra.mxu3 %vm505_vm0, %v1124_v62  ;;  %1198 = vmatmul.msk.bf16.gmra.mxu1 %vm505_vm0, %v1124_v62  ;;  %1381 = vrcp.f32 %v1399_v50 }
  0x2a   : > { %519 = vmatpush.bf16.msra.mxu0 %v1128_v56 }
  0x2b   : > { %557 = vmatpush.bf16.msra.mxu2 %v1132_v60 }
  0x2d   : > { %520 = vmatmul.bf16.vlgmr.msra.gmra.mxu0 %v1112_v61 }
  0x2e   : > { %558 = vmatmul.bf16.vlgmr.msra.gmra.mxu2 %v1112_v61  ;;  %v1382_v51 = vpop.eup %1381 }
  0x2f   : > { %v613_v52 = vmul.f32 144.0, %v1382_v51  ;;  %vm617_vm1 = vweird.f32 %v1382_v51 }
  0x31   : > { %v614_v53 = vsub.f32 1.0, %v613_v52 }
  0x33   : > { %v615_v54 = vmul.f32 %v1382_v51, %v614_v53 }
  0x35   : > { %v616_v55 = vadd.f32 %v1382_v51, %v615_v54 }
  0x37   : > { %v1608_v56 = vsel %vm617_vm1, %v1382_v51, %v616_v55  ;;  %v1297_v55 = vld [vmem:[%s1878_s7 + $0x70] sm:$0xf] }
  0x3d   : > { %525 = vmatmul.bf16.gmra.mxu0 %v1120_v1 }
  0x3e   : > { %563 = vmatmul.bf16.gmra.mxu2 %v1120_v1 }
  0x95   : > { %v540_v2 = vpop.f32.mrf.mxu1 }
  0x9b   : > { %v578_v4 = vpop.f32.mrf.mxu3 }
  0x9d   : > { %v542_v10 = vpop.f32.mrf.mxu1 }
  0xa3   : > { %v580_v14 = vpop.f32.mrf.mxu3 }
  0xa5   : > { %v545_v23 = vpop.f32.mrf.mxu1 }
  0xaa   : > { %v521_v3 = vpop.f32.mrf.mxu0 }
  0xab   : > { %v541_v5 = vadd.f32 %v540_v2, %v521_v3  ;;  %v583_v27 = vpop.f32.mrf.mxu3 }
  0xad   : > { %v588_v12 = vadd.f32 %v541_v5, %v367_v6  ;;  %v547_v36 = vpop.f32.mrf.mxu1 }
  0xb1   : > { %v559_v8 = vpop.f32.mrf.mxu2 }
  0xb2   : > { %v579_v9 = vadd.f32 %v578_v4, %v559_v8  ;;  %v523_v11 = vpop.f32.mrf.mxu0 }
  0xb3   : > { %v543_v17 = vadd.f32 %v542_v10, %v523_v11  ;;  %v585_v40 = vpop.f32.mrf.mxu3 }
  0xb4   : > { %v589_v13 = vadd.f32 %v579_v9, %v368_v7 }
  0xb5   : > { %v590_v25 = vadd.f32 %v543_v17, %v369_v20 }
  0xb6   : > { %v596_v15 = vsel %vm505_vm0, %v589_v13, 0.0 }
  0xb7   : > { %v597_v16 = vadd.f32 %v596_v15, %v588_v12 }
  0xb9   : > { %v561_v19 = vpop.f32.mrf.mxu2  ;;  %598 = vadd.xlane.f32.xlu0 %v597_v16 }
  0xba   : > { %v581_v21 = vadd.f32 %v580_v14, %v561_v19  ;;  %v526_v24 = vpop.f32.mrf.mxu0 }
  0xbb   : > { %v546_v28 = vadd.f32 %v545_v23, %v526_v24 }
  0xbc   : > { %v591_v22 = vadd.f32 %v581_v21, %v370_v18 }
  0xbd   : > { %v592_v34 = vadd.f32 %v546_v28, %v371_v30  ;;  %v1334_v28 = vld [vmem:[%s1876_s5 + $0x20] sm:$0xff] }
  0xbe   : > { %v600_v26 = vsel %vm505_vm0, %v591_v22, 0.0  ;;  %v1338_v30 = vld [vmem:[%s1876_s5 + $0x40] sm:$0xff] }
  0xbf   : > { %v601_v29 = vadd.f32 %v600_v26, %v590_v25  ;;  %v1336_v26 = vld [vmem:[%s1876_s5 + $0x30] sm:$0xff]  ;;  %851 = vmatpush.bf16.msrb.mxu3 %v1338_v30 }
  0xc1   : > { %v564_v32 = vpop.f32.mrf.mxu2  ;;  %602 = vadd.xlane.f32.xlu0 %v601_v29  ;;  %v1333_v29 = vld [vmem:[%s1876_s5 + $0x18] sm:$0xff] }
  0xc2   : > { %v584_v33 = vadd.f32 %v583_v27, %v564_v32  ;;  %v528_v37 = vpop.f32.mrf.mxu0  ;;  %v1335_v27 = vld [vmem:[%s1876_s5 + $0x28] sm:$0xff] }
  0xc3   : > { %v548_v41 = vadd.f32 %v547_v36, %v528_v37  ;;  %v1331_v32 = vld [vmem:[%s1876_s5 + $0x8] sm:$0xff] }
  0xc4   : > { %v593_v35 = vadd.f32 %v584_v33, %v372_v31  ;;  %v1332_v31 = vld [vmem:[%s1876_s5 + $0x10] sm:$0xff] }
  0xc5   : > { %v594_v47 = vadd.f32 %v548_v41, %v373_v44 }
  0xc6   : > { %v604_v38 = vsel %vm505_vm0, %v593_v35, 0.0 }
  0xc7   : > { %v605_v39 = vadd.f32 %v604_v38, %v592_v34 }
  0xc9   : > { %v566_v43 = vpop.f32.mrf.mxu2  ;;  %606 = vadd.xlane.f32.xlu1 %v605_v39 }
  0xca   : > { %v586_v45 = vadd.f32 %v585_v40, %v566_v43 }
  0xcc   : > { %v595_v46 = vadd.f32 %v586_v45, %v374_v42 }
  0xce   : > { %v608_v48 = vsel %vm505_vm0, %v595_v46, 0.0 }
  0xcf   : > { %v609_v49 = vadd.f32 %v608_v48, %v594_v47 }
  0xd1   : > { %610 = vadd.xlane.f32.xlu1 %v609_v49  ;;  %v711_v49 = vld [vmem:[%s1874_s3] sm:$0x3] }
  0xd2   : > { %v1686_v54 = vperm.slane %v711_v49, 0 }
 0x12c   : > { %v599_v57 = vpop.xlane.xlu0 %598 }
 0x12d   : > { %v619_v58 = vmul.f32 %v1608_v56, %v599_v57  ;;  %v1354_v57 = vld [vmem:[%s1878_s7 + $0x74] sm:$0xf0] }
 0x12f   : > { %v1611_v59 = vsub.f32 %v588_v12, %v619_v58  ;;  %v1613_v60 = vsub.f32 %v589_v13, %v619_v58  ;;  %v1353_v58 = vld [vmem:[%s1878_s7 + $0x74] sm:$0xf] }
 0x131   : > { %v631_v61 = vmul.f32 %v1611_v59, %v1611_v59  ;;  %v632_v62 = vmul.f32 %v1613_v60, %v1613_v60 }
 0x133   : > { %v639_v63 = vsel %vm505_vm0, %v632_v62, 0.0 }
 0x134   : > { %v603_v0 = vpop.xlane.xlu0 %602  ;;  %v640_v1 = vadd.f32 %v639_v63, %v631_v61  ;;  %v1697_v63 = vperm.slane %v711_v49, 1 }
 0x135   : > { %v620_v2 = vmul.f32 %v1608_v56, %v603_v0  ;;  %v1298_v0 = vor.u32 %v1354_v57, %v1297_v55 }
 0x136   : > { %641 = vadd.xlane.f32.xlu2 %v640_v1  ;;  %v1299_v1 = vld [vmem:[%s1878_s7 + $0x78] sm:$0xf0] }
 0x137   : > { %v1621_v3 = vsub.f32 %v590_v25, %v620_v2  ;;  %v1623_v4 = vsub.f32 %v591_v22, %v620_v2  ;;  %v1337_v25 = vld [vmem:[%s1876_s5 + $0x38] sm:$0xff]  ;;  %v1289_v2 = vld [vmem:[%s1878_s7 + $0x60] sm:$0xf]  ;;  %971 = vmatpush.bf16.msrb.mxu0 %v1298_v0 }
 0x138   : > { %825 = vmatpush.bf16.msrb.mxu1 %v1337_v25 }
 0x139   : > { %v633_v5 = vmul.f32 %v1621_v3, %v1621_v3  ;;  %v634_v6 = vmul.f32 %v1623_v4, %v1623_v4 }
 0x13b   : > { %v643_v7 = vsel %vm505_vm0, %v634_v6, 0.0 }
 0x13c   : > { %v607_v8 = vpop.xlane.xlu1 %606  ;;  %v644_v9 = vadd.f32 %v643_v7, %v633_v5  ;;  %826 = vmatpush.bf16.msrb.mxu1 %v1336_v26 }
 0x13d   : > { %v621_v10 = vmul.f32 %v1608_v56, %v607_v8  ;;  %v1302_v8 = vor.u32 %v1353_v58, %v1299_v1 }
 0x13e   : > { %645 = vadd.xlane.f32.xlu2 %v644_v9  ;;  %v1352_v9 = vld [vmem:[%s1878_s7 + $0x64] sm:$0xf0] }
 0x13f   : > { %v1631_v11 = vsub.f32 %v592_v34, %v621_v10  ;;  %v1633_v12 = vsub.f32 %v593_v35, %v621_v10  ;;  %v1330_v35 = vld [vmem:[%s1876_s5] sm:$0xff]  ;;  %990 = vmatpush.bf16.msrb.mxu2 %v1302_v8  ;;  %1363 = vmatpush.bf16.msra.mxu3 %v1302_v8 }
 0x140   : > { %827 = vmatpush.bf16.msrb.mxu1 %v1335_v27  ;;  %v1351_v10 = vld [vmem:[%s1878_s7 + $0x64] sm:$0xf] }
 0x141   : > { %v635_v13 = vmul.f32 %v1631_v11, %v1631_v11  ;;  %v636_v14 = vmul.f32 %v1633_v12, %v1633_v12 }
 0x143   : > { %v647_v15 = vsel %vm505_vm0, %v636_v14, 0.0 }
 0x144   : > { %v611_v16 = vpop.xlane.xlu1 %610  ;;  %v648_v17 = vadd.f32 %v647_v15, %v635_v13  ;;  %828 = vmatpush.bf16.msrb.mxu1 %v1334_v28  ;;  %v1291_v13 = vld [vmem:[%s1878_s7 + $0x68] sm:$0xf0] }
 0x145   : > { %v622_v18 = vmul.f32 %v1608_v56, %v611_v16  ;;  %v1294_v16 = vor.u32 %v1351_v10, %v1291_v13  ;;  %v1346_v10 = vld [vmem:[%s1878_s7 + $0x34] sm:$0xf0]  ;;  %v1345_v13 = vld [vmem:[%s1878_s7 + $0x34] sm:$0xf] }
 0x146   : > { %649 = vadd.xlane.f32.xlu0 %v648_v17  ;;  %v1281_v17 = vld [vmem:[%s1878_s7 + $0x50] sm:$0xf] }
 0x147   : > { %v1641_v19 = vsub.f32 %v594_v47, %v622_v18  ;;  %v1643_v20 = vsub.f32 %v595_v46, %v622_v18  ;;  %v1350_v18 = vld [vmem:[%s1878_s7 + $0x54] sm:$0xf0]  ;;  %991 = vmatpush.bf16.msrb.mxu2 %v1294_v16  ;;  %1364 = vmatpush.bf16.msra.mxu3 %v1294_v16  ;;  %v1343_v16 = vld [vmem:[%s1878_s7 + $0x24] sm:$0xf] }
 0x148   : > { %829 = vmatpush.bf16.msrb.mxu1 %v1333_v29  ;;  %v1282_v30 = vor.u32 %v1350_v18, %v1281_v17  ;;  %v1259_v18 = vld [vmem:[%s1878_s7 + $0x28] sm:$0xf0] }
 0x149   : > { %v637_v21 = vmul.f32 %v1641_v19, %v1641_v19  ;;  %v638_v22 = vmul.f32 %v1643_v20, %v1643_v20 }
 0x14b   : > { %v651_v23 = vsel %vm505_vm0, %v638_v22, 0.0 }
 0x14c   : > { %v652_v24 = vadd.f32 %v651_v23, %v637_v21  ;;  %830 = vmatpush.bf16.msrb.mxu1 %v1332_v31  ;;  %v1349_v23 = vld [vmem:[%s1878_s7 + $0x54] sm:$0xf] }
 0x14e   : > { %653 = vadd.xlane.f32.xlu1 %v652_v24  ;;  %v1283_v24 = vld [vmem:[%s1878_s7 + $0x58] sm:$0xf0] }
 0x150   : > { %831 = vmatpush.bf16.msrb.mxu1 %v1331_v32 }
 0x154   : > { %832 = vmatpush.bf16.msrb.mxu1 %v1330_v35 }
 0x158   : > { %1355 = vmatpush.bf16.msra.mxu1 %v1298_v0 }
 0x1a9   : > { %v642_v33 = vpop.xlane.xlu2 %641 }
 0x1aa   : > { %v655_v34 = vmul.f32 %v642_v33, %v1608_v56 }
 0x1ac   : > { %v659_v36 = vadd.f32 1e-05, %v655_v34  ;;  %v1286_v34 = vor.u32 %v1349_v23, %v1283_v24  ;;  %v1342_v23 = vld [vmem:[%s1878_s7 + $0x14] sm:$0xf0]  ;;  %v1341_v24 = vld [vmem:[%s1878_s7 + $0x14] sm:$0xf] }
 0x1ae   : > { %1383 = vrsqrt.f32 %v659_v36  ;;  %vm669_vm3 = vweird.f32 %v659_v36  ;;  %992 = vmatpush.bf16.msrb.mxu2 %v1286_v34  ;;  %1365 = vmatpush.bf16.msra.mxu3 %v1286_v34 }
 0x1b1   : > { %v646_v37 = vpop.xlane.xlu2 %645 }
 0x1b2   : > { %v656_v38 = vmul.f32 %v646_v37, %v1608_v56 }
 0x1b4   : > { %v1384_v39 = vpop.eup %1383  ;;  %v660_v40 = vadd.f32 1e-05, %v656_v38 }
 0x1b5   : > { %v664_v41 = vmul.f32 %v1384_v39, %v659_v36  ;;  %vm670_vm2 = vweird.f32 %v1384_v39 }
 0x1b6   : > { %1385 = vrsqrt.f32 %v660_v40  ;;  %vm671_vm4 = vmor %vm669_vm3, %vm670_vm2  ;;  %vm679_vm6 = vweird.f32 %v660_v40 }
 0x1b7   : > { %v665_v42 = vmul.f32 %v1384_v39, %v664_v41 }
 0x1b9   : > { %v666_v43 = vmul.f32 0.5, %v665_v42  ;;  %v650_v44 = vpop.xlane.xlu0 %649 }
 0x1ba   : > { %v657_v45 = vmul.f32 %v650_v44, %v1608_v56 }
 0x1bb   : > { %v667_v46 = vsub.f32 1.5, %v666_v43 }
 0x1bc   : > { %v1386_v47 = vpop.eup %1385  ;;  %v1680_v48 = vadd.f32 1e-05, %v657_v45 }
 0x1bd   : > { %v668_v50 = vmul.f32 %v1384_v39, %v667_v46  ;;  %v674_v51 = vmul.f32 %v1386_v47, %v660_v40  ;;  %vm680_vm5 = vweird.f32 %v1386_v47 }
 0x1be   : > { %1387 = vrsqrt.f32 %v1680_v48  ;;  %vm681_vm7 = vmor %vm679_vm6, %vm680_vm5  ;;  %vm689_vm9 = vweird.f32 %v1680_v48 }
 0x1bf   : > { %v672_v52 = vsel %vm671_vm4, %v1384_v39, %v668_v50  ;;  %v675_v53 = vmul.f32 %v1386_v47, %v674_v51 }
 0x1c0   : > { %v703_v5 = vmul.f32 %v672_v52, %v1611_v59  ;;  %v704_v6 = vmul.f32 %v672_v52, %v1613_v60  ;;  %v725_v59 = vld [vmem:[%s1875_s4] sm:$0x3] }
 0x1c1   : > { %v676_v61 = vmul.f32 0.5, %v675_v53  ;;  %v654_v62 = vpop.xlane.xlu1 %653  ;;  %v727_v29 = vperm.slane %v725_v59, 0  ;;  %v728_v33 = vperm.slane %v725_v59, 1  ;;  %v1267_v59 = vld [vmem:[%s1878_s7 + $0x38] sm:$0xf0] }
 0x1c2   : > { %v658_v7 = vmul.f32 %v654_v62, %v1608_v56  ;;  %v1290_v56 = vor.u32 %v1352_v9, %v1289_v2  ;;  %v717_v25 = vmul.f32 %v1686_v54, %v703_v5  ;;  %v718_v26 = vmul.f32 %v1697_v63, %v704_v6  ;;  %v1347_v5 = vld [vmem:[%s1878_s7 + $0x44] sm:$0xf]  ;;  %v1265_v9 = vld [vmem:[%s1878_s7 + $0x30] sm:$0xf] }
 0x1c3   : > { %v677_v14 = vsub.f32 1.5, %v676_v61 }
 0x1c4   : > { %v1388_v60 = vpop.eup %1387  ;;  %v662_v15 = vadd.f32 1e-05, %v658_v7  ;;  %972 = vmatpush.bf16.msrb.mxu0 %v1290_v56  ;;  %1356 = vmatpush.bf16.msra.mxu1 %v1290_v56  ;;  %v1740_v39 = vadd.f32 %v727_v29, %v717_v25  ;;  %v1275_v7 = vld [vmem:[%s1878_s7 + $0x48] sm:$0xf0]  ;;  %v1270_v56 = vor.u32 %v1345_v13, %v1267_v59 }
 0x1c5   : > { %v678_v21 = vmul.f32 %v1386_v47, %v677_v14  ;;  %v684_v22 = vmul.f32 %v1388_v60, %v1680_v48  ;;  %vm690_vm8 = vweird.f32 %v1388_v60  ;;  %v1278_v8 = vor.u32 %v1347_v5, %v1275_v7 }
 0x1c6   : > { %1389 = vrsqrt.f32 %v662_v15  ;;  %vm691_vm10 = vmor %vm689_vm9, %vm690_vm8  ;;  %vm699_vm12 = vweird.f32 %v662_v15  ;;  %v1266_v14 = vor.u32 %v1346_v10, %v1265_v9 }
 0x1c7   : > { %v682_v27 = vsel %vm681_vm7, %v1386_v47, %v678_v21  ;;  %v685_v28 = vmul.f32 %v1388_v60, %v684_v22  ;;  %993 = vmatpush.bf16.msrb.mxu2 %v1278_v8  ;;  %1366 = vmatpush.bf16.msra.mxu3 %v1278_v8  ;;  %v1262_v21 = vor.u32 %v1343_v16, %v1259_v18  ;;  %v1249_v22 = vld [vmem:[%s1878_s7 + $0x10] sm:$0xf] }
 0x1c8   : > { %v705_v31 = vmul.f32 %v682_v27, %v1621_v3  ;;  %v706_v32 = vmul.f32 %v682_v27, %v1623_v4  ;;  %973 = vmatpush.bf16.msrb.mxu0 %v1282_v30  ;;  %1357 = vmatpush.bf16.msra.mxu1 %v1282_v30  ;;  %v1744_v3 = vadd.f32 %v728_v33, %v718_v26  ;;  %v1251_v26 = vld [vmem:[%s1878_s7 + $0x18] sm:$0xf0]  ;;  %v1339_v30 = vld [vmem:[%s1878_s7 + $0x4] sm:$0xf] }
 0x1c9   : > { %v686_v35 = vmul.f32 0.5, %v685_v28  ;;  %v1250_v25 = vor.u32 %v1342_v23, %v1249_v22  ;;  %v1254_v27 = vor.u32 %v1341_v24, %v1251_v26  ;;  %v1241_v28 = vld [vmem:[%s1878_s7] sm:$0xf] }
 0x1ca   : > { %v719_v36 = vmul.f32 %v1686_v54, %v705_v31  ;;  %v720_v37 = vmul.f32 %v1697_v63, %v706_v32  ;;  %v1243_v32 = vld [vmem:[%s1878_s7 + $0x8] sm:$0xf0] }
 0x1cb   : > { %v687_v38 = vsub.f32 1.5, %v686_v35  ;;  %994 = vmatpush.bf16.msrb.mxu2 %v1270_v56  ;;  %1367 = vmatpush.bf16.msra.mxu3 %v1270_v56 }
 0x1cc   : > { %v1390_v40 = vpop.eup %1389  ;;  %v1742_v41 = vadd.f32 %v727_v29, %v719_v36  ;;  %v1746_v4 = vadd.f32 %v728_v33, %v720_v37  ;;  %v1380_v36 = vld [vmem:[%s1877_s6] ss:$0 sm:$0xff] }
 0x1cd   : > { %v688_v42 = vmul.f32 %v1388_v60, %v687_v38  ;;  %v694_v43 = vmul.f32 %v1390_v40, %v662_v15  ;;  %vm700_vm11 = vweird.f32 %v1390_v40  ;;  %v1344_v15 = vld [vmem:[%s1878_s7 + $0x24] sm:$0xf0] }
 0x1ce   : > { %v739_v44 = vpack.c.bf16 %v1742_v41, %v1740_v39  ;;  %v740_v45 = vpack.c.bf16 %v1746_v4, %v1744_v3  ;;  %vm701_vm13 = vmor %vm699_vm12, %vm700_vm11 }
 0x1cf   : > { %v695_v46 = vmul.f32 %v1390_v40, %v694_v43  ;;  %v692_v49 = vsel %vm691_vm10, %v1388_v60, %v688_v42  ;;  %v1257_v60 = vld [vmem:[%s1878_s7 + $0x20] sm:$0xf]  ;;  %995 = vmatpush.bf16.msrb.mxu2 %v1262_v21  ;;  %1368 = vmatpush.bf16.msra.mxu3 %v1262_v21 }
 0x1d0   : > { %833 = vmatmul.bf16.vlgmr.msrb.gmra.mxu1 %v739_v44  ;;  %1237 = vmatmul.msk.bf16.vlgmr.msrb.gmra.mxu3 %vm505_vm0, %v740_v45  ;;  %v707_v51 = vmul.f32 %v692_v49, %v1631_v11  ;;  %v708_v52 = vmul.f32 %v692_v49, %v1633_v12  ;;  %v1258_v17 = vor.u32 %v1344_v15, %v1257_v60 }
 0x1d1   : > { %v696_v47 = vmul.f32 0.5, %v695_v46 }
 0x1d2   : > { %v721_v58 = vmul.f32 %v1686_v54, %v707_v51  ;;  %v722_v61 = vmul.f32 %v1697_v63, %v708_v52 }
 0x1d3   : > { %v697_v50 = vsub.f32 1.5, %v696_v47  ;;  %996 = vmatpush.bf16.msrb.mxu2 %v1254_v27  ;;  %1369 = vmatpush.bf16.msra.mxu3 %v1254_v27 }
 0x1d4   : > { %v1762_v1 = vadd.f32 %v727_v29, %v721_v58  ;;  %v1766_v12 = vadd.f32 %v728_v33, %v722_v61 }
 0x1d5   : > { %v698_v53 = vmul.f32 %v1390_v40, %v697_v50 }
 0x1d7   : > { %v702_v55 = vsel %vm701_vm13, %v1390_v40, %v698_v53 }
 0x1d8   : > { %v709_v57 = vmul.f32 %v702_v55, %v1641_v19  ;;  %v710_v48 = vmul.f32 %v702_v55, %v1643_v20 }
 0x1da   : > { %v723_v62 = vmul.f32 %v1686_v54, %v709_v57  ;;  %v724_v0 = vmul.f32 %v1697_v63, %v710_v48  ;;  %v1273_v54 = vld [vmem:[%s1878_s7 + $0x40] sm:$0xf]  ;;  %v1348_v63 = vld [vmem:[%s1878_s7 + $0x44] sm:$0xf0] }
 0x1db   : > { %v1274_v6 = vor.u32 %v1348_v63, %v1273_v54 }
 0x1dc   : > { %v1764_v11 = vadd.f32 %v727_v29, %v723_v62  ;;  %v1768_v2 = vadd.f32 %v728_v33, %v724_v0  ;;  %v1340_v29 = vld [vmem:[%s1878_s7 + $0x4] sm:$0xf0]  ;;  %v1246_v33 = vor.u32 %v1339_v30, %v1243_v32  ;;  %v885_v0 = vld [vmem:[%s1879_s8] sm:$0x3] }
 0x1dd   : > { %974 = vmatpush.bf16.msrb.mxu0 %v1274_v6  ;;  %1358 = vmatpush.bf16.msra.mxu1 %v1274_v6  ;;  %v1242_v31 = vor.u32 %v1340_v29, %v1241_v28  ;;  %v888_v5 = vperm.slane %v885_v0, 1 }
 0x1de   : > { %v741_v19 = vpack.c.bf16 %v1764_v11, %v1762_v1  ;;  %v742_v20 = vpack.c.bf16 %v1768_v2, %v1766_v12  ;;  %997 = vmatpush.bf16.msrb.mxu2 %v1246_v33  ;;  %1370 = vmatpush.bf16.msra.mxu3 %v1246_v33 }
 0x1e0   : > { %838 = vmatmul.bf16.gmra.mxu1 %v741_v19  ;;  %1238 = vmatmul.msk.bf16.gmra.mxu3 %vm505_vm0, %v742_v20  ;;  %v887_v19 = vperm.slane %v885_v0, 0 }
 0x1e1   : > { %975 = vmatpush.bf16.msrb.mxu0 %v1266_v14  ;;  %1359 = vmatpush.bf16.msra.mxu1 %v1266_v14 }
 0x1e5   : > { %976 = vmatpush.bf16.msrb.mxu0 %v1258_v17  ;;  %1360 = vmatpush.bf16.msra.mxu1 %v1258_v17 }
 0x1e9   : > { %977 = vmatpush.bf16.msrb.mxu0 %v1250_v25  ;;  %1361 = vmatpush.bf16.msra.mxu1 %v1250_v25 }
 0x1ed   : > { %978 = vmatpush.bf16.msrb.mxu0 %v1242_v31  ;;  %1362 = vmatpush.bf16.msra.mxu1 %v1242_v31 }
 0x24d   : > { %v834_v34 = vpop.f32.mrf.mxu1 }
 0x24e   : > { %v835_v38 = vadd.f32 %v1380_v36, %v834_v34 }
 0x253   : > { %v853_v35 = vpop.f32.mrf.mxu3 }
 0x254   : > { %v854_v40 = vadd.f32 %v853_v35, %v835_v38 }
 0x255   : > { %v836_v37 = vpop.f32.mrf.mxu1 }
 0x256   : > { %v837_v42 = vadd.f32 %v1380_v36, %v836_v37  ;;  %v863_v46 = vmax.f32 %v854_v40, 0.0 }
 0x25b   : > { %v855_v43 = vpop.f32.mrf.mxu3 }
 0x25c   : > { %v856_v44 = vadd.f32 %v855_v43, %v837_v42 }
 0x25d   : > { %v839_v45 = vpop.f32.mrf.mxu1 }
 0x25e   : > { %v864_v47 = vmax.f32 %v856_v44, 0.0  ;;  %v840_v52 = vadd.f32 %v1380_v36, %v839_v45 }
 0x260   : > { %v867_v49 = vpack.c.bf16 %v864_v47, %v863_v46 }
 0x262   : > { %979 = vmatmul.bf16.vlgmr.msrb.gmra.mxu0 %v867_v49  ;;  %998 = vmatmul.bf16.vlgmr.msrb.gmra.mxu2 %v867_v49 }
 0x263   : > { %v858_v50 = vpop.f32.mrf.mxu3 }
 0x264   : > { %v859_v53 = vadd.f32 %v858_v50, %v840_v52 }
 0x265   : > { %v841_v51 = vpop.f32.mrf.mxu1 }
 0x266   : > { %v842_v55 = vadd.f32 %v1380_v36, %v841_v51  ;;  %v865_v58 = vmax.f32 %v859_v53, 0.0 }
 0x26b   : > { %v860_v57 = vpop.f32.mrf.mxu3 }
 0x26c   : > { %v861_v48 = vadd.f32 %v860_v57, %v842_v55 }
 0x26e   : > { %v866_v61 = vmax.f32 %v861_v48, 0.0 }
 0x270   : > { %v868_v62 = vpack.c.bf16 %v866_v61, %v865_v58 }
 0x272   : > { %984 = vmatmul.bf16.vlgmr.msra.gmra.mxu1 %v868_v62  ;;  %1003 = vmatmul.bf16.vlgmr.msra.gmra.mxu3 %v868_v62 }
 0x2df   : > { %v980_v20 = vpop.f32.mrf.mxu0 }
 0x2e0   : > { %v981_v54 = vadd.f32 %v980_v20, %v887_v19 }
 0x2e2   : > { %v1009_v63 = vadd.f32 %v981_v54, %v1740_v39 }
 0x2e4   : > { %1017 = vst [vmem:[%s1846_s17] sm:$0xff] %v1009_v63 }
 0x2e5   : > { %v999_v6 = vpop.f32.mrf.mxu2 }
 0x2e6   : > { %v1000_v7 = vadd.f32 %v999_v6, %v888_v5 }
 0x2e7   : > { %v982_v8 = vpop.f32.mrf.mxu0 }
 0x2e8   : > { %v1010_v9 = vadd.f32 %v1000_v7, %v1744_v3  ;;  %v983_v10 = vadd.f32 %v982_v8, %v887_v19 }
 0x2ea   : > { %1018 = vst.msk [vmem:[%s1846_s17 + $0x8] sm:$0xff] %vm505_vm0, %v1010_v9  ;;  %v1011_v13 = vadd.f32 %v983_v10, %v1742_v41 }
 0x2ec   : > { %1019 = vst [vmem:[%s1846_s17 + $0x10] sm:$0xff] %v1011_v13 }
 0x2ed   : > { %v1001_v14 = vpop.f32.mrf.mxu2 }
 0x2ee   : > { %v1002_v59 = vadd.f32 %v1001_v14, %v888_v5 }
 0x2ef   : > { %v985_v39 = vpop.f32.mrf.mxu1 }
 0x2f0   : > { %v1012_v56 = vadd.f32 %v1002_v59, %v1746_v4  ;;  %v986_v60 = vadd.f32 %v985_v39, %v887_v19 }
 0x2f2   : > { %1020 = vst.msk [vmem:[%s1846_s17 + $0x18] sm:$0xff] %vm505_vm0, %v1012_v56  ;;  %v1013_v15 = vadd.f32 %v986_v60, %v1762_v1 }
 0x2f4   : > { %1021 = vst [vmem:[%s1846_s17 + $0x20] sm:$0xff] %v1013_v15 }
 0x2f5   : > { %v1004_v3 = vpop.f32.mrf.mxu3 }
 0x2f6   : > { %v1005_v16 = vadd.f32 %v1004_v3, %v888_v5 }
 0x2f7   : > { %v987_v17 = vpop.f32.mrf.mxu1 }
 0x2f8   : > { %v1014_v18 = vadd.f32 %v1005_v16, %v1766_v12  ;;  %v988_v41 = vadd.f32 %v987_v17, %v887_v19 }
 0x2fa   : > { %1022 = vst.msk [vmem:[%s1846_s17 + $0x28] sm:$0xff] %vm505_vm0, %v1014_v18  ;;  %v1015_v21 = vadd.f32 %v988_v41, %v1764_v11 }
 0x2fc   : > { %1023 = vst [vmem:[%s1846_s17 + $0x30] sm:$0xff] %v1015_v21 }
 0x2fd   : > { %v1006_v22 = vpop.f32.mrf.mxu3 }
 0x2fe   : > { %v1007_v4 = vadd.f32 %v1006_v22, %v888_v5 }
 0x300   : > { %v1016_v23 = vadd.f32 %v1007_v4, %v1768_v2 }
 0x302   : > { %1024 = vst.msk [vmem:[%s1846_s17 + $0x38] sm:$0xff] %vm505_vm0, %v1016_v23 }
 0x303 PF: > { %s19_s30 = sadd.s32 1, %s1397_s30  }
 0x304   : > { %p16_p4 = scmp.ge.s32.totalorder %s19_s30, 4  }
 0x306   :  { %18 = sbr.rel (!%p16_p4) target bundleno = 1 (0x1), region = 89 }

</bundles_post_ra>
